<compile_context>
chip_gen: v5e
topology: v5e:2x2
jax: 0.10.0
libtpu: 0.0.40
codegen_flags: <defaults>
</compile_context>

<pallas_src>
import numpy as np
import jax
import jax.numpy as jnp
from jax.experimental import pallas as pl
from jax.experimental.pallas import tpu as pltpu


# ----------------------------------------------------------------------------
# Pallas kernel: full recurrence + final-timestep gather + classifier Linear.
# ----------------------------------------------------------------------------
def make_semiseq_kernel(L):
    def kernel(*args):
        sl_ref, x_ref, wx0_ref, wh0_ref = args[0], args[1], args[2], args[3]
        wxh_refs = args[4:4 + (L - 1)]            # (4H, 8H) fused [Wx ; Wh], l>=1
        b_refs = args[4 + (L - 1):4 + (L - 1) + L]  # (1, 8H) packed biases
        wc_ref = args[4 + (L - 1) + L]            # (2H, C) classifier weight (bf16)
        bc_ref = args[5 + (L - 1) + L]            # (1, C)  classifier bias (f32)
        pred_ref = args[6 + (L - 1) + L]          # (Bp, C) output
        gx0_ref = args[7 + (L - 1) + L]           # VMEM scratch (T*Bp, 8H) f32

        TB, _Din = x_ref.shape
        Bp = pred_ref.shape[0]
        T = TB // Bp
        HH = wh0_ref.shape[0]                     # 2H (both directions concatenated)
        G = wh0_ref.shape[1]                      # 8H packed gate width

        sl = sl_ref[...]                          # (Bp, 1) int32 valid lengths

        # Layer-0 input projection for every timestep: one batched bf16 matmul, off
        # the serial recurrence path, layer-0 bias folded in, written once to VMEM
        # scratch so it is NOT carried live in vregs across the unrolled loop.
        gx0_ref[...] = (jnp.dot(x_ref[...], wx0_ref[...],
                                preferred_element_type=jnp.float32)
                        + b_refs[0][...])

        # Hoist loop-invariant bias broadcasts (JAX does not CSE broadcast_in_dim).
        biases = [jnp.broadcast_to(b_refs[l][...], (Bp, G)) for l in range(1, L)]

        # Hidden state per layer and the gathered final output, carried as values.
        h = [jnp.zeros((Bp, HH), jnp.float32) for _ in range(L)]
        fin = jnp.zeros((Bp, HH), jnp.float32)

        layer_out = None
        for t in range(T):                        # static unroll: T compile-time const
            for l in range(L):                    # static: stacked layers
                if l == 0:
                    # layer 0: input part precomputed -> one K=2H matmul per step.
                    g = gx0_ref[pl.ds(t * Bp, Bp), :] + jnp.dot(
                        h[0].astype(jnp.bfloat16), wh0_ref[...],
                        preferred_element_type=jnp.float32)
                else:
                    # layers 1..L-1: input + hidden fused into one K=4H(=128) matmul.
                    lhs = jnp.concatenate([layer_out, h[l]], axis=-1)
                    g = jnp.dot(lhs.astype(jnp.bfloat16), wxh_refs[l - 1][...],
                                preferred_element_type=jnp.float32) + biases[l - 1]
                # column blocks: [r | z | n_input | n_hidden], each 2H wide,
                # with both directions side by side ([dir0 | dir1]) inside a block.
                s = jax.nn.sigmoid(g[:, :2 * HH])     # r and z in one EUP pass
                r = s[:, :HH]
                z = s[:, HH:]
                n = jnp.tanh(g[:, 2 * HH:3 * HH] + r * g[:, 3 * HH:])
                h[l] = n + z * (h[l] - n)             # == (1-z)*n + z*h
                layer_out = h[l]                       # (Bp, 2H), next layer's input
            # keep the last-layer output at each sample's final valid timestep
            fin = jnp.where(sl == (t + 1), layer_out, fin)

        # Classification (cl_num_layers = 1): single Linear on hidden[0, :, :]
        pred_ref[...] = (jnp.dot(fin.astype(jnp.bfloat16), wc_ref[...],
                                 preferred_element_type=jnp.float32)
                         + bc_ref[...])
    return kernel


# ----------------------------------------------------------------------------
# Weight packing: raw per-gate GRU weights -> fused bf16 block matrices.
#   layer 0:  wx0 (Din, 8H), wh0 (2H, 8H)
#   layer l>0: wxh_l (4H, 8H)   rows = [previous-layer output (2H) ; own hidden (2H)]
#   biases:   b_l (1, 8H) f32
# Column blocks: [r_sum | z_sum | n_input | n_hidden], each 2H wide = [dir0 | dir1].
# ----------------------------------------------------------------------------
def pack_gru_params(p, mx_dtype=jnp.bfloat16):
    H, L = int(p["H"]), int(p["L"])
    HH = 2 * H
    G = 8 * H
    wih0 = np.asarray(p["wih0"], np.float32)   # (2, Din, 3H)
    wihr = np.asarray(p["wihr"], np.float32)   # (max(L-1,1), 2, 2H, 3H)
    whh = np.asarray(p["whh"], np.float32)     # (L, 2, H, 3H)
    bih = np.asarray(p["bih"], np.float32)     # (L, 2, 1, 3H)
    bhh = np.asarray(p["bhh"], np.float32)     # (L, 2, 1, 3H)
    Din = wih0.shape[1]

    wx0 = np.zeros((Din, G), np.float32)
    wh0 = np.zeros((HH, G), np.float32)
    wxh_list, b_list = [], []
    for l in range(L):
        bih_l = bih[l, :, 0]                   # (2, 3H)
        bhh_l = bhh[l, :, 0]                   # (2, 3H)
        bb = np.zeros((1, G), np.float32)
        for d in range(2):
            c = d * H
            bb[0, 0 * HH + c:0 * HH + c + H] = bih_l[d, 0:H] + bhh_l[d, 0:H]
            bb[0, 1 * HH + c:1 * HH + c + H] = bih_l[d, H:2 * H] + bhh_l[d, H:2 * H]
            bb[0, 2 * HH + c:2 * HH + c + H] = bih_l[d, 2 * H:3 * H]
            bb[0, 3 * HH + c:3 * HH + c + H] = bhh_l[d, 2 * H:3 * H]
        b_list.append(jnp.asarray(bb, jnp.float32))

        if l == 0:
            for d in range(2):
                c = d * H
                wx0[:, 0 * HH + c:0 * HH + c + H] = wih0[d, :, 0:H]
                wx0[:, 1 * HH + c:1 * HH + c + H] = wih0[d, :, H:2 * H]
                wx0[:, 2 * HH + c:2 * HH + c + H] = wih0[d, :, 2 * H:3 * H]
                wh0[d * H:(d + 1) * H, 0 * HH + c:0 * HH + c + H] = whh[0, d, :, 0:H]
                wh0[d * H:(d + 1) * H, 1 * HH + c:1 * HH + c + H] = whh[0, d, :, H:2 * H]
                wh0[d * H:(d + 1) * H, 3 * HH + c:3 * HH + c + H] = whh[0, d, :, 2 * H:3 * H]
        else:
            wxh = np.zeros((2 * HH, G), np.float32)
            for d in range(2):
                c = d * H
                # input rows 0:2H (previous layer output, both directions)
                wxh[0:HH, 0 * HH + c:0 * HH + c + H] = wihr[l - 1, d, :, 0:H]
                wxh[0:HH, 1 * HH + c:1 * HH + c + H] = wihr[l - 1, d, :, H:2 * H]
                wxh[0:HH, 2 * HH + c:2 * HH + c + H] = wihr[l - 1, d, :, 2 * H:3 * H]
                # hidden rows 2H:4H (own hidden, direction-diagonal)
                rs = HH + d * H
                wxh[rs:rs + H, 0 * HH + c:0 * HH + c + H] = whh[l, d, :, 0:H]
                wxh[rs:rs + H, 1 * HH + c:1 * HH + c + H] = whh[l, d, :, H:2 * H]
                wxh[rs:rs + H, 3 * HH + c:3 * HH + c + H] = whh[l, d, :, 2 * H:3 * H]
            wxh_list.append(jnp.asarray(wxh, mx_dtype))
    return jnp.asarray(wx0, mx_dtype), jnp.asarray(wh0, mx_dtype), wxh_list, b_list


# ----------------------------------------------------------------------------
# Wrapper (glue: time-major transpose, batch padding to 8 sublanes, pallas_call)
# ----------------------------------------------------------------------------
def semiseq_forward(x, seq_len, p):
    """x: (B, T, D_in) batch_first (PyTorch convention); seq_len: (B,) ints in [1, T]."""
    B, T, Din = x.shape
    H, L, C = int(p["H"]), int(p["L"]), int(p["C"])
    Bp = max(8, int(np.ceil(B / 8.0)) * 8)              # pad to f32 sublane multiple

    x_tm = jnp.transpose(x, (1, 0, 2)).astype(jnp.float32)   # (T, B, D_in)
    if Bp != B:
        x_tm = jnp.pad(x_tm, ((0, 0), (0, Bp - B), (0, 0)))
    x_flat = x_tm.reshape(T * Bp, Din).astype(jnp.bfloat16)  # bf16 MXU operand

    # clamp guards seq_len outside [1, T]; padded rows get 0 so their mask never fires
    sl_valid = jnp.clip(seq_len.astype(jnp.int32), 1, T)
    sl = jnp.zeros((Bp, 1), jnp.int32).at[:B, 0].set(sl_valid)

    wx0, wh0, wxh_list, b_list = pack_gru_params(p)
    wc = jnp.asarray(p["wc"], jnp.bfloat16)
    bc = jnp.asarray(p["bc"], jnp.float32)

    n_in = 4 + (L - 1) + L + 2
    pred = pl.pallas_call(
        make_semiseq_kernel(L),
        out_shape=jax.ShapeDtypeStruct((Bp, C), jnp.float32),
        in_specs=[pl.BlockSpec(memory_space=pltpu.MemorySpace.VMEM)] * n_in,
        out_specs=pl.BlockSpec(memory_space=pltpu.MemorySpace.VMEM),
        scratch_shapes=[pltpu.VMEM((T * Bp, 8 * H), jnp.float32)],   # gx0 scratch
    )(sl, x_flat, wx0, wh0, *wxh_list, *b_list, wc, bc)
    return pred[:B]


# ----------------------------------------------------------------------------
# Deterministic parameter init (PyTorch-style U(-1/sqrt(H), 1/sqrt(H)))
# ----------------------------------------------------------------------------
def init_params(key, Din, H, L, C):
    ks = list(jax.random.split(key, 8))
    u = lambda k, shape, b: jax.random.uniform(k, shape, jnp.float32, -b, b)
    bg = 1.0 / np.sqrt(H)
    bc = 1.0 / np.sqrt(2 * H)
    return dict(
        H=H, L=L, C=C,
        wih0=u(ks[0], (2, Din, 3 * H), bg),                   # layer 0 input weights
        wihr=u(ks[1], (max(L - 1, 1), 2, 2 * H, 3 * H), bg),  # layers 1..L-1
        whh=u(ks[2], (L, 2, H, 3 * H), bg),
        bih=u(ks[3], (L, 2, 1, 3 * H), bg),
        bhh=u(ks[4], (L, 2, 1, 3 * H), bg),
        wc=u(ks[5], (2 * H, C), bc),
        bc=u(ks[6], (1, C), bc),
    )


# ----------------------------------------------------------------------------
# Pure-JAX reference (mirrors the PyTorch module's per-timestep feeding).
# mx_dtype selects the matmul operand dtype: float32 = exact module semantics,
# bfloat16 = numerics-matched mirror of the kernel's MXU precision.
# ----------------------------------------------------------------------------
def ref_forward(x, seq_len, p, mx_dtype=jnp.float32):
    B, T, Din = x.shape
    H, L = p["H"], p["L"]
    hp = jax.lax.Precision.HIGHEST

    def mm(a, w):
        return jnp.dot(a.astype(mx_dtype), w.astype(mx_dtype),
                       precision=hp, preferred_element_type=jnp.float32)

    h = jnp.zeros((L, 2, B, H), jnp.float32)
    outs = []
    for t in range(T):
        layer_in = x[:, t, :]
        for l in range(L):
            new = []
            for d in range(2):
                wih = p["wih0"][d] if l == 0 else p["wihr"][l - 1, d]
                gi = mm(layer_in, wih) + p["bih"][l, d, 0]
                gh = mm(h[l, d], p["whh"][l, d]) + p["bhh"][l, d, 0]
                r = jax.nn.sigmoid(gi[:, :H] + gh[:, :H])
                z = jax.nn.sigmoid(gi[:, H:2 * H] + gh[:, H:2 * H])
                n = jnp.tanh(gi[:, 2 * H:] + r * gh[:, 2 * H:])
                hn = (1.0 - z) * n + z * h[l, d]
                h = h.at[l, d].set(hn)
                new.append(hn)
            layer_in = jnp.concatenate(new, axis=-1)
        outs.append(layer_in)
    enc = jnp.stack(outs, axis=1)                       # (B, T, 2H)
    final = enc[jnp.arange(B), seq_len - 1, :]          # hidden[0, b, :] in PyTorch
    return mm(final, p["wc"]) + p["bc"][0]


if __name__ == "__main__":
    B, T, Din, H, L, C = 4, 8, 16, 32, 3, 8   # en_input_size=16, en_hidden_size=32,
                                              # en_num_layers=3, cla_dim=[8]
    key = jax.random.PRNGKey(0)
    kx, kp = jax.random.split(key)
    x = jax.random.normal(kx, (B, T, Din), jnp.float32)
    seq_len = jnp.array([8, 5, 3, 8], jnp.int32)        # max(seq_len) == T
    params = init_params(kp, Din, H, L, C)

    pred = jax.block_until_ready(semiseq_forward(x, seq_len, params))

    # Tight check vs a bf16-MXU-mirrored reference (validates packing / recurrence).
    ref_bf16 = ref_forward(x, seq_len, params, mx_dtype=jnp.bfloat16)
    np.testing.assert_allclose(np.asarray(pred), np.asarray(ref_bf16),
                               rtol=1e-2, atol=1e-2)
    # Loose check vs the exact f32 module semantics (bounds bf16 operand rounding).
    ref_f32 = ref_forward(x, seq_len, params, mx_dtype=jnp.float32)
    np.testing.assert_allclose(np.asarray(pred), np.asarray(ref_f32),
                               rtol=1e-1, atol=1e-1)
    print("KERNEL_OK")
</pallas_src>

<mosaic_0001>
module attributes {stable_mosaic.version = 11 : i64} {
  func.func @kernel(%arg0: memref<8x1xi32, #tpu.memory_space<vmem>>, %arg1: memref<64x16xbf16, #tpu.memory_space<vmem>>, %arg2: memref<16x256xbf16, #tpu.memory_space<vmem>>, %arg3: memref<64x256xbf16, #tpu.memory_space<vmem>>, %arg4: memref<128x256xbf16, #tpu.memory_space<vmem>>, %arg5: memref<128x256xbf16, #tpu.memory_space<vmem>>, %arg6: memref<1x256xf32, #tpu.memory_space<vmem>>, %arg7: memref<1x256xf32, #tpu.memory_space<vmem>>, %arg8: memref<1x256xf32, #tpu.memory_space<vmem>>, %arg9: memref<64x8xbf16, #tpu.memory_space<vmem>>, %arg10: memref<1x8xf32, #tpu.memory_space<vmem>>, %arg11: memref<8x8xf32, #tpu.memory_space<vmem>>, %arg12: memref<64x256xf32, #tpu.memory_space<vmem>>) attributes {dimension_semantics = [], scalar_prefetch = 0 : i64, scratch_operands = 1 : i64, tpu.core_type = #tpu.core_type<tc>} {
    %c0 = arith.constant 0 : index
    %c0_0 = arith.constant 0 : index
    %0 = vector.load %arg0[%c0, %c0_0] : memref<8x1xi32, #tpu.memory_space<vmem>>, vector<8x1xi32>
    %c0_1 = arith.constant 0 : index
    %c0_2 = arith.constant 0 : index
    %1 = vector.load %arg1[%c0_1, %c0_2] : memref<64x16xbf16, #tpu.memory_space<vmem>>, vector<64x16xbf16>
    %c0_3 = arith.constant 0 : index
    %c0_4 = arith.constant 0 : index
    %2 = vector.load %arg2[%c0_3, %c0_4] : memref<16x256xbf16, #tpu.memory_space<vmem>>, vector<16x256xbf16>
    %cst = arith.constant dense<0.000000e+00> : vector<64x256xf32>
    %3 = tpu.matmul %1, %2, %cst {dimension_numbers = #tpu.dot_dimension_numbers<[1], [0], [0], [1], [0, 0, 1, 1], [], []>} : vector<64x16xbf16>, vector<16x256xbf16>, vector<64x256xf32> -> vector<64x256xf32>
    %c0_5 = arith.constant 0 : index
    %c0_6 = arith.constant 0 : index
    %4 = vector.load %arg6[%c0_5, %c0_6] : memref<1x256xf32, #tpu.memory_space<vmem>>, vector<1x256xf32>
    %5 = vector.broadcast %4 : vector<1x256xf32> to vector<64x256xf32>
    %6 = arith.addf %3, %5 : vector<64x256xf32>
    %c0_7 = arith.constant 0 : index
    %c0_8 = arith.constant 0 : index
    %7 = vector.load %arg12[%c0_7, %c0_8] : memref<64x256xf32, #tpu.memory_space<vmem>>, vector<64x256xf32>
    tpu.vector_store %arg12[%c0_7, %c0_8], %6 {strides = array<i32>} : memref<64x256xf32, #tpu.memory_space<vmem>>, vector<64x256xf32>,
    %c0_9 = arith.constant 0 : index
    %c0_10 = arith.constant 0 : index
    %8 = vector.load %arg7[%c0_9, %c0_10] : memref<1x256xf32, #tpu.memory_space<vmem>>, vector<1x256xf32>
    %9 = vector.shape_cast %8 : vector<1x256xf32> to vector<1x256xf32>
    %10 = vector.broadcast %9 : vector<1x256xf32> to vector<8x256xf32>
    %c0_11 = arith.constant 0 : index
    %c0_12 = arith.constant 0 : index
    %11 = vector.load %arg8[%c0_11, %c0_12] : memref<1x256xf32, #tpu.memory_space<vmem>>, vector<1x256xf32>
    %12 = vector.shape_cast %11 : vector<1x256xf32> to vector<1x256xf32>
    %13 = vector.broadcast %12 : vector<1x256xf32> to vector<8x256xf32>
    %cst_13 = arith.constant 0.000000e+00 : f32
    %14 = vector.broadcast %cst_13 : f32 to vector<8x64xf32>
    %cst_14 = arith.constant 0.000000e+00 : f32
    %15 = vector.broadcast %cst_14 : f32 to vector<8x64xf32>
    %cst_15 = arith.constant 0.000000e+00 : f32
    %16 = vector.broadcast %cst_15 : f32 to vector<8x64xf32>
    %cst_16 = arith.constant 0.000000e+00 : f32
    %17 = vector.broadcast %cst_16 : f32 to vector<8x64xf32>
    %c0_17 = arith.constant 0 : index
    %c0_18 = arith.constant 0 : index
    %18 = vector.load %arg12[%c0_17, %c0_18] : memref<64x256xf32, #tpu.memory_space<vmem>>, vector<8x256xf32>
    %19 = arith.truncf %14 : vector<8x64xf32> to vector<8x64xbf16>
    %c0_19 = arith.constant 0 : index
    %c0_20 = arith.constant 0 : index
    %20 = vector.load %arg3[%c0_19, %c0_20] : memref<64x256xbf16, #tpu.memory_space<vmem>>, vector<64x256xbf16>
    %cst_21 = arith.constant dense<0.000000e+00> : vector<8x256xf32>
    %21 = tpu.matmul %19, %20, %cst_21 {dimension_numbers = #tpu.dot_dimension_numbers<[1], [0], [0], [1], [0, 0, 1, 1], [], []>} : vector<8x64xbf16>, vector<64x256xbf16>, vector<8x256xf32> -> vector<8x256xf32>
    %22 = arith.addf %18, %21 : vector<8x256xf32>
    %23 = vector.extract_strided_slice %22 {offsets = [0, 0], sizes = [8, 128], strides = [1, 1]} : vector<8x256xf32> to vector<8x128xf32>
    %24 = arith.negf %23 : vector<8x128xf32>
    %25 = math.exp %24 : vector<8x128xf32>
    %cst_22 = arith.constant 1.000000e+00 : f32
    %26 = vector.broadcast %cst_22 : f32 to vector<8x128xf32>
    %27 = arith.addf %26, %25 : vector<8x128xf32>
    %28 = arith.divf %26, %27 : vector<8x128xf32>
    %29 = vector.extract_strided_slice %28 {offsets = [0, 0], sizes = [8, 64], strides = [1, 1]} : vector<8x128xf32> to vector<8x64xf32>
    %30 = vector.extract_strided_slice %28 {offsets = [0, 64], sizes = [8, 64], strides = [1, 1]} : vector<8x128xf32> to vector<8x64xf32>
    %31 = vector.extract_strided_slice %22 {offsets = [0, 128], sizes = [8, 64], strides = [1, 1]} : vector<8x256xf32> to vector<8x64xf32>
    %32 = vector.extract_strided_slice %22 {offsets = [0, 192], sizes = [8, 64], strides = [1, 1]} : vector<8x256xf32> to vector<8x64xf32>
    %33 = arith.mulf %29, %32 : vector<8x64xf32>
    %34 = arith.addf %31, %33 : vector<8x64xf32>
    %35 = math.tanh %34 : vector<8x64xf32>
    %36 = arith.subf %14, %35 : vector<8x64xf32>
    %37 = arith.mulf %30, %36 : vector<8x64xf32>
    %38 = arith.addf %35, %37 : vector<8x64xf32>
    %39 = tpu.concatenate %38, %15 in 1 : vector<8x64xf32>, vector<8x64xf32> -> vector<8x128xf32>
    %40 = arith.truncf %39 : vector<8x128xf32> to vector<8x128xbf16>
    %c0_23 = arith.constant 0 : index
    %c0_24 = arith.constant 0 : index
    %41 = vector.load %arg4[%c0_23, %c0_24] : memref<128x256xbf16, #tpu.memory_space<vmem>>, vector<128x256xbf16>
    %cst_25 = arith.constant dense<0.000000e+00> : vector<8x256xf32>
    %42 = tpu.matmul %40, %41, %cst_25 {dimension_numbers = #tpu.dot_dimension_numbers<[1], [0], [0], [1], [0, 0, 1, 1], [], []>} : vector<8x128xbf16>, vector<128x256xbf16>, vector<8x256xf32> -> vector<8x256xf32>
    %43 = arith.addf %42, %10 : vector<8x256xf32>
    %44 = vector.extract_strided_slice %43 {offsets = [0, 0], sizes = [8, 128], strides = [1, 1]} : vector<8x256xf32> to vector<8x128xf32>
    %45 = arith.negf %44 : vector<8x128xf32>
    %46 = math.exp %45 : vector<8x128xf32>
    %cst_26 = arith.constant 1.000000e+00 : f32
    %47 = vector.broadcast %cst_26 : f32 to vector<8x128xf32>
    %48 = arith.addf %47, %46 : vector<8x128xf32>
    %49 = arith.divf %47, %48 : vector<8x128xf32>
    %50 = vector.extract_strided_slice %49 {offsets = [0, 0], sizes = [8, 64], strides = [1, 1]} : vector<8x128xf32> to vector<8x64xf32>
    %51 = vector.extract_strided_slice %49 {offsets = [0, 64], sizes = [8, 64], strides = [1, 1]} : vector<8x128xf32> to vector<8x64xf32>
    %52 = vector.extract_strided_slice %43 {offsets = [0, 128], sizes = [8, 64], strides = [1, 1]} : vector<8x256xf32> to vector<8x64xf32>
    %53 = vector.extract_strided_slice %43 {offsets = [0, 192], sizes = [8, 64], strides = [1, 1]} : vector<8x256xf32> to vector<8x64xf32>
    %54 = arith.mulf %50, %53 : vector<8x64xf32>
    %55 = arith.addf %52, %54 : vector<8x64xf32>
    %56 = math.tanh %55 : vector<8x64xf32>
    %57 = arith.subf %15, %56 : vector<8x64xf32>
    %58 = arith.mulf %51, %57 : vector<8x64xf32>
    %59 = arith.addf %56, %58 : vector<8x64xf32>
    %60 = tpu.concatenate %59, %16 in 1 : vector<8x64xf32>, vector<8x64xf32> -> vector<8x128xf32>
    %61 = arith.truncf %60 : vector<8x128xf32> to vector<8x128xbf16>
    %c0_27 = arith.constant 0 : index
    %c0_28 = arith.constant 0 : index
    %62 = vector.load %arg5[%c0_27, %c0_28] : memref<128x256xbf16, #tpu.memory_space<vmem>>, vector<128x256xbf16>
    %cst_29 = arith.constant dense<0.000000e+00> : vector<8x256xf32>
    %63 = tpu.matmul %61, %62, %cst_29 {dimension_numbers = #tpu.dot_dimension_numbers<[1], [0], [0], [1], [0, 0, 1, 1], [], []>} : vector<8x128xbf16>, vector<128x256xbf16>, vector<8x256xf32> -> vector<8x256xf32>
    %64 = arith.addf %63, %13 : vector<8x256xf32>
    %65 = vector.extract_strided_slice %64 {offsets = [0, 0], sizes = [8, 128], strides = [1, 1]} : vector<8x256xf32> to vector<8x128xf32>
    %66 = arith.negf %65 : vector<8x128xf32>
    %67 = math.exp %66 : vector<8x128xf32>
    %cst_30 = arith.constant 1.000000e+00 : f32
    %68 = vector.broadcast %cst_30 : f32 to vector<8x128xf32>
    %69 = arith.addf %68, %67 : vector<8x128xf32>
    %70 = arith.divf %68, %69 : vector<8x128xf32>
    %71 = vector.extract_strided_slice %70 {offsets = [0, 0], sizes = [8, 64], strides = [1, 1]} : vector<8x128xf32> to vector<8x64xf32>
    %72 = vector.extract_strided_slice %70 {offsets = [0, 64], sizes = [8, 64], strides = [1, 1]} : vector<8x128xf32> to vector<8x64xf32>
    %73 = vector.extract_strided_slice %64 {offsets = [0, 128], sizes = [8, 64], strides = [1, 1]} : vector<8x256xf32> to vector<8x64xf32>
    %74 = vector.extract_strided_slice %64 {offsets = [0, 192], sizes = [8, 64], strides = [1, 1]} : vector<8x256xf32> to vector<8x64xf32>
    %75 = arith.mulf %71, %74 : vector<8x64xf32>
    %76 = arith.addf %73, %75 : vector<8x64xf32>
    %77 = math.tanh %76 : vector<8x64xf32>
    %78 = arith.subf %16, %77 : vector<8x64xf32>
    %79 = arith.mulf %72, %78 : vector<8x64xf32>
    %80 = arith.addf %77, %79 : vector<8x64xf32>
    %c1_i32 = arith.constant 1 : i32
    %81 = vector.broadcast %c1_i32 : i32 to vector<8x1xi32>
    %82 = arith.cmpi eq, %0, %81 : vector<8x1xi32>
    %83 = vector.shape_cast %82 : vector<8x1xi1> to vector<8x1xi1>
    %84 = vector.broadcast %83 : vector<8x1xi1> to vector<8x64xi1>
    %85 = arith.select %84, %80, %17 : vector<8x64xi1>, vector<8x64xf32>
    %c8 = arith.constant 8 : index
    %c0_31 = arith.constant 0 : index
    %86 = vector.load %arg12[%c8, %c0_31] : memref<64x256xf32, #tpu.memory_space<vmem>>, vector<8x256xf32>
    %87 = arith.truncf %38 : vector<8x64xf32> to vector<8x64xbf16>
    %c0_32 = arith.constant 0 : index
    %c0_33 = arith.constant 0 : index
    %88 = vector.load %arg3[%c0_32, %c0_33] : memref<64x256xbf16, #tpu.memory_space<vmem>>, vector<64x256xbf16>
    %cst_34 = arith.constant dense<0.000000e+00> : vector<8x256xf32>
    %89 = tpu.matmul %87, %88, %cst_34 {dimension_numbers = #tpu.dot_dimension_numbers<[1], [0], [0], [1], [0, 0, 1, 1], [], []>} : vector<8x64xbf16>, vector<64x256xbf16>, vector<8x256xf32> -> vector<8x256xf32>
    %90 = arith.addf %86, %89 : vector<8x256xf32>
    %91 = vector.extract_strided_slice %90 {offsets = [0, 0], sizes = [8, 128], strides = [1, 1]} : vector<8x256xf32> to vector<8x128xf32>
    %92 = arith.negf %91 : vector<8x128xf32>
    %93 = math.exp %92 : vector<8x128xf32>
    %cst_35 = arith.constant 1.000000e+00 : f32
    %94 = vector.broadcast %cst_35 : f32 to vector<8x128xf32>
    %95 = arith.addf %94, %93 : vector<8x128xf32>
    %96 = arith.divf %94, %95 : vector<8x128xf32>
    %97 = vector.extract_strided_slice %96 {offsets = [0, 0], sizes = [8, 64], strides = [1, 1]} : vector<8x128xf32> to vector<8x64xf32>
    %98 = vector.extract_strided_slice %96 {offsets = [0, 64], sizes = [8, 64], strides = [1, 1]} : vector<8x128xf32> to vector<8x64xf32>
    %99 = vector.extract_strided_slice %90 {offsets = [0, 128], sizes = [8, 64], strides = [1, 1]} : vector<8x256xf32> to vector<8x64xf32>
    %100 = vector.extract_strided_slice %90 {offsets = [0, 192], sizes = [8, 64], strides = [1, 1]} : vector<8x256xf32> to vector<8x64xf32>
    %101 = arith.mulf %97, %100 : vector<8x64xf32>
    %102 = arith.addf %99, %101 : vector<8x64xf32>
    %103 = math.tanh %102 : vector<8x64xf32>
    %104 = arith.subf %38, %103 : vector<8x64xf32>
    %105 = arith.mulf %98, %104 : vector<8x64xf32>
    %106 = arith.addf %103, %105 : vector<8x64xf32>
    %107 = tpu.concatenate %106, %59 in 1 : vector<8x64xf32>, vector<8x64xf32> -> vector<8x128xf32>
    %108 = arith.truncf %107 : vector<8x128xf32> to vector<8x128xbf16>
    %c0_36 = arith.constant 0 : index
    %c0_37 = arith.constant 0 : index
    %109 = vector.load %arg4[%c0_36, %c0_37] : memref<128x256xbf16, #tpu.memory_space<vmem>>, vector<128x256xbf16>
    %cst_38 = arith.constant dense<0.000000e+00> : vector<8x256xf32>
    %110 = tpu.matmul %108, %109, %cst_38 {dimension_numbers = #tpu.dot_dimension_numbers<[1], [0], [0], [1], [0, 0, 1, 1], [], []>} : vector<8x128xbf16>, vector<128x256xbf16>, vector<8x256xf32> -> vector<8x256xf32>
    %111 = arith.addf %110, %10 : vector<8x256xf32>
    %112 = vector.extract_strided_slice %111 {offsets = [0, 0], sizes = [8, 128], strides = [1, 1]} : vector<8x256xf32> to vector<8x128xf32>
    %113 = arith.negf %112 : vector<8x128xf32>
    %114 = math.exp %113 : vector<8x128xf32>
    %cst_39 = arith.constant 1.000000e+00 : f32
    %115 = vector.broadcast %cst_39 : f32 to vector<8x128xf32>
    %116 = arith.addf %115, %114 : vector<8x128xf32>
    %117 = arith.divf %115, %116 : vector<8x128xf32>
    %118 = vector.extract_strided_slice %117 {offsets = [0, 0], sizes = [8, 64], strides = [1, 1]} : vector<8x128xf32> to vector<8x64xf32>
    %119 = vector.extract_strided_slice %117 {offsets = [0, 64], sizes = [8, 64], strides = [1, 1]} : vector<8x128xf32> to vector<8x64xf32>
    %120 = vector.extract_strided_slice %111 {offsets = [0, 128], sizes = [8, 64], strides = [1, 1]} : vector<8x256xf32> to vector<8x64xf32>
    %121 = vector.extract_strided_slice %111 {offsets = [0, 192], sizes = [8, 64], strides = [1, 1]} : vector<8x256xf32> to vector<8x64xf32>
    %122 = arith.mulf %118, %121 : vector<8x64xf32>
    %123 = arith.addf %120, %122 : vector<8x64xf32>
    %124 = math.tanh %123 : vector<8x64xf32>
    %125 = arith.subf %59, %124 : vector<8x64xf32>
    %126 = arith.mulf %119, %125 : vector<8x64xf32>
    %127 = arith.addf %124, %126 : vector<8x64xf32>
    %128 = tpu.concatenate %127, %80 in 1 : vector<8x64xf32>, vector<8x64xf32> -> vector<8x128xf32>
    %129 = arith.truncf %128 : vector<8x128xf32> to vector<8x128xbf16>
    %c0_40 = arith.constant 0 : index
    %c0_41 = arith.constant 0 : index
    %130 = vector.load %arg5[%c0_40, %c0_41] : memref<128x256xbf16, #tpu.memory_space<vmem>>, vector<128x256xbf16>
    %cst_42 = arith.constant dense<0.000000e+00> : vector<8x256xf32>
    %131 = tpu.matmul %129, %130, %cst_42 {dimension_numbers = #tpu.dot_dimension_numbers<[1], [0], [0], [1], [0, 0, 1, 1], [], []>} : vector<8x128xbf16>, vector<128x256xbf16>, vector<8x256xf32> -> vector<8x256xf32>
    %132 = arith.addf %131, %13 : vector<8x256xf32>
    %133 = vector.extract_strided_slice %132 {offsets = [0, 0], sizes = [8, 128], strides = [1, 1]} : vector<8x256xf32> to vector<8x128xf32>
    %134 = arith.negf %133 : vector<8x128xf32>
    %135 = math.exp %134 : vector<8x128xf32>
    %cst_43 = arith.constant 1.000000e+00 : f32
    %136 = vector.broadcast %cst_43 : f32 to vector<8x128xf32>
    %137 = arith.addf %136, %135 : vector<8x128xf32>
    %138 = arith.divf %136, %137 : vector<8x128xf32>
    %139 = vector.extract_strided_slice %138 {offsets = [0, 0], sizes = [8, 64], strides = [1, 1]} : vector<8x128xf32> to vector<8x64xf32>
    %140 = vector.extract_strided_slice %138 {offsets = [0, 64], sizes = [8, 64], strides = [1, 1]} : vector<8x128xf32> to vector<8x64xf32>
    %141 = vector.extract_strided_slice %132 {offsets = [0, 128], sizes = [8, 64], strides = [1, 1]} : vector<8x256xf32> to vector<8x64xf32>
    %142 = vector.extract_strided_slice %132 {offsets = [0, 192], sizes = [8, 64], strides = [1, 1]} : vector<8x256xf32> to vector<8x64xf32>
    %143 = arith.mulf %139, %142 : vector<8x64xf32>
    %144 = arith.addf %141, %143 : vector<8x64xf32>
    %145 = math.tanh %144 : vector<8x64xf32>
    %146 = arith.subf %80, %145 : vector<8x64xf32>
    %147 = arith.mulf %140, %146 : vector<8x64xf32>
    %148 = arith.addf %145, %147 : vector<8x64xf32>
    %c2_i32 = arith.constant 2 : i32
    %149 = vector.broadcast %c2_i32 : i32 to vector<8x1xi32>
    %150 = arith.cmpi eq, %0, %149 : vector<8x1xi32>
    %151 = vector.shape_cast %150 : vector<8x1xi1> to vector<8x1xi1>
    %152 = vector.broadcast %151 : vector<8x1xi1> to vector<8x64xi1>
    %153 = arith.select %152, %148, %85 : vector<8x64xi1>, vector<8x64xf32>
    %c16 = arith.constant 16 : index
    %c0_44 = arith.constant 0 : index
    %154 = vector.load %arg12[%c16, %c0_44] : memref<64x256xf32, #tpu.memory_space<vmem>>, vector<8x256xf32>
    %155 = arith.truncf %106 : vector<8x64xf32> to vector<8x64xbf16>
    %c0_45 = arith.constant 0 : index
    %c0_46 = arith.constant 0 : index
    %156 = vector.load %arg3[%c0_45, %c0_46] : memref<64x256xbf16, #tpu.memory_space<vmem>>, vector<64x256xbf16>
    %cst_47 = arith.constant dense<0.000000e+00> : vector<8x256xf32>
    %157 = tpu.matmul %155, %156, %cst_47 {dimension_numbers = #tpu.dot_dimension_numbers<[1], [0], [0], [1], [0, 0, 1, 1], [], []>} : vector<8x64xbf16>, vector<64x256xbf16>, vector<8x256xf32> -> vector<8x256xf32>
    %158 = arith.addf %154, %157 : vector<8x256xf32>
    %159 = vector.extract_strided_slice %158 {offsets = [0, 0], sizes = [8, 128], strides = [1, 1]} : vector<8x256xf32> to vector<8x128xf32>
    %160 = arith.negf %159 : vector<8x128xf32>
    %161 = math.exp %160 : vector<8x128xf32>
    %cst_48 = arith.constant 1.000000e+00 : f32
    %162 = vector.broadcast %cst_48 : f32 to vector<8x128xf32>
    %163 = arith.addf %162, %161 : vector<8x128xf32>
    %164 = arith.divf %162, %163 : vector<8x128xf32>
    %165 = vector.extract_strided_slice %164 {offsets = [0, 0], sizes = [8, 64], strides = [1, 1]} : vector<8x128xf32> to vector<8x64xf32>
    %166 = vector.extract_strided_slice %164 {offsets = [0, 64], sizes = [8, 64], strides = [1, 1]} : vector<8x128xf32> to vector<8x64xf32>
    %167 = vector.extract_strided_slice %158 {offsets = [0, 128], sizes = [8, 64], strides = [1, 1]} : vector<8x256xf32> to vector<8x64xf32>
    %168 = vector.extract_strided_slice %158 {offsets = [0, 192], sizes = [8, 64], strides = [1, 1]} : vector<8x256xf32> to vector<8x64xf32>
    %169 = arith.mulf %165, %168 : vector<8x64xf32>
    %170 = arith.addf %167, %169 : vector<8x64xf32>
    %171 = math.tanh %170 : vector<8x64xf32>
    %172 = arith.subf %106, %171 : vector<8x64xf32>
    %173 = arith.mulf %166, %172 : vector<8x64xf32>
    %174 = arith.addf %171, %173 : vector<8x64xf32>
    %175 = tpu.concatenate %174, %127 in 1 : vector<8x64xf32>, vector<8x64xf32> -> vector<8x128xf32>
    %176 = arith.truncf %175 : vector<8x128xf32> to vector<8x128xbf16>
    %c0_49 = arith.constant 0 : index
    %c0_50 = arith.constant 0 : index
    %177 = vector.load %arg4[%c0_49, %c0_50] : memref<128x256xbf16, #tpu.memory_space<vmem>>, vector<128x256xbf16>
    %cst_51 = arith.constant dense<0.000000e+00> : vector<8x256xf32>
    %178 = tpu.matmul %176, %177, %cst_51 {dimension_numbers = #tpu.dot_dimension_numbers<[1], [0], [0], [1], [0, 0, 1, 1], [], []>} : vector<8x128xbf16>, vector<128x256xbf16>, vector<8x256xf32> -> vector<8x256xf32>
    %179 = arith.addf %178, %10 : vector<8x256xf32>
    %180 = vector.extract_strided_slice %179 {offsets = [0, 0], sizes = [8, 128], strides = [1, 1]} : vector<8x256xf32> to vector<8x128xf32>
    %181 = arith.negf %180 : vector<8x128xf32>
    %182 = math.exp %181 : vector<8x128xf32>
    %cst_52 = arith.constant 1.000000e+00 : f32
    %183 = vector.broadcast %cst_52 : f32 to vector<8x128xf32>
    %184 = arith.addf %183, %182 : vector<8x128xf32>
    %185 = arith.divf %183, %184 : vector<8x128xf32>
    %186 = vector.extract_strided_slice %185 {offsets = [0, 0], sizes = [8, 64], strides = [1, 1]} : vector<8x128xf32> to vector<8x64xf32>
    %187 = vector.extract_strided_slice %185 {offsets = [0, 64], sizes = [8, 64], strides = [1, 1]} : vector<8x128xf32> to vector<8x64xf32>
    %188 = vector.extract_strided_slice %179 {offsets = [0, 128], sizes = [8, 64], strides = [1, 1]} : vector<8x256xf32> to vector<8x64xf32>
    %189 = vector.extract_strided_slice %179 {offsets = [0, 192], sizes = [8, 64], strides = [1, 1]} : vector<8x256xf32> to vector<8x64xf32>
    %190 = arith.mulf %186, %189 : vector<8x64xf32>
    %191 = arith.addf %188, %190 : vector<8x64xf32>
    %192 = math.tanh %191 : vector<8x64xf32>
    %193 = arith.subf %127, %192 : vector<8x64xf32>
    %194 = arith.mulf %187, %193 : vector<8x64xf32>
    %195 = arith.addf %192, %194 : vector<8x64xf32>
    %196 = tpu.concatenate %195, %148 in 1 : vector<8x64xf32>, vector<8x64xf32> -> vector<8x128xf32>
    %197 = arith.truncf %196 : vector<8x128xf32> to vector<8x128xbf16>
    %c0_53 = arith.constant 0 : index
    %c0_54 = arith.constant 0 : index
    %198 = vector.load %arg5[%c0_53, %c0_54] : memref<128x256xbf16, #tpu.memory_space<vmem>>, vector<128x256xbf16>
    %cst_55 = arith.constant dense<0.000000e+00> : vector<8x256xf32>
    %199 = tpu.matmul %197, %198, %cst_55 {dimension_numbers = #tpu.dot_dimension_numbers<[1], [0], [0], [1], [0, 0, 1, 1], [], []>} : vector<8x128xbf16>, vector<128x256xbf16>, vector<8x256xf32> -> vector<8x256xf32>
    %200 = arith.addf %199, %13 : vector<8x256xf32>
    %201 = vector.extract_strided_slice %200 {offsets = [0, 0], sizes = [8, 128], strides = [1, 1]} : vector<8x256xf32> to vector<8x128xf32>
    %202 = arith.negf %201 : vector<8x128xf32>
    %203 = math.exp %202 : vector<8x128xf32>
    %cst_56 = arith.constant 1.000000e+00 : f32
    %204 = vector.broadcast %cst_56 : f32 to vector<8x128xf32>
    %205 = arith.addf %204, %203 : vector<8x128xf32>
    %206 = arith.divf %204, %205 : vector<8x128xf32>
    %207 = vector.extract_strided_slice %206 {offsets = [0, 0], sizes = [8, 64], strides = [1, 1]} : vector<8x128xf32> to vector<8x64xf32>
    %208 = vector.extract_strided_slice %206 {offsets = [0, 64], sizes = [8, 64], strides = [1, 1]} : vector<8x128xf32> to vector<8x64xf32>
    %209 = vector.extract_strided_slice %200 {offsets = [0, 128], sizes = [8, 64], strides = [1, 1]} : vector<8x256xf32> to vector<8x64xf32>
    %210 = vector.extract_strided_slice %200 {offsets = [0, 192], sizes = [8, 64], strides = [1, 1]} : vector<8x256xf32> to vector<8x64xf32>
    %211 = arith.mulf %207, %210 : vector<8x64xf32>
    %212 = arith.addf %209, %211 : vector<8x64xf32>
    %213 = math.tanh %212 : vector<8x64xf32>
    %214 = arith.subf %148, %213 : vector<8x64xf32>
    %215 = arith.mulf %208, %214 : vector<8x64xf32>
    %216 = arith.addf %213, %215 : vector<8x64xf32>
    %c3_i32 = arith.constant 3 : i32
    %217 = vector.broadcast %c3_i32 : i32 to vector<8x1xi32>
    %218 = arith.cmpi eq, %0, %217 : vector<8x1xi32>
    %219 = vector.shape_cast %218 : vector<8x1xi1> to vector<8x1xi1>
    %220 = vector.broadcast %219 : vector<8x1xi1> to vector<8x64xi1>
    %221 = arith.select %220, %216, %153 : vector<8x64xi1>, vector<8x64xf32>
    %c24 = arith.constant 24 : index
    %c0_57 = arith.constant 0 : index
    %222 = vector.load %arg12[%c24, %c0_57] : memref<64x256xf32, #tpu.memory_space<vmem>>, vector<8x256xf32>
    %223 = arith.truncf %174 : vector<8x64xf32> to vector<8x64xbf16>
    %c0_58 = arith.constant 0 : index
    %c0_59 = arith.constant 0 : index
    %224 = vector.load %arg3[%c0_58, %c0_59] : memref<64x256xbf16, #tpu.memory_space<vmem>>, vector<64x256xbf16>
    %cst_60 = arith.constant dense<0.000000e+00> : vector<8x256xf32>
    %225 = tpu.matmul %223, %224, %cst_60 {dimension_numbers = #tpu.dot_dimension_numbers<[1], [0], [0], [1], [0, 0, 1, 1], [], []>} : vector<8x64xbf16>, vector<64x256xbf16>, vector<8x256xf32> -> vector<8x256xf32>
    %226 = arith.addf %222, %225 : vector<8x256xf32>
    %227 = vector.extract_strided_slice %226 {offsets = [0, 0], sizes = [8, 128], strides = [1, 1]} : vector<8x256xf32> to vector<8x128xf32>
    %228 = arith.negf %227 : vector<8x128xf32>
    %229 = math.exp %228 : vector<8x128xf32>
    %cst_61 = arith.constant 1.000000e+00 : f32
    %230 = vector.broadcast %cst_61 : f32 to vector<8x128xf32>
    %231 = arith.addf %230, %229 : vector<8x128xf32>
    %232 = arith.divf %230, %231 : vector<8x128xf32>
    %233 = vector.extract_strided_slice %232 {offsets = [0, 0], sizes = [8, 64], strides = [1, 1]} : vector<8x128xf32> to vector<8x64xf32>
    %234 = vector.extract_strided_slice %232 {offsets = [0, 64], sizes = [8, 64], strides = [1, 1]} : vector<8x128xf32> to vector<8x64xf32>
    %235 = vector.extract_strided_slice %226 {offsets = [0, 128], sizes = [8, 64], strides = [1, 1]} : vector<8x256xf32> to vector<8x64xf32>
    %236 = vector.extract_strided_slice %226 {offsets = [0, 192], sizes = [8, 64], strides = [1, 1]} : vector<8x256xf32> to vector<8x64xf32>
    %237 = arith.mulf %233, %236 : vector<8x64xf32>
    %238 = arith.addf %235, %237 : vector<8x64xf32>
    %239 = math.tanh %238 : vector<8x64xf32>
    %240 = arith.subf %174, %239 : vector<8x64xf32>
    %241 = arith.mulf %234, %240 : vector<8x64xf32>
    %242 = arith.addf %239, %241 : vector<8x64xf32>
    %243 = tpu.concatenate %242, %195 in 1 : vector<8x64xf32>, vector<8x64xf32> -> vector<8x128xf32>
    %244 = arith.truncf %243 : vector<8x128xf32> to vector<8x128xbf16>
    %c0_62 = arith.constant 0 : index
    %c0_63 = arith.constant 0 : index
    %245 = vector.load %arg4[%c0_62, %c0_63] : memref<128x256xbf16, #tpu.memory_space<vmem>>, vector<128x256xbf16>
    %cst_64 = arith.constant dense<0.000000e+00> : vector<8x256xf32>
    %246 = tpu.matmul %244, %245, %cst_64 {dimension_numbers = #tpu.dot_dimension_numbers<[1], [0], [0], [1], [0, 0, 1, 1], [], []>} : vector<8x128xbf16>, vector<128x256xbf16>, vector<8x256xf32> -> vector<8x256xf32>
    %247 = arith.addf %246, %10 : vector<8x256xf32>
    %248 = vector.extract_strided_slice %247 {offsets = [0, 0], sizes = [8, 128], strides = [1, 1]} : vector<8x256xf32> to vector<8x128xf32>
    %249 = arith.negf %248 : vector<8x128xf32>
    %250 = math.exp %249 : vector<8x128xf32>
    %cst_65 = arith.constant 1.000000e+00 : f32
    %251 = vector.broadcast %cst_65 : f32 to vector<8x128xf32>
    %252 = arith.addf %251, %250 : vector<8x128xf32>
    %253 = arith.divf %251, %252 : vector<8x128xf32>
    %254 = vector.extract_strided_slice %253 {offsets = [0, 0], sizes = [8, 64], strides = [1, 1]} : vector<8x128xf32> to vector<8x64xf32>
    %255 = vector.extract_strided_slice %253 {offsets = [0, 64], sizes = [8, 64], strides = [1, 1]} : vector<8x128xf32> to vector<8x64xf32>
    %256 = vector.extract_strided_slice %247 {offsets = [0, 128], sizes = [8, 64], strides = [1, 1]} : vector<8x256xf32> to vector<8x64xf32>
    %257 = vector.extract_strided_slice %247 {offsets = [0, 192], sizes = [8, 64], strides = [1, 1]} : vector<8x256xf32> to vector<8x64xf32>
    %258 = arith.mulf %254, %257 : vector<8x64xf32>
    %259 = arith.addf %256, %258 : vector<8x64xf32>
    %260 = math.tanh %259 : vector<8x64xf32>
    %261 = arith.subf %195, %260 : vector<8x64xf32>
    %262 = arith.mulf %255, %261 : vector<8x64xf32>
    %263 = arith.addf %260, %262 : vector<8x64xf32>
    %264 = tpu.concatenate %263, %216 in 1 : vector<8x64xf32>, vector<8x64xf32> -> vector<8x128xf32>
    %265 = arith.truncf %264 : vector<8x128xf32> to vector<8x128xbf16>
    %c0_66 = arith.constant 0 : index
    %c0_67 = arith.constant 0 : index
    %266 = vector.load %arg5[%c0_66, %c0_67] : memref<128x256xbf16, #tpu.memory_space<vmem>>, vector<128x256xbf16>
    %cst_68 = arith.constant dense<0.000000e+00> : vector<8x256xf32>
    %267 = tpu.matmul %265, %266, %cst_68 {dimension_numbers = #tpu.dot_dimension_numbers<[1], [0], [0], [1], [0, 0, 1, 1], [], []>} : vector<8x128xbf16>, vector<128x256xbf16>, vector<8x256xf32> -> vector<8x256xf32>
    %268 = arith.addf %267, %13 : vector<8x256xf32>
    %269 = vector.extract_strided_slice %268 {offsets = [0, 0], sizes = [8, 128], strides = [1, 1]} : vector<8x256xf32> to vector<8x128xf32>
    %270 = arith.negf %269 : vector<8x128xf32>
    %271 = math.exp %270 : vector<8x128xf32>
    %cst_69 = arith.constant 1.000000e+00 : f32
    %272 = vector.broadcast %cst_69 : f32 to vector<8x128xf32>
    %273 = arith.addf %272, %271 : vector<8x128xf32>
    %274 = arith.divf %272, %273 : vector<8x128xf32>
    %275 = vector.extract_strided_slice %274 {offsets = [0, 0], sizes = [8, 64], strides = [1, 1]} : vector<8x128xf32> to vector<8x64xf32>
    %276 = vector.extract_strided_slice %274 {offsets = [0, 64], sizes = [8, 64], strides = [1, 1]} : vector<8x128xf32> to vector<8x64xf32>
    %277 = vector.extract_strided_slice %268 {offsets = [0, 128], sizes = [8, 64], strides = [1, 1]} : vector<8x256xf32> to vector<8x64xf32>
    %278 = vector.extract_strided_slice %268 {offsets = [0, 192], sizes = [8, 64], strides = [1, 1]} : vector<8x256xf32> to vector<8x64xf32>
    %279 = arith.mulf %275, %278 : vector<8x64xf32>
    %280 = arith.addf %277, %279 : vector<8x64xf32>
    %281 = math.tanh %280 : vector<8x64xf32>
    %282 = arith.subf %216, %281 : vector<8x64xf32>
    %283 = arith.mulf %276, %282 : vector<8x64xf32>
    %284 = arith.addf %281, %283 : vector<8x64xf32>
    %c4_i32 = arith.constant 4 : i32
    %285 = vector.broadcast %c4_i32 : i32 to vector<8x1xi32>
    %286 = arith.cmpi eq, %0, %285 : vector<8x1xi32>
    %287 = vector.shape_cast %286 : vector<8x1xi1> to vector<8x1xi1>
    %288 = vector.broadcast %287 : vector<8x1xi1> to vector<8x64xi1>
    %289 = arith.select %288, %284, %221 : vector<8x64xi1>, vector<8x64xf32>
    %c32 = arith.constant 32 : index
    %c0_70 = arith.constant 0 : index
    %290 = vector.load %arg12[%c32, %c0_70] : memref<64x256xf32, #tpu.memory_space<vmem>>, vector<8x256xf32>
    %291 = arith.truncf %242 : vector<8x64xf32> to vector<8x64xbf16>
    %c0_71 = arith.constant 0 : index
    %c0_72 = arith.constant 0 : index
    %292 = vector.load %arg3[%c0_71, %c0_72] : memref<64x256xbf16, #tpu.memory_space<vmem>>, vector<64x256xbf16>
    %cst_73 = arith.constant dense<0.000000e+00> : vector<8x256xf32>
    %293 = tpu.matmul %291, %292, %cst_73 {dimension_numbers = #tpu.dot_dimension_numbers<[1], [0], [0], [1], [0, 0, 1, 1], [], []>} : vector<8x64xbf16>, vector<64x256xbf16>, vector<8x256xf32> -> vector<8x256xf32>
    %294 = arith.addf %290, %293 : vector<8x256xf32>
    %295 = vector.extract_strided_slice %294 {offsets = [0, 0], sizes = [8, 128], strides = [1, 1]} : vector<8x256xf32> to vector<8x128xf32>
    %296 = arith.negf %295 : vector<8x128xf32>
    %297 = math.exp %296 : vector<8x128xf32>
    %cst_74 = arith.constant 1.000000e+00 : f32
    %298 = vector.broadcast %cst_74 : f32 to vector<8x128xf32>
    %299 = arith.addf %298, %297 : vector<8x128xf32>
    %300 = arith.divf %298, %299 : vector<8x128xf32>
    %301 = vector.extract_strided_slice %300 {offsets = [0, 0], sizes = [8, 64], strides = [1, 1]} : vector<8x128xf32> to vector<8x64xf32>
    %302 = vector.extract_strided_slice %300 {offsets = [0, 64], sizes = [8, 64], strides = [1, 1]} : vector<8x128xf32> to vector<8x64xf32>
    %303 = vector.extract_strided_slice %294 {offsets = [0, 128], sizes = [8, 64], strides = [1, 1]} : vector<8x256xf32> to vector<8x64xf32>
    %304 = vector.extract_strided_slice %294 {offsets = [0, 192], sizes = [8, 64], strides = [1, 1]} : vector<8x256xf32> to vector<8x64xf32>
    %305 = arith.mulf %301, %304 : vector<8x64xf32>
    %306 = arith.addf %303, %305 : vector<8x64xf32>
    %307 = math.tanh %306 : vector<8x64xf32>
    %308 = arith.subf %242, %307 : vector<8x64xf32>
    %309 = arith.mulf %302, %308 : vector<8x64xf32>
    %310 = arith.addf %307, %309 : vector<8x64xf32>
    %311 = tpu.concatenate %310, %263 in 1 : vector<8x64xf32>, vector<8x64xf32> -> vector<8x128xf32>
    %312 = arith.truncf %311 : vector<8x128xf32> to vector<8x128xbf16>
    %c0_75 = arith.constant 0 : index
    %c0_76 = arith.constant 0 : index
    %313 = vector.load %arg4[%c0_75, %c0_76] : memref<128x256xbf16, #tpu.memory_space<vmem>>, vector<128x256xbf16>
    %cst_77 = arith.constant dense<0.000000e+00> : vector<8x256xf32>
    %314 = tpu.matmul %312, %313, %cst_77 {dimension_numbers = #tpu.dot_dimension_numbers<[1], [0], [0], [1], [0, 0, 1, 1], [], []>} : vector<8x128xbf16>, vector<128x256xbf16>, vector<8x256xf32> -> vector<8x256xf32>
    %315 = arith.addf %314, %10 : vector<8x256xf32>
    %316 = vector.extract_strided_slice %315 {offsets = [0, 0], sizes = [8, 128], strides = [1, 1]} : vector<8x256xf32> to vector<8x128xf32>
    %317 = arith.negf %316 : vector<8x128xf32>
    %318 = math.exp %317 : vector<8x128xf32>
    %cst_78 = arith.constant 1.000000e+00 : f32
    %319 = vector.broadcast %cst_78 : f32 to vector<8x128xf32>
    %320 = arith.addf %319, %318 : vector<8x128xf32>
    %321 = arith.divf %319, %320 : vector<8x128xf32>
    %322 = vector.extract_strided_slice %321 {offsets = [0, 0], sizes = [8, 64], strides = [1, 1]} : vector<8x128xf32> to vector<8x64xf32>
    %323 = vector.extract_strided_slice %321 {offsets = [0, 64], sizes = [8, 64], strides = [1, 1]} : vector<8x128xf32> to vector<8x64xf32>
    %324 = vector.extract_strided_slice %315 {offsets = [0, 128], sizes = [8, 64], strides = [1, 1]} : vector<8x256xf32> to vector<8x64xf32>
    %325 = vector.extract_strided_slice %315 {offsets = [0, 192], sizes = [8, 64], strides = [1, 1]} : vector<8x256xf32> to vector<8x64xf32>
    %326 = arith.mulf %322, %325 : vector<8x64xf32>
    %327 = arith.addf %324, %326 : vector<8x64xf32>
    %328 = math.tanh %327 : vector<8x64xf32>
    %329 = arith.subf %263, %328 : vector<8x64xf32>
    %330 = arith.mulf %323, %329 : vector<8x64xf32>
    %331 = arith.addf %328, %330 : vector<8x64xf32>
    %332 = tpu.concatenate %331, %284 in 1 : vector<8x64xf32>, vector<8x64xf32> -> vector<8x128xf32>
    %333 = arith.truncf %332 : vector<8x128xf32> to vector<8x128xbf16>
    %c0_79 = arith.constant 0 : index
    %c0_80 = arith.constant 0 : index
    %334 = vector.load %arg5[%c0_79, %c0_80] : memref<128x256xbf16, #tpu.memory_space<vmem>>, vector<128x256xbf16>
    %cst_81 = arith.constant dense<0.000000e+00> : vector<8x256xf32>
    %335 = tpu.matmul %333, %334, %cst_81 {dimension_numbers = #tpu.dot_dimension_numbers<[1], [0], [0], [1], [0, 0, 1, 1], [], []>} : vector<8x128xbf16>, vector<128x256xbf16>, vector<8x256xf32> -> vector<8x256xf32>
    %336 = arith.addf %335, %13 : vector<8x256xf32>
    %337 = vector.extract_strided_slice %336 {offsets = [0, 0], sizes = [8, 128], strides = [1, 1]} : vector<8x256xf32> to vector<8x128xf32>
    %338 = arith.negf %337 : vector<8x128xf32>
    %339 = math.exp %338 : vector<8x128xf32>
    %cst_82 = arith.constant 1.000000e+00 : f32
    %340 = vector.broadcast %cst_82 : f32 to vector<8x128xf32>
    %341 = arith.addf %340, %339 : vector<8x128xf32>
    %342 = arith.divf %340, %341 : vector<8x128xf32>
    %343 = vector.extract_strided_slice %342 {offsets = [0, 0], sizes = [8, 64], strides = [1, 1]} : vector<8x128xf32> to vector<8x64xf32>
    %344 = vector.extract_strided_slice %342 {offsets = [0, 64], sizes = [8, 64], strides = [1, 1]} : vector<8x128xf32> to vector<8x64xf32>
    %345 = vector.extract_strided_slice %336 {offsets = [0, 128], sizes = [8, 64], strides = [1, 1]} : vector<8x256xf32> to vector<8x64xf32>
    %346 = vector.extract_strided_slice %336 {offsets = [0, 192], sizes = [8, 64], strides = [1, 1]} : vector<8x256xf32> to vector<8x64xf32>
    %347 = arith.mulf %343, %346 : vector<8x64xf32>
    %348 = arith.addf %345, %347 : vector<8x64xf32>
    %349 = math.tanh %348 : vector<8x64xf32>
    %350 = arith.subf %284, %349 : vector<8x64xf32>
    %351 = arith.mulf %344, %350 : vector<8x64xf32>
    %352 = arith.addf %349, %351 : vector<8x64xf32>
    %c5_i32 = arith.constant 5 : i32
    %353 = vector.broadcast %c5_i32 : i32 to vector<8x1xi32>
    %354 = arith.cmpi eq, %0, %353 : vector<8x1xi32>
    %355 = vector.shape_cast %354 : vector<8x1xi1> to vector<8x1xi1>
    %356 = vector.broadcast %355 : vector<8x1xi1> to vector<8x64xi1>
    %357 = arith.select %356, %352, %289 : vector<8x64xi1>, vector<8x64xf32>
    %c40 = arith.constant 40 : index
    %c0_83 = arith.constant 0 : index
    %358 = vector.load %arg12[%c40, %c0_83] : memref<64x256xf32, #tpu.memory_space<vmem>>, vector<8x256xf32>
    %359 = arith.truncf %310 : vector<8x64xf32> to vector<8x64xbf16>
    %c0_84 = arith.constant 0 : index
    %c0_85 = arith.constant 0 : index
    %360 = vector.load %arg3[%c0_84, %c0_85] : memref<64x256xbf16, #tpu.memory_space<vmem>>, vector<64x256xbf16>
    %cst_86 = arith.constant dense<0.000000e+00> : vector<8x256xf32>
    %361 = tpu.matmul %359, %360, %cst_86 {dimension_numbers = #tpu.dot_dimension_numbers<[1], [0], [0], [1], [0, 0, 1, 1], [], []>} : vector<8x64xbf16>, vector<64x256xbf16>, vector<8x256xf32> -> vector<8x256xf32>
    %362 = arith.addf %358, %361 : vector<8x256xf32>
    %363 = vector.extract_strided_slice %362 {offsets = [0, 0], sizes = [8, 128], strides = [1, 1]} : vector<8x256xf32> to vector<8x128xf32>
    %364 = arith.negf %363 : vector<8x128xf32>
    %365 = math.exp %364 : vector<8x128xf32>
    %cst_87 = arith.constant 1.000000e+00 : f32
    %366 = vector.broadcast %cst_87 : f32 to vector<8x128xf32>
    %367 = arith.addf %366, %365 : vector<8x128xf32>
    %368 = arith.divf %366, %367 : vector<8x128xf32>
    %369 = vector.extract_strided_slice %368 {offsets = [0, 0], sizes = [8, 64], strides = [1, 1]} : vector<8x128xf32> to vector<8x64xf32>
    %370 = vector.extract_strided_slice %368 {offsets = [0, 64], sizes = [8, 64], strides = [1, 1]} : vector<8x128xf32> to vector<8x64xf32>
    %371 = vector.extract_strided_slice %362 {offsets = [0, 128], sizes = [8, 64], strides = [1, 1]} : vector<8x256xf32> to vector<8x64xf32>
    %372 = vector.extract_strided_slice %362 {offsets = [0, 192], sizes = [8, 64], strides = [1, 1]} : vector<8x256xf32> to vector<8x64xf32>
    %373 = arith.mulf %369, %372 : vector<8x64xf32>
    %374 = arith.addf %371, %373 : vector<8x64xf32>
    %375 = math.tanh %374 : vector<8x64xf32>
    %376 = arith.subf %310, %375 : vector<8x64xf32>
    %377 = arith.mulf %370, %376 : vector<8x64xf32>
    %378 = arith.addf %375, %377 : vector<8x64xf32>
    %379 = tpu.concatenate %378, %331 in 1 : vector<8x64xf32>, vector<8x64xf32> -> vector<8x128xf32>
    %380 = arith.truncf %379 : vector<8x128xf32> to vector<8x128xbf16>
    %c0_88 = arith.constant 0 : index
    %c0_89 = arith.constant 0 : index
    %381 = vector.load %arg4[%c0_88, %c0_89] : memref<128x256xbf16, #tpu.memory_space<vmem>>, vector<128x256xbf16>
    %cst_90 = arith.constant dense<0.000000e+00> : vector<8x256xf32>
    %382 = tpu.matmul %380, %381, %cst_90 {dimension_numbers = #tpu.dot_dimension_numbers<[1], [0], [0], [1], [0, 0, 1, 1], [], []>} : vector<8x128xbf16>, vector<128x256xbf16>, vector<8x256xf32> -> vector<8x256xf32>
    %383 = arith.addf %382, %10 : vector<8x256xf32>
    %384 = vector.extract_strided_slice %383 {offsets = [0, 0], sizes = [8, 128], strides = [1, 1]} : vector<8x256xf32> to vector<8x128xf32>
    %385 = arith.negf %384 : vector<8x128xf32>
    %386 = math.exp %385 : vector<8x128xf32>
    %cst_91 = arith.constant 1.000000e+00 : f32
    %387 = vector.broadcast %cst_91 : f32 to vector<8x128xf32>
    %388 = arith.addf %387, %386 : vector<8x128xf32>
    %389 = arith.divf %387, %388 : vector<8x128xf32>
    %390 = vector.extract_strided_slice %389 {offsets = [0, 0], sizes = [8, 64], strides = [1, 1]} : vector<8x128xf32> to vector<8x64xf32>
    %391 = vector.extract_strided_slice %389 {offsets = [0, 64], sizes = [8, 64], strides = [1, 1]} : vector<8x128xf32> to vector<8x64xf32>
    %392 = vector.extract_strided_slice %383 {offsets = [0, 128], sizes = [8, 64], strides = [1, 1]} : vector<8x256xf32> to vector<8x64xf32>
    %393 = vector.extract_strided_slice %383 {offsets = [0, 192], sizes = [8, 64], strides = [1, 1]} : vector<8x256xf32> to vector<8x64xf32>
    %394 = arith.mulf %390, %393 : vector<8x64xf32>
    %395 = arith.addf %392, %394 : vector<8x64xf32>
    %396 = math.tanh %395 : vector<8x64xf32>
    %397 = arith.subf %331, %396 : vector<8x64xf32>
    %398 = arith.mulf %391, %397 : vector<8x64xf32>
    %399 = arith.addf %396, %398 : vector<8x64xf32>
    %400 = tpu.concatenate %399, %352 in 1 : vector<8x64xf32>, vector<8x64xf32> -> vector<8x128xf32>
    %401 = arith.truncf %400 : vector<8x128xf32> to vector<8x128xbf16>
    %c0_92 = arith.constant 0 : index
    %c0_93 = arith.constant 0 : index
    %402 = vector.load %arg5[%c0_92, %c0_93] : memref<128x256xbf16, #tpu.memory_space<vmem>>, vector<128x256xbf16>
    %cst_94 = arith.constant dense<0.000000e+00> : vector<8x256xf32>
    %403 = tpu.matmul %401, %402, %cst_94 {dimension_numbers = #tpu.dot_dimension_numbers<[1], [0], [0], [1], [0, 0, 1, 1], [], []>} : vector<8x128xbf16>, vector<128x256xbf16>, vector<8x256xf32> -> vector<8x256xf32>
    %404 = arith.addf %403, %13 : vector<8x256xf32>
    %405 = vector.extract_strided_slice %404 {offsets = [0, 0], sizes = [8, 128], strides = [1, 1]} : vector<8x256xf32> to vector<8x128xf32>
    %406 = arith.negf %405 : vector<8x128xf32>
    %407 = math.exp %406 : vector<8x128xf32>
    %cst_95 = arith.constant 1.000000e+00 : f32
    %408 = vector.broadcast %cst_95 : f32 to vector<8x128xf32>
    %409 = arith.addf %408, %407 : vector<8x128xf32>
    %410 = arith.divf %408, %409 : vector<8x128xf32>
    %411 = vector.extract_strided_slice %410 {offsets = [0, 0], sizes = [8, 64], strides = [1, 1]} : vector<8x128xf32> to vector<8x64xf32>
    %412 = vector.extract_strided_slice %410 {offsets = [0, 64], sizes = [8, 64], strides = [1, 1]} : vector<8x128xf32> to vector<8x64xf32>
    %413 = vector.extract_strided_slice %404 {offsets = [0, 128], sizes = [8, 64], strides = [1, 1]} : vector<8x256xf32> to vector<8x64xf32>
    %414 = vector.extract_strided_slice %404 {offsets = [0, 192], sizes = [8, 64], strides = [1, 1]} : vector<8x256xf32> to vector<8x64xf32>
    %415 = arith.mulf %411, %414 : vector<8x64xf32>
    %416 = arith.addf %413, %415 : vector<8x64xf32>
    %417 = math.tanh %416 : vector<8x64xf32>
    %418 = arith.subf %352, %417 : vector<8x64xf32>
    %419 = arith.mulf %412, %418 : vector<8x64xf32>
    %420 = arith.addf %417, %419 : vector<8x64xf32>
    %c6_i32 = arith.constant 6 : i32
    %421 = vector.broadcast %c6_i32 : i32 to vector<8x1xi32>
    %422 = arith.cmpi eq, %0, %421 : vector<8x1xi32>
    %423 = vector.shape_cast %422 : vector<8x1xi1> to vector<8x1xi1>
    %424 = vector.broadcast %423 : vector<8x1xi1> to vector<8x64xi1>
    %425 = arith.select %424, %420, %357 : vector<8x64xi1>, vector<8x64xf32>
    %c48 = arith.constant 48 : index
    %c0_96 = arith.constant 0 : index
    %426 = vector.load %arg12[%c48, %c0_96] : memref<64x256xf32, #tpu.memory_space<vmem>>, vector<8x256xf32>
    %427 = arith.truncf %378 : vector<8x64xf32> to vector<8x64xbf16>
    %c0_97 = arith.constant 0 : index
    %c0_98 = arith.constant 0 : index
    %428 = vector.load %arg3[%c0_97, %c0_98] : memref<64x256xbf16, #tpu.memory_space<vmem>>, vector<64x256xbf16>
    %cst_99 = arith.constant dense<0.000000e+00> : vector<8x256xf32>
    %429 = tpu.matmul %427, %428, %cst_99 {dimension_numbers = #tpu.dot_dimension_numbers<[1], [0], [0], [1], [0, 0, 1, 1], [], []>} : vector<8x64xbf16>, vector<64x256xbf16>, vector<8x256xf32> -> vector<8x256xf32>
    %430 = arith.addf %426, %429 : vector<8x256xf32>
    %431 = vector.extract_strided_slice %430 {offsets = [0, 0], sizes = [8, 128], strides = [1, 1]} : vector<8x256xf32> to vector<8x128xf32>
    %432 = arith.negf %431 : vector<8x128xf32>
    %433 = math.exp %432 : vector<8x128xf32>
    %cst_100 = arith.constant 1.000000e+00 : f32
    %434 = vector.broadcast %cst_100 : f32 to vector<8x128xf32>
    %435 = arith.addf %434, %433 : vector<8x128xf32>
    %436 = arith.divf %434, %435 : vector<8x128xf32>
    %437 = vector.extract_strided_slice %436 {offsets = [0, 0], sizes = [8, 64], strides = [1, 1]} : vector<8x128xf32> to vector<8x64xf32>
    %438 = vector.extract_strided_slice %436 {offsets = [0, 64], sizes = [8, 64], strides = [1, 1]} : vector<8x128xf32> to vector<8x64xf32>
    %439 = vector.extract_strided_slice %430 {offsets = [0, 128], sizes = [8, 64], strides = [1, 1]} : vector<8x256xf32> to vector<8x64xf32>
    %440 = vector.extract_strided_slice %430 {offsets = [0, 192], sizes = [8, 64], strides = [1, 1]} : vector<8x256xf32> to vector<8x64xf32>
    %441 = arith.mulf %437, %440 : vector<8x64xf32>
    %442 = arith.addf %439, %441 : vector<8x64xf32>
    %443 = math.tanh %442 : vector<8x64xf32>
    %444 = arith.subf %378, %443 : vector<8x64xf32>
    %445 = arith.mulf %438, %444 : vector<8x64xf32>
    %446 = arith.addf %443, %445 : vector<8x64xf32>
    %447 = tpu.concatenate %446, %399 in 1 : vector<8x64xf32>, vector<8x64xf32> -> vector<8x128xf32>
    %448 = arith.truncf %447 : vector<8x128xf32> to vector<8x128xbf16>
    %c0_101 = arith.constant 0 : index
    %c0_102 = arith.constant 0 : index
    %449 = vector.load %arg4[%c0_101, %c0_102] : memref<128x256xbf16, #tpu.memory_space<vmem>>, vector<128x256xbf16>
    %cst_103 = arith.constant dense<0.000000e+00> : vector<8x256xf32>
    %450 = tpu.matmul %448, %449, %cst_103 {dimension_numbers = #tpu.dot_dimension_numbers<[1], [0], [0], [1], [0, 0, 1, 1], [], []>} : vector<8x128xbf16>, vector<128x256xbf16>, vector<8x256xf32> -> vector<8x256xf32>
    %451 = arith.addf %450, %10 : vector<8x256xf32>
    %452 = vector.extract_strided_slice %451 {offsets = [0, 0], sizes = [8, 128], strides = [1, 1]} : vector<8x256xf32> to vector<8x128xf32>
    %453 = arith.negf %452 : vector<8x128xf32>
    %454 = math.exp %453 : vector<8x128xf32>
    %cst_104 = arith.constant 1.000000e+00 : f32
    %455 = vector.broadcast %cst_104 : f32 to vector<8x128xf32>
    %456 = arith.addf %455, %454 : vector<8x128xf32>
    %457 = arith.divf %455, %456 : vector<8x128xf32>
    %458 = vector.extract_strided_slice %457 {offsets = [0, 0], sizes = [8, 64], strides = [1, 1]} : vector<8x128xf32> to vector<8x64xf32>
    %459 = vector.extract_strided_slice %457 {offsets = [0, 64], sizes = [8, 64], strides = [1, 1]} : vector<8x128xf32> to vector<8x64xf32>
    %460 = vector.extract_strided_slice %451 {offsets = [0, 128], sizes = [8, 64], strides = [1, 1]} : vector<8x256xf32> to vector<8x64xf32>
    %461 = vector.extract_strided_slice %451 {offsets = [0, 192], sizes = [8, 64], strides = [1, 1]} : vector<8x256xf32> to vector<8x64xf32>
    %462 = arith.mulf %458, %461 : vector<8x64xf32>
    %463 = arith.addf %460, %462 : vector<8x64xf32>
    %464 = math.tanh %463 : vector<8x64xf32>
    %465 = arith.subf %399, %464 : vector<8x64xf32>
    %466 = arith.mulf %459, %465 : vector<8x64xf32>
    %467 = arith.addf %464, %466 : vector<8x64xf32>
    %468 = tpu.concatenate %467, %420 in 1 : vector<8x64xf32>, vector<8x64xf32> -> vector<8x128xf32>
    %469 = arith.truncf %468 : vector<8x128xf32> to vector<8x128xbf16>
    %c0_105 = arith.constant 0 : index
    %c0_106 = arith.constant 0 : index
    %470 = vector.load %arg5[%c0_105, %c0_106] : memref<128x256xbf16, #tpu.memory_space<vmem>>, vector<128x256xbf16>
    %cst_107 = arith.constant dense<0.000000e+00> : vector<8x256xf32>
    %471 = tpu.matmul %469, %470, %cst_107 {dimension_numbers = #tpu.dot_dimension_numbers<[1], [0], [0], [1], [0, 0, 1, 1], [], []>} : vector<8x128xbf16>, vector<128x256xbf16>, vector<8x256xf32> -> vector<8x256xf32>
    %472 = arith.addf %471, %13 : vector<8x256xf32>
    %473 = vector.extract_strided_slice %472 {offsets = [0, 0], sizes = [8, 128], strides = [1, 1]} : vector<8x256xf32> to vector<8x128xf32>
    %474 = arith.negf %473 : vector<8x128xf32>
    %475 = math.exp %474 : vector<8x128xf32>
    %cst_108 = arith.constant 1.000000e+00 : f32
    %476 = vector.broadcast %cst_108 : f32 to vector<8x128xf32>
    %477 = arith.addf %476, %475 : vector<8x128xf32>
    %478 = arith.divf %476, %477 : vector<8x128xf32>
    %479 = vector.extract_strided_slice %478 {offsets = [0, 0], sizes = [8, 64], strides = [1, 1]} : vector<8x128xf32> to vector<8x64xf32>
    %480 = vector.extract_strided_slice %478 {offsets = [0, 64], sizes = [8, 64], strides = [1, 1]} : vector<8x128xf32> to vector<8x64xf32>
    %481 = vector.extract_strided_slice %472 {offsets = [0, 128], sizes = [8, 64], strides = [1, 1]} : vector<8x256xf32> to vector<8x64xf32>
    %482 = vector.extract_strided_slice %472 {offsets = [0, 192], sizes = [8, 64], strides = [1, 1]} : vector<8x256xf32> to vector<8x64xf32>
    %483 = arith.mulf %479, %482 : vector<8x64xf32>
    %484 = arith.addf %481, %483 : vector<8x64xf32>
    %485 = math.tanh %484 : vector<8x64xf32>
    %486 = arith.subf %420, %485 : vector<8x64xf32>
    %487 = arith.mulf %480, %486 : vector<8x64xf32>
    %488 = arith.addf %485, %487 : vector<8x64xf32>
    %c7_i32 = arith.constant 7 : i32
    %489 = vector.broadcast %c7_i32 : i32 to vector<8x1xi32>
    %490 = arith.cmpi eq, %0, %489 : vector<8x1xi32>
    %491 = vector.shape_cast %490 : vector<8x1xi1> to vector<8x1xi1>
    %492 = vector.broadcast %491 : vector<8x1xi1> to vector<8x64xi1>
    %493 = arith.select %492, %488, %425 : vector<8x64xi1>, vector<8x64xf32>
    %c56 = arith.constant 56 : index
    %c0_109 = arith.constant 0 : index
    %494 = vector.load %arg12[%c56, %c0_109] : memref<64x256xf32, #tpu.memory_space<vmem>>, vector<8x256xf32>
    %495 = arith.truncf %446 : vector<8x64xf32> to vector<8x64xbf16>
    %c0_110 = arith.constant 0 : index
    %c0_111 = arith.constant 0 : index
    %496 = vector.load %arg3[%c0_110, %c0_111] : memref<64x256xbf16, #tpu.memory_space<vmem>>, vector<64x256xbf16>
    %cst_112 = arith.constant dense<0.000000e+00> : vector<8x256xf32>
    %497 = tpu.matmul %495, %496, %cst_112 {dimension_numbers = #tpu.dot_dimension_numbers<[1], [0], [0], [1], [0, 0, 1, 1], [], []>} : vector<8x64xbf16>, vector<64x256xbf16>, vector<8x256xf32> -> vector<8x256xf32>
    %498 = arith.addf %494, %497 : vector<8x256xf32>
    %499 = vector.extract_strided_slice %498 {offsets = [0, 0], sizes = [8, 128], strides = [1, 1]} : vector<8x256xf32> to vector<8x128xf32>
    %500 = arith.negf %499 : vector<8x128xf32>
    %501 = math.exp %500 : vector<8x128xf32>
    %cst_113 = arith.constant 1.000000e+00 : f32
    %502 = vector.broadcast %cst_113 : f32 to vector<8x128xf32>
    %503 = arith.addf %502, %501 : vector<8x128xf32>
    %504 = arith.divf %502, %503 : vector<8x128xf32>
    %505 = vector.extract_strided_slice %504 {offsets = [0, 0], sizes = [8, 64], strides = [1, 1]} : vector<8x128xf32> to vector<8x64xf32>
    %506 = vector.extract_strided_slice %504 {offsets = [0, 64], sizes = [8, 64], strides = [1, 1]} : vector<8x128xf32> to vector<8x64xf32>
    %507 = vector.extract_strided_slice %498 {offsets = [0, 128], sizes = [8, 64], strides = [1, 1]} : vector<8x256xf32> to vector<8x64xf32>
    %508 = vector.extract_strided_slice %498 {offsets = [0, 192], sizes = [8, 64], strides = [1, 1]} : vector<8x256xf32> to vector<8x64xf32>
    %509 = arith.mulf %505, %508 : vector<8x64xf32>
    %510 = arith.addf %507, %509 : vector<8x64xf32>
    %511 = math.tanh %510 : vector<8x64xf32>
    %512 = arith.subf %446, %511 : vector<8x64xf32>
    %513 = arith.mulf %506, %512 : vector<8x64xf32>
    %514 = arith.addf %511, %513 : vector<8x64xf32>
    %515 = tpu.concatenate %514, %467 in 1 : vector<8x64xf32>, vector<8x64xf32> -> vector<8x128xf32>
    %516 = arith.truncf %515 : vector<8x128xf32> to vector<8x128xbf16>
    %c0_114 = arith.constant 0 : index
    %c0_115 = arith.constant 0 : index
    %517 = vector.load %arg4[%c0_114, %c0_115] : memref<128x256xbf16, #tpu.memory_space<vmem>>, vector<128x256xbf16>
    %cst_116 = arith.constant dense<0.000000e+00> : vector<8x256xf32>
    %518 = tpu.matmul %516, %517, %cst_116 {dimension_numbers = #tpu.dot_dimension_numbers<[1], [0], [0], [1], [0, 0, 1, 1], [], []>} : vector<8x128xbf16>, vector<128x256xbf16>, vector<8x256xf32> -> vector<8x256xf32>
    %519 = arith.addf %518, %10 : vector<8x256xf32>
    %520 = vector.extract_strided_slice %519 {offsets = [0, 0], sizes = [8, 128], strides = [1, 1]} : vector<8x256xf32> to vector<8x128xf32>
    %521 = arith.negf %520 : vector<8x128xf32>
    %522 = math.exp %521 : vector<8x128xf32>
    %cst_117 = arith.constant 1.000000e+00 : f32
    %523 = vector.broadcast %cst_117 : f32 to vector<8x128xf32>
    %524 = arith.addf %523, %522 : vector<8x128xf32>
    %525 = arith.divf %523, %524 : vector<8x128xf32>
    %526 = vector.extract_strided_slice %525 {offsets = [0, 0], sizes = [8, 64], strides = [1, 1]} : vector<8x128xf32> to vector<8x64xf32>
    %527 = vector.extract_strided_slice %525 {offsets = [0, 64], sizes = [8, 64], strides = [1, 1]} : vector<8x128xf32> to vector<8x64xf32>
    %528 = vector.extract_strided_slice %519 {offsets = [0, 128], sizes = [8, 64], strides = [1, 1]} : vector<8x256xf32> to vector<8x64xf32>
    %529 = vector.extract_strided_slice %519 {offsets = [0, 192], sizes = [8, 64], strides = [1, 1]} : vector<8x256xf32> to vector<8x64xf32>
    %530 = arith.mulf %526, %529 : vector<8x64xf32>
    %531 = arith.addf %528, %530 : vector<8x64xf32>
    %532 = math.tanh %531 : vector<8x64xf32>
    %533 = arith.subf %467, %532 : vector<8x64xf32>
    %534 = arith.mulf %527, %533 : vector<8x64xf32>
    %535 = arith.addf %532, %534 : vector<8x64xf32>
    %536 = tpu.concatenate %535, %488 in 1 : vector<8x64xf32>, vector<8x64xf32> -> vector<8x128xf32>
    %537 = arith.truncf %536 : vector<8x128xf32> to vector<8x128xbf16>
    %c0_118 = arith.constant 0 : index
    %c0_119 = arith.constant 0 : index
    %538 = vector.load %arg5[%c0_118, %c0_119] : memref<128x256xbf16, #tpu.memory_space<vmem>>, vector<128x256xbf16>
    %cst_120 = arith.constant dense<0.000000e+00> : vector<8x256xf32>
    %539 = tpu.matmul %537, %538, %cst_120 {dimension_numbers = #tpu.dot_dimension_numbers<[1], [0], [0], [1], [0, 0, 1, 1], [], []>} : vector<8x128xbf16>, vector<128x256xbf16>, vector<8x256xf32> -> vector<8x256xf32>
    %540 = arith.addf %539, %13 : vector<8x256xf32>
    %541 = vector.extract_strided_slice %540 {offsets = [0, 0], sizes = [8, 128], strides = [1, 1]} : vector<8x256xf32> to vector<8x128xf32>
    %542 = arith.negf %541 : vector<8x128xf32>
    %543 = math.exp %542 : vector<8x128xf32>
    %cst_121 = arith.constant 1.000000e+00 : f32
    %544 = vector.broadcast %cst_121 : f32 to vector<8x128xf32>
    %545 = arith.addf %544, %543 : vector<8x128xf32>
    %546 = arith.divf %544, %545 : vector<8x128xf32>
    %547 = vector.extract_strided_slice %546 {offsets = [0, 0], sizes = [8, 64], strides = [1, 1]} : vector<8x128xf32> to vector<8x64xf32>
    %548 = vector.extract_strided_slice %546 {offsets = [0, 64], sizes = [8, 64], strides = [1, 1]} : vector<8x128xf32> to vector<8x64xf32>
    %549 = vector.extract_strided_slice %540 {offsets = [0, 128], sizes = [8, 64], strides = [1, 1]} : vector<8x256xf32> to vector<8x64xf32>
    %550 = vector.extract_strided_slice %540 {offsets = [0, 192], sizes = [8, 64], strides = [1, 1]} : vector<8x256xf32> to vector<8x64xf32>
    %551 = arith.mulf %547, %550 : vector<8x64xf32>
    %552 = arith.addf %549, %551 : vector<8x64xf32>
    %553 = math.tanh %552 : vector<8x64xf32>
    %554 = arith.subf %488, %553 : vector<8x64xf32>
    %555 = arith.mulf %548, %554 : vector<8x64xf32>
    %556 = arith.addf %553, %555 : vector<8x64xf32>
    %c8_i32 = arith.constant 8 : i32
    %557 = vector.broadcast %c8_i32 : i32 to vector<8x1xi32>
    %558 = arith.cmpi eq, %0, %557 : vector<8x1xi32>
    %559 = vector.shape_cast %558 : vector<8x1xi1> to vector<8x1xi1>
    %560 = vector.broadcast %559 : vector<8x1xi1> to vector<8x64xi1>
    %561 = arith.select %560, %556, %493 : vector<8x64xi1>, vector<8x64xf32>
    %562 = arith.truncf %561 : vector<8x64xf32> to vector<8x64xbf16>
    %c0_122 = arith.constant 0 : index
    %c0_123 = arith.constant 0 : index
    %563 = vector.load %arg9[%c0_122, %c0_123] : memref<64x8xbf16, #tpu.memory_space<vmem>>, vector<64x8xbf16>
    %cst_124 = arith.constant dense<0.000000e+00> : vector<8x8xf32>
    %564 = tpu.matmul %562, %563, %cst_124 {dimension_numbers = #tpu.dot_dimension_numbers<[1], [0], [0], [1], [0, 0, 1, 1], [], []>} : vector<8x64xbf16>, vector<64x8xbf16>, vector<8x8xf32> -> vector<8x8xf32>
    %c0_125 = arith.constant 0 : index
    %c0_126 = arith.constant 0 : index
    %565 = vector.load %arg10[%c0_125, %c0_126] : memref<1x8xf32, #tpu.memory_space<vmem>>, vector<1x8xf32>
    %566 = vector.broadcast %565 : vector<1x8xf32> to vector<8x8xf32>
    %567 = arith.addf %564, %566 : vector<8x8xf32>
    %c0_127 = arith.constant 0 : index
    %c0_128 = arith.constant 0 : index
    %568 = vector.load %arg11[%c0_127, %c0_128] : memref<8x8xf32, #tpu.memory_space<vmem>>, vector<8x8xf32>
    tpu.vector_store %arg11[%c0_127, %c0_128], %567 {strides = array<i32>} : memref<8x8xf32, #tpu.memory_space<vmem>>, vector<8x8xf32>,
    return
  }
}

</mosaic_0001>

<bundles_post_ra>
// kernel: tpu_custom_call.1
= control target key start
LH: loop header
LB: loop body
LE: loop exit
PB: predicated region body
PF: predicated region fallthrough
CT: control target
= control target key end

     0   :  { %16 = vsyncpa [#allocation4], 0  ;;  %s3836_s0 = inlined_call_operand.vmem [shape: s32[8,1], index: 0, kind: input, shape index: {}]   ;;  %s3837_s1 = inlined_call_operand.vmem [shape: bf16[64,16], index: 1, kind: input, shape index: {}]   ;;  %s3838_s2 = inlined_call_operand.hbm [shape: bf16[16,256], index: 2, kind: input, shape index: {}]   ;;  %s3839_s3 = inlined_call_operand.vmem [shape: bf16[64,256], index: 3, kind: input, shape index: {}]   ;;  %s3840_s4 = inlined_call_operand.hbm [shape: bf16[128,256], index: 4, kind: input, shape index: {}]   ;;  %s3841_s5 = inlined_call_operand.hbm [shape: bf16[128,256], index: 5, kind: input, shape index: {}]   ;;  %s3842_s6 = inlined_call_operand.vmem [shape: f32[1,256], index: 6, kind: input, shape index: {}]   ;;  %s3843_s7 = inlined_call_operand.vmem [shape: f32[1,256], index: 7, kind: input, shape index: {}]   ;;  %s3844_s8 = inlined_call_operand.vmem [shape: f32[1,256], index: 8, kind: input, shape index: {}]   ;;  %s3845_s9 = inlined_call_operand.vmem [shape: bf16[64,8], index: 9, kind: input, shape index: {}]   ;;  %s3846_s10 = inlined_call_operand.vmem [shape: f32[1,8], index: 10, kind: input, shape index: {}]   ;;  %s3847_s11 = inlined_call_operand.hbm [shape: f32[8,8], index: 11, kind: output, shape index: {}]  }
   0x1   :  { %17 = vsyncpa [#allocation7], 0 }
   0x2   :  { %18 = vsyncpa [#allocation5], 0  ;;  %s42_s19 = sshll.u32 %s3840_s4, 4  ;;  %s2833_s20 = smov [#allocation6]   ;;  %s43_s19 = int_to_ptr.hbm [resolvable:$true] %s42_s19 }
   0x3   :  { %s44_s21 = sshll.u32 %s2833_s20, 4  ;;  %s27_s24 = sshll.u32 %s3838_s2, 4  ;;  %s45_s21 = int_to_ptr.vmem [resolvable:$true] %s44_s21  ;;  %s28_s24 = int_to_ptr.hbm [resolvable:$true] %s27_s24 }
   0x4   :  { %s2834_s25 = smov 128   ;;  %s2835_s26 = smov 8  }
   0x5   :  { %50 = dma.hbm_to_vmem [thread:$0]  %s43_s19, 2048, %s45_s21, [#allocation7], %s2834_s25, %s2834_s25, %s2835_s26  }
   0x6   :  { %s2836_s27 = smov [#allocation3]   ;;  %s55_s12 = sshll.u32 %s3841_s5, 4  ;;  %s56_s12 = int_to_ptr.hbm [resolvable:$true] %s55_s12 }
   0x7   :  { %s29_s28 = sshll.u32 %s2836_s27, 4  ;;  %s2837_s4 = smov [#allocation8]   ;;  %s30_s28 = int_to_ptr.vmem [resolvable:$true] %s29_s28 }
   0x8   :  { %35 = dma.hbm_to_vmem [thread:$0]  %s28_s24, 256, %s30_s28, [#allocation4], %s2834_s25, %s2834_s25, %s2835_s26  }
   0x9   :  { %s57_s13 = sshll.u32 %s2837_s4, 4  ;;  %s58_s13 = int_to_ptr.vmem [resolvable:$true] %s57_s13 }
   0xa   :  { %63 = dma.hbm_to_vmem [thread:$0]  %s56_s12, 2048, %s58_s13, [#allocation7], %s2834_s25, %s2834_s25, %s2835_s26  }
   0xb   :  { %2827 = dma.done.wait [#allocation4], 256  }
   0xc   :  { %2828 = vsyncadd [#allocation4], 4294967040 }
   0xd   :  { %2829 = dma.done.wait [#allocation7], 4096  }
   0xe   :  { %2830 = vsyncadd [#allocation7], 4294963200  ;;  %v3848_v0 = vmov 0   ;;  %v2537_v1 = vld [vmem:[%s3839_s3 + $0x34] sm:$0xf]  ;;  %v2525_v10 = vld [vmem:[%s3837_s1] sm:$0xff] }
   0xf   :  { %2583 = vset.pattern.permute.xlu1 %v3848_v0  ;;  %2584 = vset.pattern.permute.xlu2 %v3848_v0  ;;  %v2326_v2 = vld [vmem:[%s3839_s3 + $0x38] sm:$0xf0]  ;;  %v2535_v3 = vld [vmem:[%s3839_s3 + $0x24] sm:$0xf]  ;;  %v2318_v5 = vld [vmem:[%s3839_s3 + $0x28] sm:$0xf0] }
  0x10   :  { %2585 = vset.pattern.permute.xlu0 %v3848_v0  ;;  %v2922_v4 = vor.u32 %v2537_v1, %v2326_v2  ;;  %v2529_v6 = vld [vmem:[#allocation3 + $0x4] sm:$0xf]  ;;  %v2286_v7 = vld [vmem:[#allocation3 + $0x8] sm:$0xf0]  ;;  %v2928_v9 = vor.u32 %v2535_v3, %v2318_v5  ;;  %vm134_vm0 = vcmask 130048   ;;  %vm283_vm5 = vcmask 523264  }
  0x11   :  { %v2289_v8 = vor.u32 %v2529_v6, %v2286_v7  ;;  %v2324_v11 = vld [vmem:[%s3839_s3 + $0x30] sm:$0xf]  ;;  %v2533_v12 = vld [vmem:[%s3839_s3 + $0x14] sm:$0xf]  ;;  %v2310_v13 = vld [vmem:[%s3839_s3 + $0x18] sm:$0xf0] }
  0x12   :  { %304 = vmatpush.bf16.msra.mxu3 %v2922_v4  ;;  %v2538_v14 = vld [vmem:[%s3839_s3 + $0x34] sm:$0xf0]  ;;  %v2316_v16 = vld [vmem:[%s3839_s3 + $0x20] sm:$0xf]  ;;  %v2536_v17 = vld [vmem:[%s3839_s3 + $0x24] sm:$0xf0]  ;;  %v2954_v20 = vor.u32 %v2533_v12, %v2310_v13 }
  0x13   :  { %183 = vmatpush.bf16.msra.mxu1 %v2289_v8  ;;  %v2945_v15 = vor.u32 %v2538_v14, %v2324_v11  ;;  %v2284_v18 = vld [vmem:[#allocation3] sm:$0xf]  ;;  %v2530_v19 = vld [vmem:[#allocation3 + $0x4] sm:$0xf0]  ;;  %v2531_v22 = vld [vmem:[%s3839_s3 + $0x4] sm:$0xf]  ;;  %v2964_v24 = vor.u32 %v2536_v17, %v2316_v16 }
  0x14   :  { %v2285_v21 = vor.u32 %v2530_v19, %v2284_v18  ;;  %v2302_v23 = vld [vmem:[%s3839_s3 + $0x8] sm:$0xf0]  ;;  %v2308_v25 = vld [vmem:[%s3839_s3 + $0x10] sm:$0xf]  ;;  %v2534_v26 = vld [vmem:[%s3839_s3 + $0x14] sm:$0xf0] }
  0x15   :  { %291 = vmatpush.bf16.msra.mxu2 %v2945_v15  ;;  %v2973_v27 = vor.u32 %v2531_v22, %v2302_v23  ;;  %v2976_v28 = vor.u32 %v2534_v26, %v2308_v25  ;;  %v2300_v29 = vld [vmem:[%s3839_s3] sm:$0xf]  ;;  %v2532_v30 = vld [vmem:[%s3839_s3 + $0x4] sm:$0xf0]  ;;  %s2839_s3 = smov 64   ;;  %vm3072_vm6 = vmpackc.low %vm283_vm5, %vm283_vm5  ;;  %s2840_s20 = smov [#allocation9]  }
  0x16   :  { %305 = vmatpush.bf16.msra.mxu3 %v2928_v9  ;;  %2294 = vmatmul.msk.bf16.vlgmr.msra.gmra.mxu1 %vm134_vm0, %v2525_v10  ;;  %v2987_v31 = vor.u32 %v2532_v30, %v2300_v29  ;;  %v98_v32 = vld [vmem:[%s3842_s6] sm:$0x3]  ;;  %v2554_v1 = vld [vmem:[#allocation6 + $0x74] sm:$0xf0]  ;;  %v2553_v2 = vld [vmem:[#allocation6 + $0x74] sm:$0xf] }
  0x17   :  { %154 = vmatpush.bf16.msra.mxu0 %v2285_v21  ;;  %v2995_v33 = vperm.slane %v98_v32, 1  ;;  %v2999_v41 = vperm.slane %v98_v32, 0  ;;  %v2389_v63 = vld [vmem:[#allocation6 + $0x70] sm:$0xf]  ;;  %v2391_v5 = vld [vmem:[#allocation6 + $0x78] sm:$0xf0] }
  0x18   :  { %v3009_v3 = vor.u32 %v2554_v1, %v2389_v63  ;;  %v2381_v6 = vld [vmem:[#allocation6 + $0x60] sm:$0xf]  ;;  %v2552_v7 = vld [vmem:[#allocation6 + $0x64] sm:$0xf0]  ;;  %v3011_v8 = vor.u32 %v2553_v2, %v2391_v5  ;;  %v2383_v11 = vld [vmem:[#allocation6 + $0x68] sm:$0xf0] }
  0x19   :  { %292 = vmatpush.bf16.msra.mxu2 %v2964_v24  ;;  %3875 = vst [vmem:[#allocation13_spill] sm:$0xff] %v2995_v33  ;;  %v3014_v12 = vor.u32 %v2552_v7, %v2381_v6  ;;  %v2373_v14 = vld [vmem:[#allocation6 + $0x50] sm:$0xf]  ;;  %v2550_v16 = vld [vmem:[#allocation6 + $0x54] sm:$0xf0]  ;;  %s2253_s21 = sshll.u32 %s2840_s20, 4  ;;  %s2254_s21 = int_to_ptr.vmem [resolvable:$true] %s2253_s21 }
  0x1a   :  { %306 = vmatpush.bf16.msra.mxu3 %v2954_v20  ;;  %2290 = vmatmul.msk.bf16.vlgmr.msra.gmra.mxu0 %vm134_vm0, %v2525_v10  ;;  %3876 = vst [vmem:[#allocation14_spill] sm:$0xff] %v2999_v41  ;;  %v2551_v10 = vld [vmem:[#allocation6 + $0x64] sm:$0xf]  ;;  %v2549_v17 = vld [vmem:[#allocation6 + $0x54] sm:$0xf]  ;;  %v3020_v19 = vor.u32 %v2550_v16, %v2373_v14  ;;  %s2255_s24 = sshll.u32 %s3847_s11, 4  ;;  %s2256_s24 = int_to_ptr.hbm [resolvable:$true] %s2255_s24 }
  0x1b   :  { %v3017_v13 = vor.u32 %v2551_v10, %v2383_v11  ;;  %v2375_v18 = vld [vmem:[#allocation6 + $0x58] sm:$0xf0]  ;;  %v2365_v22 = vld [vmem:[#allocation6 + $0x40] sm:$0xf]  ;;  %v2548_v23 = vld [vmem:[#allocation6 + $0x44] sm:$0xf0] }
  0x1c   :  { %v3023_v21 = vor.u32 %v2549_v17, %v2375_v18  ;;  %v2547_v25 = vld [vmem:[#allocation6 + $0x44] sm:$0xf]  ;;  %v2367_v26 = vld [vmem:[#allocation6 + $0x48] sm:$0xf0]  ;;  %v3026_v29 = vor.u32 %v2548_v23, %v2365_v22  ;;  %v2357_v32 = vld [vmem:[#allocation6 + $0x30] sm:$0xf] }
  0x1d   :  { %293 = vmatpush.bf16.msra.mxu2 %v2976_v28  ;;  %v3029_v30 = vor.u32 %v2547_v25, %v2367_v26 }
  0x1e   :  { %307 = vmatpush.bf16.msra.mxu3 %v2973_v27 }
  0x21   :  { %308 = vmatmul.bf16.vlgmr.msra.gmra.mxu3 %v3848_v0  ;;  %294 = vmatpush.bf16.msra.mxu2 %v2987_v31 }
  0x22   :  { %463 = vmatpush.bf16.msrb.mxu3 %v3011_v8 }
  0x24   :  { %295 = vmatmul.bf16.vlgmr.msra.gmra.mxu2 %v3848_v0 }
  0x25   :  { %450 = vmatpush.bf16.msrb.mxu2 %v3009_v3 }
  0x26   :  { %464 = vmatpush.bf16.msrb.mxu3 %v3017_v13 }
  0x29   :  { %451 = vmatpush.bf16.msrb.mxu2 %v3014_v12 }
  0x2a   :  { %465 = vmatpush.bf16.msrb.mxu3 %v3023_v21 }
  0x2d   :  { %452 = vmatpush.bf16.msrb.mxu2 %v3020_v19 }
  0x2e   :  { %466 = vmatpush.bf16.msrb.mxu3 %v3029_v30 }
  0x31   :  { %453 = vmatpush.bf16.msrb.mxu2 %v3026_v29 }
  0x93   :  { %v185_v34 = vpop.f32.mrf.mxu1 }
  0x94   :  { %v186_v35 = vadd.f32 %v185_v34, %v2995_v33  ;;  %v2546_v34 = vld [vmem:[#allocation6 + $0x34] sm:$0xf0] }
  0x97   :  { %v156_v42 = vpop.f32.mrf.mxu0 }
  0x98   :  { %v157_v43 = vadd.f32 %v156_v42, %v2999_v41  ;;  %v2543_v42 = vld [vmem:[#allocation6 + $0x24] sm:$0xf] }
  0x9b   :  { %v187_v14 = vpop.f32.mrf.mxu1 }
  0x9c   :  { %v188_v16 = vadd.f32 %v187_v14, %v2995_v33 }
  0x9f   :  { %v158_v26 = vpop.f32.mrf.mxu0 }
  0xa4   :  { %v309_v36 = vpop.f32.mrf.mxu3 }
  0xa5   :  { %v314_v37 = vadd.f32 %v309_v36, %v186_v35  ;;  %v2545_v35 = vld [vmem:[#allocation6 + $0x34] sm:$0xf]  ;;  %v2359_v36 = vld [vmem:[#allocation6 + $0x38] sm:$0xf0] }
  0xa7   :  { %335 = vrot.lane.b32.xlu0 %v314_v37, %s2839_s3  ;;  %v296_v38 = vpop.f32.mrf.mxu2 }
  0xa8   :  { %v313_v44 = vadd.f32 %v296_v38, %v157_v43  ;;  %v3035_v38 = vor.u32 %v2545_v35, %v2359_v36  ;;  %v2351_v43 = vld [vmem:[#allocation6 + $0x28] sm:$0xf0] }
  0xaa   :  { %v2330_v45 = vmul.f32 -1.442695, %v313_v44  ;;  %467 = vmatpush.bf16.msrb.mxu3 %v3035_v38 }
  0xac   :  { %v311_v39 = vpop.f32.mrf.mxu3  ;;  %2587 = vpow2.f32 %v2330_v45  ;;  %v3041_v45 = vor.u32 %v2543_v42, %v2351_v43 }
  0xad   :  { %v2349_v39 = vld [vmem:[#allocation6 + $0x20] sm:$0xf] }
  0xae   :  { %468 = vmatpush.bf16.msrb.mxu3 %v3041_v45 }
  0xaf   :  { %v298_v40 = vpop.f32.mrf.mxu2 }
  0xb0   :  { %v2544_v40 = vld [vmem:[#allocation6 + $0x24] sm:$0xf0] }
  0xb1   :  { %v3038_v44 = vor.u32 %v2544_v40, %v2349_v39 }
  0xb2   :  { %v2588_v46 = vpop.eup %2587 }
  0xb3   :  { %v318_v47 = vadd.f32 1.0, %v2588_v46  ;;  %v2341_v46 = vld [vmem:[#allocation6 + $0x10] sm:$0xf] }
  0xb5   :  { %2589 = vrcp.f32 %v318_v47  ;;  %vm324_vm1 = vweird.f32 %v318_v47  ;;  %v330_v52 = vand.u32 2147483648, %v318_v47  ;;  %v328_v54 = vand.u32 2147483647, %v318_v47 }
  0xb7   :  { %v331_v55 = vor.u32 1.1754944e-38, %v330_v52  ;;  %vm329_vm4 = vcmp.eq.f32.partialorder %v328_v54, 8.507059e+37  ;;  %v2333_v54 = vld [vmem:[#allocation6] sm:$0xf] }
  0xbb   :  { %v2590_v48 = vpop.eup %2589 }
  0xbc   :  { %v320_v49 = vmul.f32 %v2590_v48, %v318_v47  ;;  %vm325_vm2 = vweird.f32 %v2590_v48  ;;  %v2542_v47 = vld [vmem:[#allocation6 + $0x14] sm:$0xf0] }
  0xbd   :  { %vm326_vm3 = vmor %vm324_vm1, %vm325_vm2 }
  0xbe   :  { %v321_v50 = vsub.f32 1.0, %v320_v49  ;;  %v2343_v49 = vld [vmem:[#allocation6 + $0x18] sm:$0xf0] }
  0xc0   :  { %v322_v51 = vmul.f32 %v2590_v48, %v321_v50  ;;  %v3044_v50 = vor.u32 %v2542_v47, %v2341_v46 }
  0xc2   :  { %v323_v53 = vadd.f32 %v2590_v48, %v322_v51  ;;  %3877 = vst [vmem:[#allocation15_spill] sm:$0xff] %v3044_v50 }
  0xc4   :  { %v327_v56 = vsel %vm326_vm3, %v2590_v48, %v323_v53  ;;  %v2541_v48 = vld [vmem:[#allocation6 + $0x14] sm:$0xf] }
  0xc5   :  { %v3002_v58 = vsel %vm329_vm4, %v331_v55, %v327_v56  ;;  %v3047_v51 = vor.u32 %v2541_v48, %v2343_v49  ;;  %v2540_v55 = vld [vmem:[#allocation6 + $0x4] sm:$0xf0]  ;;  %v2539_v56 = vld [vmem:[#allocation6 + $0x4] sm:$0xf] }
  0xc7   :  { %3878 = vst [vmem:[#allocation16_spill] sm:$0xff] %v3047_v51  ;;  %469 = vmatpush.bf16.msrb.mxu3 %v3047_v51 }
 0x119   :  { %v336_v57 = vpop.permute.xlu0 %335 }
 0x11a   :  { %v338_v59 = vmul.f32 %v336_v57, %v3002_v58  ;;  %v3053_v57 = vor.u32 %v2540_v55, %v2333_v54 }
 0x11c   :  { %v339_v60 = vadd.f32 %v338_v59, %v314_v37  ;;  %v3032_v37 = vor.u32 %v2546_v34, %v2357_v32  ;;  %3879 = vst [vmem:[#allocation17_spill] sm:$0xff] %v3053_v57  ;;  %v2335_v59 = vld [vmem:[#allocation6 + $0x8] sm:$0xf0]  ;;  %v159_v32 = vadd.f32 %v158_v26, %v2999_v41 }
 0x11e   :  { %2591 = vtanh.f32 %v339_v60  ;;  %454 = vmatpush.bf16.msrb.mxu2 %v3032_v37  ;;  %v3055_v60 = vor.u32 %v2539_v56, %v2335_v59 }
 0x120   :  { %3880 = vst [vmem:[#allocation18_spill] sm:$0xff] %v3055_v60  ;;  %470 = vmatpush.bf16.msrb.mxu3 %v3055_v60 }
 0x122   :  { %455 = vmatpush.bf16.msrb.mxu2 %v3038_v44 }
 0x124   :  { %v3005_v61 = vpop.eup %2591  ;;  %704 = vmatpush.bf16.msra.mxu3 %v2922_v4 }
 0x125   :  { %v341_v62 = vsub.f32 0.0, %v3005_v61 }
 0x126   :  { %456 = vmatpush.bf16.msrb.mxu2 %v3044_v50 }
 0x127   :  { %343 = vrot.lane.b32.xlu0 %v341_v62, %s2839_s3 }
 0x128   :  { %705 = vmatpush.bf16.msra.mxu3 %v2928_v9 }
 0x12a   :  { %457 = vmatpush.bf16.msrb.mxu2 %v3053_v57 }
 0x12c   :  { %706 = vmatpush.bf16.msra.mxu3 %v2954_v20 }
 0x12e   :  { %691 = vmatpush.bf16.msra.mxu2 %v2945_v15 }
 0x130   :  { %707 = vmatpush.bf16.msra.mxu3 %v2973_v27 }
 0x132   :  { %692 = vmatpush.bf16.msra.mxu2 %v2964_v24 }
 0x136   :  { %693 = vmatpush.bf16.msra.mxu2 %v2976_v28 }
 0x13a   :  { %694 = vmatpush.bf16.msra.mxu2 %v2987_v31 }
 0x199   :  { %v344_v52 = vpop.permute.xlu0 %343 }
 0x19a   :  { %v346_v53 = vmul.f32 %v344_v52, %v3002_v58 }
 0x19c   :  { %348 = vrot.lane.b32.xlu1 %v346_v53, %s2839_s3 }
 0x20e   :  { %v349_v58 = vpop.permute.xlu1 %348 }
 0x20f   :  { %v3068_v62 = vadd.f32 %v3005_v61, %v349_v58  ;;  %v221_v61 = vld [vmem:[%s3843_s7] sm:$0x3] }
 0x210   :  { %v3111_v2 = vperm.slane %v221_v61, 1  ;;  %v3118_v35 = vperm.slane %v221_v61, 0 }
 0x211   :  { %v2396_v1 = vpack.c.bf16 %v3068_v62, %v3068_v62 }
 0x212   :  { %3883 = vst [vmem:[#allocation19_spill] sm:$0xff] %v3111_v2 }
 0x213   :  { %2397 = vmatmul.msk.bf16.vlgmr.msrb.gmra.mxu2 %vm3072_vm6, %v2396_v1  ;;  %2400 = vmatmul.msk.bf16.vlgmr.msrb.gmra.mxu3 %vm3072_vm6, %v2396_v1  ;;  %3884 = vst [vmem:[#allocation20_spill] sm:$0xff] %v3118_v35 }
 0x214   :  { %758 = vmatpush.bf16.msrb.mxu2 %v3009_v3  ;;  %771 = vmatpush.bf16.msrb.mxu3 %v3011_v8 }
 0x218   :  { %759 = vmatpush.bf16.msrb.mxu2 %v3014_v12  ;;  %772 = vmatpush.bf16.msrb.mxu3 %v3017_v13 }
 0x21c   :  { %760 = vmatpush.bf16.msrb.mxu2 %v3020_v19  ;;  %773 = vmatpush.bf16.msrb.mxu3 %v3023_v21 }
 0x220   :  { %761 = vmatpush.bf16.msrb.mxu2 %v3026_v29  ;;  %774 = vmatpush.bf16.msrb.mxu3 %v3029_v30 }
 0x223   :  { %2473 = vmatmul.msk.bf16.vlgmr.msra.gmra.mxu2 %vm283_vm5, %v2396_v1  ;;  %2474 = vmatmul.msk.bf16.vlgmr.msra.gmra.mxu3 %vm283_vm5, %v2396_v1 }
 0x224   :  { %762 = vmatpush.bf16.msrb.mxu2 %v3032_v37  ;;  %775 = vmatpush.bf16.msrb.mxu3 %v3035_v38 }
 0x228   :  { %763 = vmatpush.bf16.msrb.mxu2 %v3038_v44  ;;  %776 = vmatpush.bf16.msrb.mxu3 %v3041_v45 }
 0x22c   :  { %764 = vmatpush.bf16.msrb.mxu2 %v3044_v50  ;;  %777 = vmatpush.bf16.msrb.mxu3 %v3047_v51 }
 0x230   :  { %765 = vmatpush.bf16.msrb.mxu2 %v3053_v57  ;;  %778 = vmatpush.bf16.msrb.mxu3 %v3055_v60 }
 0x234   :  { %907 = vmatpush.bf16.msra.mxu2 %v2945_v15  ;;  %920 = vmatpush.bf16.msra.mxu3 %v2922_v4 }
 0x238   :  { %908 = vmatpush.bf16.msra.mxu2 %v2964_v24  ;;  %921 = vmatpush.bf16.msra.mxu3 %v2928_v9 }
 0x23c   :  { %909 = vmatpush.bf16.msra.mxu2 %v2976_v28  ;;  %922 = vmatpush.bf16.msra.mxu3 %v2954_v20 }
 0x240   :  { %910 = vmatpush.bf16.msra.mxu2 %v2987_v31  ;;  %923 = vmatpush.bf16.msra.mxu3 %v2973_v27 }
 0x296   :  { %v459_v5 = vpop.f32.mrf.mxu2  ;;  %v472_v6 = vpop.f32.mrf.mxu3 }
 0x297   :  { %v473_v7 = vadd.f32 %v472_v6, %v3111_v2  ;;  %v460_v39 = vadd.f32 %v459_v5, %v3118_v35 }
 0x299   :  { %496 = vrot.lane.b32.xlu1 %v473_v7, %s2839_s3  ;;  %v2401_v40 = vmul.f32 -1.442695, %v460_v39 }
 0x29e   :  { %v461_v10 = vpop.f32.mrf.mxu2  ;;  %v474_v11 = vpop.f32.mrf.mxu3 }
 0x2a6   :  { %v696_v17 = vpop.f32.mrf.mxu2  ;;  %v709_v18 = vpop.f32.mrf.mxu3 }
 0x2a7   :  { %v714_v22 = vadd.f32 %v709_v18, %v188_v16  ;;  %v713_v34 = vadd.f32 %v696_v17, %v159_v32 }
 0x2a9   :  { %735 = vrot.lane.b32.xlu2 %v714_v22, %s2839_s3  ;;  %v2475_v36 = vmul.f32 -1.442695, %v713_v34 }
 0x2ab   :  { %2593 = vpow2.f32 %v2475_v36 }
 0x2ac   :  { %2595 = vpow2.f32 %v2401_v40 }
 0x2ae   :  { %v698_v23 = vpop.f32.mrf.mxu2  ;;  %v711_v25 = vpop.f32.mrf.mxu3 }
 0x2b1   :  { %v2594_v42 = vpop.eup %2593 }
 0x2b2   :  { %v718_v43 = vadd.f32 1.0, %v2594_v42  ;;  %v2596_v46 = vpop.eup %2595 }
 0x2b3   :  { %v479_v47 = vadd.f32 1.0, %v2596_v46  ;;  %v2569_v46 = vld [vmem:[#allocation8 + $0x74] sm:$0xf] }
 0x2b4   :  { %2597 = vrcp.f32 %v718_v43  ;;  %v730_v58 = vand.u32 2147483648, %v718_v43  ;;  %vm724_vm8 = vweird.f32 %v718_v43  ;;  %v728_v1 = vand.u32 2147483647, %v718_v43 }
 0x2b5   :  { %2599 = vrcp.f32 %v479_v47  ;;  %v491_v17 = vand.u32 2147483648, %v479_v47  ;;  %vm485_vm12 = vweird.f32 %v479_v47  ;;  %v489_v23 = vand.u32 2147483647, %v479_v47 }
 0x2b6   :  { %v731_v6 = vor.u32 1.1754944e-38, %v730_v58  ;;  %vm729_vm10 = vcmp.eq.f32.partialorder %v728_v1, 8.507059e+37  ;;  %v2452_v58 = vld [vmem:[#allocation8 + $0x60] sm:$0xf]  ;;  %v2568_v1 = vld [vmem:[#allocation8 + $0x64] sm:$0xf0] }
 0x2b7   :  { %v492_v26 = vor.u32 1.1754944e-38, %v491_v17  ;;  %vm490_vm14 = vcmp.eq.f32.partialorder %v489_v23, 8.507059e+37  ;;  %v2561_v23 = vld [vmem:[#allocation8 + $0x34] sm:$0xf] }
 0x2ba   :  { %v2598_v48 = vpop.eup %2597 }
 0x2bb   :  { %v720_v49 = vmul.f32 %v2598_v48, %v718_v43  ;;  %v2600_v53 = vpop.eup %2599  ;;  %vm725_vm7 = vweird.f32 %v2598_v48 }
 0x2bc   :  { %v481_v55 = vmul.f32 %v2600_v53, %v479_v47  ;;  %vm726_vm9 = vmor %vm724_vm8, %vm725_vm7  ;;  %vm486_vm11 = vweird.f32 %v2600_v53  ;;  %v2462_v47 = vld [vmem:[#allocation8 + $0x78] sm:$0xf0] }
 0x2bd   :  { %v721_v52 = vsub.f32 1.0, %v720_v49  ;;  %vm487_vm13 = vmor %vm485_vm12, %vm486_vm11  ;;  %v3136_v49 = vor.u32 %v2569_v46, %v2462_v47  ;;  %v2559_v47 = vld [vmem:[#allocation8 + $0x24] sm:$0xf] }
 0x2be   :  { %v482_v59 = vsub.f32 1.0, %v481_v55  ;;  %v2570_v55 = vld [vmem:[#allocation8 + $0x74] sm:$0xf0] }
 0x2bf   :  { %v722_v54 = vmul.f32 %v2598_v48, %v721_v52  ;;  %v2454_v52 = vld [vmem:[#allocation8 + $0x68] sm:$0xf0]  ;;  %624 = vmatpush.bf16.msrb.mxu1 %v3136_v49 }
 0x2c0   :  { %v483_v5 = vmul.f32 %v2600_v53, %v482_v59 }
 0x2c1   :  { %v723_v56 = vadd.f32 %v2598_v48, %v722_v54  ;;  %v2460_v54 = vld [vmem:[#allocation8 + $0x70] sm:$0xf] }
 0x2c2   :  { %v484_v16 = vadd.f32 %v2600_v53, %v483_v5  ;;  %v3143_v59 = vor.u32 %v2570_v55, %v2460_v54 }
 0x2c3   :  { %v727_v61 = vsel %vm726_vm9, %v2598_v48, %v723_v56  ;;  %v2526_v48 = vld [vmem:[%s3837_s1 + $0x8] sm:$0xff] }
 0x2c4   :  { %v3121_v11 = vsel %vm729_vm10, %v731_v6, %v727_v61  ;;  %v488_v25 = vsel %vm487_vm13, %v2600_v53, %v484_v16  ;;  %2295 = vmatmul.msk.bf16.gmra.mxu1 %vm134_vm0, %v2526_v48  ;;  %2291 = vmatmul.msk.bf16.gmra.mxu0 %vm134_vm0, %v2526_v48  ;;  %v2565_v53 = vld [vmem:[#allocation8 + $0x54] sm:$0xf]  ;;  %v2446_v56 = vld [vmem:[#allocation8 + $0x58] sm:$0xf0]  ;;  %v3146_v61 = vor.u32 %v2568_v1, %v2452_v58  ;;  %v2444_v6 = vld [vmem:[#allocation8 + $0x50] sm:$0xf] }
 0x2c5   :  { %v493_v34 = vsel %vm490_vm14, %v492_v26, %v488_v25  ;;  %611 = vmatpush.bf16.msrb.mxu0 %v3143_v59  ;;  %v3149_v5 = vor.u32 %v2565_v53, %v2446_v56  ;;  %v2438_v16 = vld [vmem:[#allocation8 + $0x48] sm:$0xf0]  ;;  %v2430_v25 = vld [vmem:[#allocation8 + $0x38] sm:$0xf0]  ;;  %v2436_v26 = vld [vmem:[#allocation8 + $0x40] sm:$0xf] }
 0x2c6   :  { %v2422_v48 = vld [vmem:[#allocation8 + $0x28] sm:$0xf0]  ;;  %v2420_v58 = vld [vmem:[#allocation8 + $0x20] sm:$0xf]  ;;  %v2560_v1 = vld [vmem:[#allocation8 + $0x24] sm:$0xf0] }
 0x2c7   :  { %v2528_v56 = vld [vmem:[%s3837_s1 + $0x18] sm:$0xff] }
 0x2c9   :  { %612 = vmatpush.bf16.msrb.mxu0 %v3146_v61 }
 0x303   :  { %v736_v10 = vpop.permute.xlu2 %735 }
 0x304   :  { %v738_v14 = vmul.f32 %v736_v10, %v3121_v11  ;;  %v2566_v10 = vld [vmem:[#allocation8 + $0x54] sm:$0xf0] }
 0x305   :  { %v3152_v17 = vor.u32 %v2566_v10, %v2444_v6  ;;  %v3184_v6 = vor.u32 %v2560_v1, %v2420_v58  ;;  %v2557_v10 = vld [vmem:[#allocation8 + $0x14] sm:$0xf] }
 0x306   :  { %v739_v18 = vadd.f32 %v738_v14, %v714_v22  ;;  %v2563_v14 = vld [vmem:[#allocation8 + $0x44] sm:$0xf] }
 0x307   :  { %613 = vmatpush.bf16.msrb.mxu0 %v3152_v17 }
 0x308   :  { %2601 = vtanh.f32 %v739_v18  ;;  %v3155_v18 = vor.u32 %v2563_v14, %v2438_v16  ;;  %v2414_v14 = vld [vmem:[#allocation8 + $0x18] sm:$0xf0]  ;;  %v2412_v16 = vld [vmem:[#allocation8 + $0x10] sm:$0xf] }
 0x30b   :  { %v497_v32 = vpop.permute.xlu1 %496 }
 0x30c   :  { %v499_v36 = vmul.f32 %v497_v32, %v493_v34  ;;  %v2564_v32 = vld [vmem:[#allocation8 + $0x44] sm:$0xf0] }
 0x30d   :  { %v3164_v46 = vor.u32 %v2564_v32, %v2436_v26  ;;  %v2404_v26 = vld [vmem:[#allocation8] sm:$0xf]  ;;  %v2556_v32 = vld [vmem:[#allocation8 + $0x4] sm:$0xf0] }
 0x30e   :  { %v3124_v39 = vpop.eup %2601  ;;  %v500_v40 = vadd.f32 %v499_v36, %v473_v7  ;;  %v2567_v7 = vld [vmem:[#allocation8 + $0x64] sm:$0xf] }
 0x30f   :  { %v741_v42 = vsub.f32 %v3068_v62, %v3124_v39  ;;  %v3141_v62 = vor.u32 %v2567_v7, %v2454_v52  ;;  %v2428_v7 = vld [vmem:[#allocation8 + $0x30] sm:$0xf]  ;;  %v2562_v52 = vld [vmem:[#allocation8 + $0x34] sm:$0xf0]  ;;  %614 = vmatpush.bf16.msrb.mxu0 %v3164_v46 }
 0x310   :  { %2603 = vtanh.f32 %v500_v40  ;;  %v3173_v53 = vor.u32 %v2562_v52, %v2428_v7 }
 0x311   :  { %743 = vrot.lane.b32.xlu0 %v741_v42, %s2839_s3  ;;  %625 = vmatpush.bf16.msrb.mxu1 %v3141_v62  ;;  %v2527_v42 = vld [vmem:[%s3837_s1 + $0x10] sm:$0xff] }
 0x312   :  { %2296 = vmatmul.msk.bf16.gmra.mxu1 %vm134_vm0, %v2527_v42  ;;  %2292 = vmatmul.msk.bf16.gmra.mxu0 %vm134_vm0, %v2527_v42  ;;  %v2406_v42 = vld [vmem:[#allocation8 + $0x8] sm:$0xf0] }
 0x313   :  { %615 = vmatpush.bf16.msrb.mxu0 %v3173_v53 }
 0x315   :  { %626 = vmatpush.bf16.msrb.mxu1 %v3149_v5 }
 0x316   :  { %v3129_v22 = vpop.eup %2603 }
 0x317   :  { %v502_v43 = vsub.f32 0.0, %v3129_v22  ;;  %616 = vmatpush.bf16.msrb.mxu0 %v3184_v6 }
 0x319   :  { %504 = vrot.lane.b32.xlu2 %v502_v43, %s2839_s3  ;;  %627 = vmatpush.bf16.msrb.mxu1 %v3155_v18  ;;  %v3162_v43 = vor.u32 %v2561_v23, %v2430_v25  ;;  %v2558_v23 = vld [vmem:[#allocation8 + $0x14] sm:$0xf0] }
 0x31a   :  { %v3189_v25 = vor.u32 %v2558_v23, %v2412_v16 }
 0x31c   :  { %617 = vmatpush.bf16.msrb.mxu0 %v3189_v25 }
 0x31d   :  { %628 = vmatpush.bf16.msrb.mxu1 %v3162_v43 }
 0x322   :  { %2297 = vmatmul.msk.bf16.gmra.mxu1 %vm134_vm0, %v2528_v56  ;;  %2293 = vmatmul.msk.bf16.gmra.mxu0 %vm134_vm0, %v2528_v56 }
 0x341   :  { %v3242_v63 = vpop.f32.mrf.mxu1 }
 0x373   :  { %v505_v36 = vpop.permute.xlu2 %504 }
 0x374   :  { %v507_v40 = vmul.f32 %v505_v36, %v493_v34  ;;  %v3171_v34 = vor.u32 %v2559_v47, %v2422_v48  ;;  %v2555_v36 = vld [vmem:[#allocation8 + $0x4] sm:$0xf] }
 0x375   :  { %v3195_v47 = vor.u32 %v2555_v36, %v2406_v42 }
 0x376   :  { %509 = vrot.lane.b32.xlu1 %v507_v40, %s2839_s3  ;;  %629 = vmatpush.bf16.msrb.mxu1 %v3171_v34  ;;  %v3193_v40 = vor.u32 %v2556_v32, %v2404_v26 }
 0x378   :  { %618 = vmatpush.bf16.msrb.mxu0 %v3193_v40 }
 0x37c   :  { %827 = vmatpush.bf16.msra.mxu0 %v3143_v59 }
 0x380   :  { %828 = vmatpush.bf16.msra.mxu0 %v3146_v61 }
 0x383   :  { %v744_v54 = vpop.permute.xlu0 %743 }
 0x384   :  { %v746_v55 = vmul.f32 %v744_v54, %v3121_v11  ;;  %v3187_v11 = vor.u32 %v2557_v10, %v2414_v14  ;;  %829 = vmatpush.bf16.msra.mxu0 %v3152_v17  ;;  %v3246_v54 = vpop.f32.mrf.mxu1 }
 0x385   :  { %3885 = vst [vmem:[#allocation21_spill] sm:$0xff] %v3246_v54 }
 0x386   :  { %748 = vrot.lane.b32.xlu2 %v746_v55, %s2839_s3  ;;  %630 = vmatpush.bf16.msrb.mxu1 %v3187_v11 }
 0x388   :  { %830 = vmatpush.bf16.msra.mxu0 %v3164_v46 }
 0x38a   :  { %631 = vmatpush.bf16.msrb.mxu1 %v3195_v47 }
 0x38c   :  { %831 = vmatpush.bf16.msra.mxu0 %v3173_v53 }
 0x38e   :  { %840 = vmatpush.bf16.msra.mxu1 %v3136_v49 }
 0x38f   :  { %v3250_v56 = vpop.f32.mrf.mxu1 }
 0x390   :  { %832 = vmatpush.bf16.msra.mxu0 %v3184_v6  ;;  %3887 = vst [vmem:[#allocation23_spill] sm:$0xff] %v3250_v56 }
 0x392   :  { %841 = vmatpush.bf16.msra.mxu1 %v3141_v62 }
 0x394   :  { %833 = vmatpush.bf16.msra.mxu0 %v3189_v25 }
 0x396   :  { %842 = vmatpush.bf16.msra.mxu1 %v3149_v5 }
 0x397   :  { %v3254_v1 = vpop.f32.mrf.mxu1 }
 0x398   :  { %834 = vmatpush.bf16.msra.mxu0 %v3193_v40  ;;  %3889 = vst [vmem:[#allocation25_spill] sm:$0xff] %v3254_v1 }
 0x39a   :  { %843 = vmatpush.bf16.msra.mxu1 %v3155_v18 }
 0x39e   :  { %844 = vmatpush.bf16.msra.mxu1 %v3162_v43 }
 0x39f   :  { %v3258_v14 = vpop.f32.mrf.mxu1 }
 0x3a0   :  { %3891 = vst [vmem:[#allocation27_spill] sm:$0xff] %v3258_v14 }
 0x3a2   :  { %845 = vmatpush.bf16.msra.mxu1 %v3171_v34 }
 0x3a6   :  { %846 = vmatpush.bf16.msra.mxu1 %v3187_v11 }
 0x3aa   :  { %847 = vmatpush.bf16.msra.mxu1 %v3195_v47 }
 0x3e0   :  { %v749_v23 = vpop.permute.xlu2 %748 }
 0x3e1   :  { %v3263_v26 = vadd.f32 %v3124_v39, %v749_v23  ;;  %v227_v39 = vld [vmem:[%s3844_s8] sm:$0x3] }
 0x3e2   :  { %v3278_v23 = vperm.slane %v227_v39, 1 }
 0x3e3   :  { %v899_v0 = vpack.c.bf16 %v3263_v26, %v3263_v26 }
 0x3e4   :  { %3895 = vst [vmem:[#allocation31_spill] sm:$0xff] %v3278_v23 }
 0x3e8   :  { %v510_v48 = vpop.permute.xlu1 %509 }
 0x3e9   :  { %v3215_v7 = vadd.f32 %v3129_v22, %v510_v48  ;;  %v3244_v22 = vpop.f32.mrf.mxu0  ;;  %v3267_v48 = vpop.f32.mrf.mxu1 }
 0x3ea   :  { %3893 = vst [vmem:[#allocation29_spill] sm:$0xff] %v3267_v48 }
 0x3eb   :  { %v2467_v52 = vpack.c.bf16 %v3215_v7, %v3215_v7  ;;  %753 = vrot.lane.b32.xlu0 %v3215_v7, %s2839_s3 }
 0x3ed   :  { %2468 = vmatmul.msk.bf16.vlgmr.msrb.gmra.mxu0 %vm3072_vm6, %v2467_v52  ;;  %2471 = vmatmul.msk.bf16.vlgmr.msrb.gmra.mxu1 %vm3072_vm6, %v2467_v52 }
 0x3ee   :  { %974 = vmatpush.bf16.msrb.mxu0 %v3009_v3  ;;  %987 = vmatpush.bf16.msrb.mxu1 %v3011_v8 }
 0x3f1   :  { %v3248_v55 = vpop.f32.mrf.mxu0 }
 0x3f2   :  { %975 = vmatpush.bf16.msrb.mxu0 %v3014_v12  ;;  %988 = vmatpush.bf16.msrb.mxu1 %v3017_v13  ;;  %3886 = vst [vmem:[#allocation22_spill] sm:$0xff] %v3248_v55 }
 0x3f6   :  { %976 = vmatpush.bf16.msrb.mxu0 %v3020_v19  ;;  %989 = vmatpush.bf16.msrb.mxu1 %v3023_v21 }
 0x3f9   :  { %v3252_v58 = vpop.f32.mrf.mxu0 }
 0x3fa   :  { %977 = vmatpush.bf16.msrb.mxu0 %v3026_v29  ;;  %990 = vmatpush.bf16.msrb.mxu1 %v3029_v30  ;;  %3888 = vst [vmem:[#allocation24_spill] sm:$0xff] %v3252_v58 }
 0x3fe   :  { %978 = vmatpush.bf16.msrb.mxu0 %v3032_v37  ;;  %991 = vmatpush.bf16.msrb.mxu1 %v3035_v38 }
 0x401   :  { %v3256_v10 = vpop.f32.mrf.mxu0 }
 0x402   :  { %979 = vmatpush.bf16.msrb.mxu0 %v3038_v44  ;;  %992 = vmatpush.bf16.msrb.mxu1 %v3041_v45  ;;  %3890 = vst [vmem:[#allocation26_spill] sm:$0xff] %v3256_v10 }
 0x406   :  { %980 = vmatpush.bf16.msrb.mxu0 %v3044_v50  ;;  %993 = vmatpush.bf16.msrb.mxu1 %v3047_v51 }
 0x409   :  { %v3260_v16 = vpop.f32.mrf.mxu0 }
 0x40a   :  { %981 = vmatpush.bf16.msrb.mxu0 %v3053_v57  ;;  %994 = vmatpush.bf16.msrb.mxu1 %v3055_v60  ;;  %3892 = vst [vmem:[#allocation28_spill] sm:$0xff] %v3260_v16 }
 0x411   :  { %v3269_v52 = vpop.f32.mrf.mxu0 }
 0x412   :  { %3894 = vst [vmem:[#allocation30_spill] sm:$0xff] %v3269_v52 }
 0x45d   :  { %v754_v32 = vpop.permute.xlu0 %753 }
 0x45e   :  { %v756_v36 = vsel %vm283_vm5, %v3263_v26, %v754_v32 }
 0x45f   :  { %v757_v42 = vpack.c.bf16 %v756_v36, %v756_v36 }
 0x461   :  { %766 = vmatmul.bf16.vlgmr.msrb.gmra.mxu2 %v757_v42  ;;  %779 = vmatmul.bf16.vlgmr.msrb.gmra.mxu3 %v757_v42 }
 0x462   :  { %1043 = vmatpush.bf16.msrb.mxu2 %v3143_v59  ;;  %1056 = vmatpush.bf16.msrb.mxu3 %v3136_v49 }
 0x466   :  { %1044 = vmatpush.bf16.msrb.mxu2 %v3146_v61  ;;  %1057 = vmatpush.bf16.msrb.mxu3 %v3141_v62 }
 0x46a   :  { %v620_v32 = vpop.f32.mrf.mxu0  ;;  %v633_v36 = vpop.f32.mrf.mxu1  ;;  %1045 = vmatpush.bf16.msrb.mxu2 %v3152_v17  ;;  %1058 = vmatpush.bf16.msrb.mxu3 %v3149_v5 }
 0x46b   :  { %v634_v42 = vadd.f32 %v633_v36, %v3278_v23 }
 0x46d   :  { %657 = vrot.lane.b32.xlu1 %v634_v42, %s2839_s3 }
 0x46e   :  { %1046 = vmatpush.bf16.msrb.mxu2 %v3164_v46  ;;  %1059 = vmatpush.bf16.msrb.mxu3 %v3155_v18 }
 0x471   :  { %2478 = vmatmul.msk.bf16.vlgmr.msra.gmra.mxu2 %vm283_vm5, %v899_v0  ;;  %2479 = vmatmul.msk.bf16.vlgmr.msra.gmra.mxu3 %vm283_vm5, %v899_v0  ;;  %v3314_v0 = vperm.slane %v227_v39, 0 }
 0x472   :  { %v622_v52 = vpop.f32.mrf.mxu0  ;;  %v635_v48 = vpop.f32.mrf.mxu1  ;;  %1047 = vmatpush.bf16.msrb.mxu2 %v3173_v53  ;;  %1060 = vmatpush.bf16.msrb.mxu3 %v3162_v43 }
 0x473   :  { %3896 = vst [vmem:[#allocation32_spill] sm:$0xff] %v3314_v0  ;;  %v621_v48 = vadd.f32 %v620_v32, %v3314_v0 }
 0x475   :  { %v2472_v52 = vmul.f32 -1.442695, %v621_v48 }
 0x476   :  { %1048 = vmatpush.bf16.msrb.mxu2 %v3184_v6  ;;  %1061 = vmatpush.bf16.msrb.mxu3 %v3171_v34 }
 0x477   :  { %2605 = vpow2.f32 %v2472_v52 }
 0x47a   :  { %1049 = vmatpush.bf16.msrb.mxu2 %v3189_v25  ;;  %1062 = vmatpush.bf16.msrb.mxu3 %v3187_v11 }
 0x47d   :  { %v2606_v36 = vpop.eup %2605 }
 0x47e   :  { %1050 = vmatpush.bf16.msrb.mxu2 %v3193_v40  ;;  %1063 = vmatpush.bf16.msrb.mxu3 %v3195_v47  ;;  %v640_v16 = vadd.f32 1.0, %v2606_v36 }
 0x480   :  { %2607 = vrcp.f32 %v640_v16  ;;  %v652_v55 = vand.u32 2147483648, %v640_v16  ;;  %vm646_vm0 = vweird.f32 %v640_v16  ;;  %v650_v54 = vand.u32 2147483647, %v640_v16 }
 0x482   :  { %1190 = vmatpush.bf16.msra.mxu2 %v3009_v3  ;;  %1203 = vmatpush.bf16.msra.mxu3 %v3011_v8  ;;  %v653_v39 = vor.u32 1.1754944e-38, %v652_v55  ;;  %vm651_vm2 = vcmp.eq.f32.partialorder %v650_v54, 8.507059e+37  ;;  %v191_v54 = vadd.f32 %v3242_v63, %v2995_v33 }
 0x486   :  { %1191 = vmatpush.bf16.msra.mxu2 %v3014_v12  ;;  %1204 = vmatpush.bf16.msra.mxu3 %v3017_v13  ;;  %v2608_v14 = vpop.eup %2607 }
 0x487   :  { %v642_v10 = vmul.f32 %v2608_v14, %v640_v16  ;;  %vm647_vm15 = vweird.f32 %v2608_v14 }
 0x488   :  { %vm648_vm1 = vmor %vm646_vm0, %vm647_vm15 }
 0x489   :  { %v643_v1 = vsub.f32 1.0, %v642_v10 }
 0x48a   :  { %1192 = vmatpush.bf16.msra.mxu2 %v3020_v19  ;;  %1205 = vmatpush.bf16.msra.mxu3 %v3023_v21 }
 0x48b   :  { %v644_v58 = vmul.f32 %v2608_v14, %v643_v1 }
 0x48d   :  { %v645_v56 = vadd.f32 %v2608_v14, %v644_v58 }
 0x48e   :  { %1193 = vmatpush.bf16.msra.mxu2 %v3026_v29  ;;  %1206 = vmatpush.bf16.msra.mxu3 %v3029_v30 }
 0x48f   :  { %v649_v23 = vsel %vm648_vm1, %v2608_v14, %v645_v56 }
 0x490   :  { %v654_v32 = vsel %vm651_vm2, %v653_v39, %v649_v23 }
 0x492   :  { %1194 = vmatpush.bf16.msra.mxu2 %v3032_v37  ;;  %1207 = vmatpush.bf16.msra.mxu3 %v3035_v38 }
 0x496   :  { %1195 = vmatpush.bf16.msra.mxu2 %v3038_v44  ;;  %1208 = vmatpush.bf16.msra.mxu3 %v3041_v45 }
 0x49a   :  { %1196 = vmatpush.bf16.msra.mxu2 %v3044_v50  ;;  %1209 = vmatpush.bf16.msra.mxu3 %v3047_v51 }
 0x49e   :  { %1197 = vmatpush.bf16.msra.mxu2 %v3053_v57  ;;  %1210 = vmatpush.bf16.msra.mxu3 %v3055_v60 }
 0x4df   :  { %v658_v60 = vpop.permute.xlu1 %657 }
 0x4e0   :  { %v660_v48 = vmul.f32 %v658_v60, %v654_v32  ;;  %v162_v60 = vadd.f32 %v3244_v22, %v2999_v41 }
 0x4e2   :  { %v661_v52 = vadd.f32 %v660_v48, %v634_v42 }
 0x4e4   :  { %2609 = vtanh.f32 %v661_v52  ;;  %v767_v36 = vpop.f32.mrf.mxu2  ;;  %v780_v0 = vpop.f32.mrf.mxu3 }
 0x4e5   :  { %v781_v57 = vadd.f32 %v780_v0, %v3111_v2  ;;  %v768_v39 = vadd.f32 %v767_v36, %v3118_v35 }
 0x4e7   :  { %804 = vrot.lane.b32.xlu2 %v781_v57, %s2839_s3  ;;  %v2476_v48 = vmul.f32 -1.442695, %v768_v39 }
 0x4e9   :  { %2611 = vpow2.f32 %v2476_v48 }
 0x4ea   :  { %v3319_v58 = vpop.eup %2609 }
 0x4eb   :  { %v663_v1 = vsub.f32 0.0, %v3319_v58 }
 0x4ec   :  { %v769_v10 = vpop.f32.mrf.mxu2  ;;  %v782_v16 = vpop.f32.mrf.mxu3 }
 0x4ed   :  { %665 = vrot.lane.b32.xlu0 %v663_v1, %s2839_s3 }
 0x4ef   :  { %v2612_v52 = vpop.eup %2611 }
 0x4f0   :  { %v787_v1 = vadd.f32 1.0, %v2612_v52 }
 0x4f2   :  { %2613 = vrcp.f32 %v787_v1  ;;  %v799_v41 = vand.u32 2147483648, %v787_v1  ;;  %vm793_vm4 = vweird.f32 %v787_v1 }
 0x4f4   :  { %v912_v55 = vpop.f32.mrf.mxu2  ;;  %v925_v56 = vpop.f32.mrf.mxu3 }
 0x4f5   :  { %v929_v14 = vadd.f32 %v912_v55, %v162_v60  ;;  %v930_v23 = vadd.f32 %v925_v56, %v191_v54  ;;  %v797_v54 = vand.u32 2147483647, %v787_v1  ;;  %v800_v56 = vor.u32 1.1754944e-38, %v799_v41 }
 0x4f7   :  { %951 = vrot.lane.b32.xlu1 %v930_v23, %s2839_s3  ;;  %v2480_v60 = vmul.f32 -1.442695, %v929_v14  ;;  %vm798_vm7 = vcmp.eq.f32.partialorder %v797_v54, 8.507059e+37 }
 0x4f8   :  { %v2614_v10 = vpop.eup %2613 }
 0x4f9   :  { %v789_v63 = vmul.f32 %v2614_v10, %v787_v1  ;;  %vm794_vm3 = vweird.f32 %v2614_v10  ;;  %2615 = vpow2.f32 %v2480_v60 }
 0x4fa   :  { %vm795_vm6 = vmor %vm793_vm4, %vm794_vm3 }
 0x4fb   :  { %v790_v16 = vsub.f32 1.0, %v789_v63 }
 0x4fc   :  { %v914_v42 = vpop.f32.mrf.mxu2  ;;  %v927_v0 = vpop.f32.mrf.mxu3 }
 0x4fd   :  { %v791_v33 = vmul.f32 %v2614_v10, %v790_v16 }
 0x4ff   :  { %v792_v22 = vadd.f32 %v2614_v10, %v791_v33  ;;  %v2616_v48 = vpop.eup %2615 }
 0x500   :  { %v934_v52 = vadd.f32 1.0, %v2616_v48 }
 0x501   :  { %v796_v55 = vsel %vm795_vm6, %v2614_v10, %v792_v22 }
 0x502   :  { %v801_v42 = vsel %vm798_vm7, %v800_v56, %v796_v55  ;;  %vm940_vm9 = vweird.f32 %v934_v52  ;;  %v944_v54 = vand.u32 2147483647, %v934_v52 }
 0x504   :  { %vm945_vm11 = vcmp.eq.f32.partialorder %v944_v54, 8.507059e+37 }
 0x541   :  { %v805_v36 = vpop.permute.xlu2 %804 }
 0x542   :  { %v807_v0 = vmul.f32 %v805_v36, %v801_v42 }
 0x544   :  { %v808_v39 = vadd.f32 %v807_v0, %v781_v57  ;;  %v946_v57 = vand.u32 2147483648, %v934_v52 }
 0x546   :  { %2617 = vtanh.f32 %v808_v39  ;;  %v947_v56 = vor.u32 1.1754944e-38, %v946_v57 }
 0x547   :  { %2619 = vrcp.f32 %v934_v52 }
 0x54c   :  { %v2618_v63 = vpop.eup %2617 }
 0x54d   :  { %v810_v33 = vsub.f32 %v3215_v7, %v2618_v63  ;;  %v2620_v14 = vpop.eup %2619 }
 0x54e   :  { %v936_v1 = vmul.f32 %v2620_v14, %v934_v52  ;;  %vm941_vm8 = vweird.f32 %v2620_v14 }
 0x54f   :  { %812 = vrot.lane.b32.xlu2 %v810_v33, %s2839_s3  ;;  %vm942_vm10 = vmor %vm940_vm9, %vm941_vm8 }
 0x550   :  { %v937_v16 = vsub.f32 1.0, %v936_v1 }
 0x552   :  { %v938_v10 = vmul.f32 %v2620_v14, %v937_v16 }
 0x554   :  { %v939_v60 = vadd.f32 %v2620_v14, %v938_v10 }
 0x556   :  { %v943_v55 = vsel %vm942_vm10, %v2620_v14, %v939_v60 }
 0x557   :  { %v948_v36 = vsel %vm945_vm11, %v947_v56, %v943_v55  ;;  %v3898_v56 = vld [vmem:[#allocation17_spill] sm:$0xff] }
 0x55f   :  { %v666_v41 = vpop.permute.xlu0 %665 }
 0x560   :  { %v668_v22 = vmul.f32 %v666_v41, %v654_v32 }
 0x562   :  { %670 = vrot.lane.b32.xlu0 %v668_v22, %s2839_s3 }
 0x569   :  { %v952_v7 = vpop.permute.xlu1 %951 }
 0x56a   :  { %v954_v0 = vmul.f32 %v952_v7, %v948_v36  ;;  %v3899_v7 = vld [vmem:[#allocation18_spill] sm:$0xff] }
 0x56c   :  { %v955_v39 = vadd.f32 %v954_v0, %v930_v23 }
 0x56e   :  { %2621 = vtanh.f32 %v955_v39  ;;  %v3900_v39 = vld [vmem:[#allocation31_spill] sm:$0xff] }
 0x574   :  { %v2622_v48 = vpop.eup %2621 }
 0x575   :  { %v957_v33 = vsub.f32 %v3263_v26, %v2622_v48 }
 0x577   :  { %959 = vrot.lane.b32.xlu1 %v957_v33, %s2839_s3 }
 0x5a9   :  { %v813_v32 = vpop.permute.xlu2 %812 }
 0x5aa   :  { %v815_v1 = vmul.f32 %v813_v32, %v801_v42 }
 0x5ac   :  { %817 = vrot.lane.b32.xlu2 %v815_v1, %s2839_s3 }
 0x5d4   :  { %v671_v16 = vpop.permute.xlu0 %670 }
 0x5d5   :  { %v3336_v52 = vadd.f32 %v3319_v58, %v671_v16 }
 0x5d7   :  { %3897 = vst [vmem:[#allocation33_spill] sm:$0xff] %v3336_v52  ;;  %822 = vrot.lane.b32.xlu0 %v3336_v52, %s2839_s3 }
 0x5e9   :  { %v960_v14 = vpop.permute.xlu1 %959 }
 0x5ea   :  { %v962_v10 = vmul.f32 %v960_v14, %v948_v36 }
 0x5ec   :  { %964 = vrot.lane.b32.xlu1 %v962_v10, %s2839_s3 }
 0x606   :  { %v818_v23 = vpop.permute.xlu2 %817 }
 0x607   :  { %v3341_v41 = vadd.f32 %v2618_v63, %v818_v23 }
 0x609   :  { %969 = vrot.lane.b32.xlu2 %v3341_v41, %s2839_s3 }
 0x649   :  { %v823_v26 = vpop.permute.xlu0 %822 }
 0x64a   :  { %v825_v42 = vsel %vm283_vm5, %v3341_v41, %v823_v26  ;;  %v3901_v26 = vld [vmem:[#allocation13_spill] sm:$0xff] }
 0x64b   :  { %v826_v22 = vpack.c.bf16 %v825_v42, %v825_v42  ;;  %v3902_v42 = vld [vmem:[#allocation21_spill] sm:$0xff] }
 0x64d   :  { %835 = vmatmul.bf16.vlgmr.msra.gmra.mxu0 %v826_v22  ;;  %848 = vmatmul.bf16.vlgmr.msra.gmra.mxu1 %v826_v22  ;;  %v193_v22 = vadd.f32 %v3902_v42, %v3901_v26 }
 0x64e   :  { %1123 = vmatpush.bf16.msra.mxu0 %v2945_v15  ;;  %1136 = vmatpush.bf16.msra.mxu1 %v2922_v4 }
 0x652   :  { %1124 = vmatpush.bf16.msra.mxu0 %v2964_v24  ;;  %1137 = vmatpush.bf16.msra.mxu1 %v2928_v9 }
 0x656   :  { %1125 = vmatpush.bf16.msra.mxu0 %v2976_v28  ;;  %1138 = vmatpush.bf16.msra.mxu1 %v2954_v20 }
 0x65a   :  { %1126 = vmatpush.bf16.msra.mxu0 %v2987_v31  ;;  %1139 = vmatpush.bf16.msra.mxu1 %v2973_v27 }
 0x65e   :  { %v965_v58 = vpop.permute.xlu1 %964 }
 0x65f   :  { %v3355_v63 = vadd.f32 %v2622_v48, %v965_v58 }
 0x661   :  { %v1115_v55 = vpack.c.bf16 %v3355_v63, %v3355_v63 }
 0x663   :  { %v970_v60 = vpop.permute.xlu2 %969 }
 0x664   :  { %v972_v57 = vsel %vm283_vm5, %v3355_v63, %v970_v60 }
 0x665   :  { %v973_v54 = vpack.c.bf16 %v972_v57, %v972_v57 }
 0x667   :  { %982 = vmatmul.bf16.vlgmr.msrb.gmra.mxu0 %v973_v54  ;;  %995 = vmatmul.bf16.vlgmr.msrb.gmra.mxu1 %v973_v54 }
 0x668   :  { %1259 = vmatpush.bf16.msrb.mxu0 %v3143_v59  ;;  %1272 = vmatpush.bf16.msrb.mxu1 %v3136_v49 }
 0x66c   :  { %1260 = vmatpush.bf16.msrb.mxu0 %v3146_v61  ;;  %1273 = vmatpush.bf16.msrb.mxu1 %v3141_v62 }
 0x670   :  { %1261 = vmatpush.bf16.msrb.mxu0 %v3152_v17  ;;  %1274 = vmatpush.bf16.msrb.mxu1 %v3149_v5 }
 0x674   :  { %1262 = vmatpush.bf16.msrb.mxu0 %v3164_v46  ;;  %1275 = vmatpush.bf16.msrb.mxu1 %v3155_v18 }
 0x677   :  { %2483 = vmatmul.msk.bf16.vlgmr.msra.gmra.mxu0 %vm283_vm5, %v1115_v55  ;;  %2484 = vmatmul.msk.bf16.vlgmr.msra.gmra.mxu1 %vm283_vm5, %v1115_v55 }
 0x678   :  { %1263 = vmatpush.bf16.msrb.mxu0 %v3173_v53  ;;  %1276 = vmatpush.bf16.msrb.mxu1 %v3162_v43 }
 0x67c   :  { %1264 = vmatpush.bf16.msrb.mxu0 %v3184_v6  ;;  %1277 = vmatpush.bf16.msrb.mxu1 %v3171_v34 }
 0x680   :  { %1265 = vmatpush.bf16.msrb.mxu0 %v3189_v25  ;;  %1278 = vmatpush.bf16.msrb.mxu1 %v3187_v11 }
 0x684   :  { %1266 = vmatpush.bf16.msrb.mxu0 %v3193_v40  ;;  %1279 = vmatpush.bf16.msrb.mxu1 %v3195_v47 }
 0x688   :  { %1406 = vmatpush.bf16.msra.mxu0 %v3009_v3  ;;  %1419 = vmatpush.bf16.msra.mxu1 %v3011_v8 }
 0x68c   :  { %1407 = vmatpush.bf16.msra.mxu0 %v3014_v12  ;;  %1420 = vmatpush.bf16.msra.mxu1 %v3017_v13 }
 0x690   :  { %1408 = vmatpush.bf16.msra.mxu0 %v3020_v19  ;;  %1421 = vmatpush.bf16.msra.mxu1 %v3023_v21 }
 0x694   :  { %1409 = vmatpush.bf16.msra.mxu0 %v3026_v29  ;;  %1422 = vmatpush.bf16.msra.mxu1 %v3029_v30 }
 0x698   :  { %1410 = vmatpush.bf16.msra.mxu0 %v3032_v37  ;;  %1423 = vmatpush.bf16.msra.mxu1 %v3035_v38 }
 0x69c   :  { %1411 = vmatpush.bf16.msra.mxu0 %v3038_v44  ;;  %1424 = vmatpush.bf16.msra.mxu1 %v3041_v45 }
 0x6a0   :  { %1412 = vmatpush.bf16.msra.mxu0 %v3044_v50  ;;  %1425 = vmatpush.bf16.msra.mxu1 %v3047_v51  ;;  %v3905_v51 = vld [vmem:[#allocation22_spill] sm:$0xff] }
 0x6a4   :  { %1413 = vmatpush.bf16.msra.mxu0 %v3898_v56  ;;  %1426 = vmatpush.bf16.msra.mxu1 %v3899_v7  ;;  %v3904_v56 = vld [vmem:[#allocation14_spill] sm:$0xff] }
 0x6ca   :  { %v836_v36 = vpop.f32.mrf.mxu0  ;;  %v849_v0 = vpop.f32.mrf.mxu1 }
 0x6cb   :  { %v850_v48 = vadd.f32 %v849_v0, %v3900_v39  ;;  %v3903_v0 = vld [vmem:[#allocation32_spill] sm:$0xff] }
 0x6cd   :  { %873 = vrot.lane.b32.xlu0 %v850_v48, %s2839_s3 }
 0x6d2   :  { %v838_v33 = vpop.f32.mrf.mxu0  ;;  %v851_v32 = vpop.f32.mrf.mxu1 }
 0x6d3   :  { %v837_v33 = vadd.f32 %v836_v36, %v3903_v0 }
 0x6d5   :  { %v2477_v32 = vmul.f32 -1.442695, %v837_v33 }
 0x6d7   :  { %2623 = vpow2.f32 %v2477_v32 }
 0x6e4   :  { %v983_v1 = vpop.f32.mrf.mxu0  ;;  %v996_v16 = vpop.f32.mrf.mxu1 }
 0x6e5   :  { %v3398_v14 = vadd.f32 %v996_v16, %v3111_v2  ;;  %v2624_v16 = vpop.eup %2623 }
 0x6e6   :  { %v856_v2 = vadd.f32 1.0, %v2624_v16 }
 0x6e7   :  { %1020 = vrot.lane.b32.xlu1 %v3398_v14, %s2839_s3 }
 0x6e8   :  { %2625 = vrcp.f32 %v856_v2  ;;  %v868_v33 = vand.u32 2147483648, %v856_v2  ;;  %vm862_vm13 = vweird.f32 %v856_v2  ;;  %v866_v32 = vand.u32 2147483647, %v856_v2 }
 0x6ea   :  { %vm867_vm15 = vcmp.eq.f32.partialorder %v866_v32, 8.507059e+37 }
 0x6ec   :  { %v985_v10 = vpop.f32.mrf.mxu0  ;;  %v998_v23 = vpop.f32.mrf.mxu1 }
 0x6ed   :  { %v984_v10 = vadd.f32 %v983_v1, %v3118_v35 }
 0x6ee   :  { %v2626_v23 = vpop.eup %2625 }
 0x6ef   :  { %v2481_v42 = vmul.f32 -1.442695, %v984_v10  ;;  %v858_v26 = vmul.f32 %v2626_v23, %v856_v2  ;;  %vm863_vm12 = vweird.f32 %v2626_v23  ;;  %v869_v10 = vor.u32 1.1754944e-38, %v868_v33 }
 0x6f0   :  { %vm864_vm14 = vmor %vm862_vm13, %vm863_vm12 }
 0x6f1   :  { %2627 = vpow2.f32 %v2481_v42 }
 0x6f4   :  { %v1128_v58 = vpop.f32.mrf.mxu0  ;;  %v1141_v60 = vpop.f32.mrf.mxu1 }
 0x6f5   :  { %v3404_v57 = vadd.f32 %v1141_v60, %v193_v22  ;;  %v859_v22 = vsub.f32 1.0, %v858_v26 }
 0x6f7   :  { %1167 = vrot.lane.b32.xlu0 %v3404_v57, %s2839_s3  ;;  %v860_v60 = vmul.f32 %v2626_v23, %v859_v22  ;;  %v2628_v7 = vpop.eup %2627 }
 0x6f8   :  { %v1003_v36 = vadd.f32 1.0, %v2628_v7 }
 0x6f9   :  { %v861_v50 = vadd.f32 %v2626_v23, %v860_v60 }
 0x6fa   :  { %2629 = vrcp.f32 %v1003_v36  ;;  %v1015_v33 = vand.u32 2147483648, %v1003_v36  ;;  %vm1009_vm1 = vweird.f32 %v1003_v36  ;;  %v1013_v32 = vand.u32 2147483647, %v1003_v36 }
 0x6fb   :  { %v865_v1 = vsel %vm864_vm14, %v2626_v23, %v861_v50 }
 0x6fc   :  { %v1130_v54 = vpop.f32.mrf.mxu0  ;;  %v1143_v55 = vpop.f32.mrf.mxu1  ;;  %v870_v26 = vsel %vm867_vm15, %v869_v10, %v865_v1  ;;  %vm1014_vm3 = vcmp.eq.f32.partialorder %v1013_v32, 8.507059e+37 }
 0x6fd   :  { %v164_v54 = vadd.f32 %v3905_v51, %v3904_v56 }
 0x6ff   :  { %v1145_v55 = vadd.f32 %v1128_v58, %v164_v54 }
 0x700   :  { %v2630_v0 = vpop.eup %2629 }
 0x701   :  { %v2485_v16 = vmul.f32 -1.442695, %v1145_v55  ;;  %v1005_v58 = vmul.f32 %v2630_v0, %v1003_v36  ;;  %vm1010_vm0 = vweird.f32 %v2630_v0 }
 0x702   :  { %vm1011_vm2 = vmor %vm1009_vm1, %vm1010_vm0 }
 0x703   :  { %2631 = vpow2.f32 %v2485_v16  ;;  %v1006_v54 = vsub.f32 1.0, %v1005_v58  ;;  %v1016_v16 = vor.u32 1.1754944e-38, %v1015_v33 }
 0x705   :  { %v1007_v50 = vmul.f32 %v2630_v0, %v1006_v54 }
 0x707   :  { %v1008_v23 = vadd.f32 %v2630_v0, %v1007_v50 }
 0x709   :  { %v2632_v51 = vpop.eup %2631 }
 0x70a   :  { %v1150_v60 = vadd.f32 1.0, %v2632_v51 }
 0x70c   :  { %vm1156_vm6 = vweird.f32 %v1150_v60 }
 0x73f   :  { %v874_v42 = vpop.permute.xlu0 %873 }
 0x740   :  { %v876_v22 = vmul.f32 %v874_v42, %v870_v26 }
 0x742   :  { %v877_v35 = vadd.f32 %v876_v22, %v850_v48  ;;  %v1012_v48 = vsel %vm1011_vm2, %v2630_v0, %v1008_v23 }
 0x743   :  { %v1017_v10 = vsel %vm1014_vm3, %v1016_v16, %v1012_v48 }
 0x744   :  { %2633 = vtanh.f32 %v877_v35 }
 0x745   :  { %2635 = vrcp.f32 %v1150_v60 }
 0x74a   :  { %v2634_v7 = vpop.eup %2633 }
 0x74b   :  { %v879_v2 = vsub.f32 %v3336_v52, %v2634_v7  ;;  %v2636_v55 = vpop.eup %2635  ;;  %v1160_v52 = vand.u32 2147483647, %v1150_v60 }
 0x74c   :  { %v1152_v35 = vmul.f32 %v2636_v55, %v1150_v60  ;;  %vm1157_vm4 = vweird.f32 %v2636_v55 }
 0x74d   :  { %881 = vrot.lane.b32.xlu2 %v879_v2, %s2839_s3  ;;  %v1162_v2 = vand.u32 2147483648, %v1150_v60  ;;  %vm1158_vm7 = vmor %vm1156_vm6, %vm1157_vm4  ;;  %vm1161_vm8 = vcmp.eq.f32.partialorder %v1160_v52, 8.507059e+37 }
 0x74e   :  { %v1153_v22 = vsub.f32 1.0, %v1152_v35 }
 0x74f   :  { %v1163_v23 = vor.u32 1.1754944e-38, %v1162_v2 }
 0x750   :  { %v1154_v58 = vmul.f32 %v2636_v55, %v1153_v22 }
 0x752   :  { %v1155_v54 = vadd.f32 %v2636_v55, %v1154_v58 }
 0x754   :  { %v1159_v0 = vsel %vm1158_vm7, %v2636_v55, %v1155_v54 }
 0x755   :  { %v1164_v32 = vsel %vm1161_vm8, %v1163_v23, %v1159_v0 }
 0x759   :  { %v1021_v1 = vpop.permute.xlu1 %1020 }
 0x75a   :  { %v1023_v42 = vmul.f32 %v1021_v1, %v1017_v10 }
 0x75c   :  { %v1024_v51 = vadd.f32 %v1023_v42, %v3398_v14 }
 0x75e   :  { %2637 = vtanh.f32 %v1024_v51 }
 0x764   :  { %v2638_v50 = vpop.eup %2637 }
 0x765   :  { %v1026_v36 = vsub.f32 %v3341_v41, %v2638_v50 }
 0x767   :  { %1028 = vrot.lane.b32.xlu1 %v1026_v36, %s2839_s3 }
 0x769   :  { %v1168_v33 = vpop.permute.xlu0 %1167 }
 0x76a   :  { %v1170_v48 = vmul.f32 %v1168_v33, %v1164_v32 }
 0x76c   :  { %v1171_v14 = vadd.f32 %v1170_v48, %v3404_v57 }
 0x76e   :  { %2639 = vtanh.f32 %v1171_v14 }
 0x774   :  { %v2640_v35 = vpop.eup %2639 }
 0x775   :  { %v1173_v16 = vsub.f32 %v3355_v63, %v2640_v35 }
 0x777   :  { %1175 = vrot.lane.b32.xlu0 %v1173_v16, %s2839_s3  ;;  %v3908_v16 = vld [vmem:[#allocation16_spill] sm:$0xff] }
 0x7a7   :  { %v882_v60 = vpop.permute.xlu2 %881 }
 0x7a8   :  { %v884_v1 = vmul.f32 %v882_v60, %v870_v26  ;;  %v3909_v60 = vld [vmem:[#allocation17_spill] sm:$0xff] }
 0x7aa   :  { %886 = vrot.lane.b32.xlu2 %v884_v1, %s2839_s3  ;;  %v3910_v1 = vld [vmem:[#allocation18_spill] sm:$0xff] }
 0x7d9   :  { %v1029_v41 = vpop.permute.xlu1 %1028 }
 0x7da   :  { %v1031_v55 = vmul.f32 %v1029_v41, %v1017_v10  ;;  %v3911_v41 = vld [vmem:[#allocation32_spill] sm:$0xff] }
 0x7dc   :  { %1033 = vrot.lane.b32.xlu1 %v1031_v55, %s2839_s3 }
 0x7e9   :  { %v1176_v52 = vpop.permute.xlu0 %1175 }
 0x7ea   :  { %v1178_v42 = vmul.f32 %v1176_v52, %v1164_v32 }
 0x7ec   :  { %1180 = vrot.lane.b32.xlu0 %v1178_v42, %s2839_s3 }
 0x804   :  { %v887_v22 = vpop.permute.xlu2 %886 }
 0x805   :  { %v3423_v57 = vadd.f32 %v2634_v7, %v887_v22 }
 0x807   :  { %3906 = vst [vmem:[#allocation21_spill] sm:$0xff] %v3423_v57  ;;  %1038 = vrot.lane.b32.xlu2 %v3423_v57, %s2839_s3 }
 0x84e   :  { %v1034_v63 = vpop.permute.xlu1 %1033 }
 0x84f   :  { %v3427_v51 = vadd.f32 %v2638_v50, %v1034_v63 }
 0x851   :  { %1185 = vrot.lane.b32.xlu1 %v3427_v51, %s2839_s3 }
 0x85e   :  { %v1181_v7 = vpop.permute.xlu0 %1180 }
 0x85f   :  { %v3441_v54 = vadd.f32 %v2640_v35, %v1181_v7  ;;  %v3907_v35 = vld [vmem:[#allocation15_spill] sm:$0xff] }
 0x861   :  { %v1039_v26 = vpop.permute.xlu2 %1038  ;;  %v1331_v0 = vpack.c.bf16 %v3441_v54, %v3441_v54 }
 0x862   :  { %v1041_v10 = vsel %vm283_vm5, %v3427_v51, %v1039_v26 }
 0x863   :  { %v1042_v58 = vpack.c.bf16 %v1041_v10, %v1041_v10 }
 0x865   :  { %1051 = vmatmul.bf16.vlgmr.msrb.gmra.mxu2 %v1042_v58  ;;  %1064 = vmatmul.bf16.vlgmr.msrb.gmra.mxu3 %v1042_v58 }
 0x866   :  { %1339 = vmatpush.bf16.msrb.mxu2 %v2945_v15  ;;  %1352 = vmatpush.bf16.msrb.mxu3 %v2922_v4 }
 0x86a   :  { %1340 = vmatpush.bf16.msrb.mxu2 %v2964_v24  ;;  %1353 = vmatpush.bf16.msrb.mxu3 %v2928_v9 }
 0x86e   :  { %1341 = vmatpush.bf16.msrb.mxu2 %v2976_v28  ;;  %1354 = vmatpush.bf16.msrb.mxu3 %v2954_v20 }
 0x872   :  { %1342 = vmatpush.bf16.msrb.mxu2 %v2987_v31  ;;  %1355 = vmatpush.bf16.msrb.mxu3 %v2973_v27 }
 0x8c3   :  { %v1186_v2 = vpop.permute.xlu1 %1185 }
 0x8c4   :  { %v1188_v50 = vsel %vm283_vm5, %v3441_v54, %v1186_v2 }
 0x8c5   :  { %v1189_v36 = vpack.c.bf16 %v1188_v50, %v1188_v50 }
 0x8c7   :  { %1198 = vmatmul.bf16.vlgmr.msra.gmra.mxu2 %v1189_v36  ;;  %1211 = vmatmul.bf16.vlgmr.msra.gmra.mxu3 %v1189_v36 }
 0x8c8   :  { %1475 = vmatpush.bf16.msra.mxu2 %v3143_v59  ;;  %1488 = vmatpush.bf16.msra.mxu3 %v3136_v49 }
 0x8cc   :  { %1476 = vmatpush.bf16.msra.mxu2 %v3146_v61  ;;  %1489 = vmatpush.bf16.msra.mxu3 %v3141_v62 }
 0x8d0   :  { %1477 = vmatpush.bf16.msra.mxu2 %v3152_v17  ;;  %1490 = vmatpush.bf16.msra.mxu3 %v3149_v5 }
 0x8d4   :  { %1478 = vmatpush.bf16.msra.mxu2 %v3164_v46  ;;  %1491 = vmatpush.bf16.msra.mxu3 %v3155_v18 }
 0x8d7   :  { %2488 = vmatmul.msk.bf16.vlgmr.msrb.gmra.mxu2 %vm283_vm5, %v1331_v0  ;;  %2489 = vmatmul.msk.bf16.vlgmr.msrb.gmra.mxu3 %vm283_vm5, %v1331_v0 }
 0x8d8   :  { %1479 = vmatpush.bf16.msra.mxu2 %v3173_v53  ;;  %1492 = vmatpush.bf16.msra.mxu3 %v3162_v43 }
 0x8dc   :  { %1480 = vmatpush.bf16.msra.mxu2 %v3184_v6  ;;  %1493 = vmatpush.bf16.msra.mxu3 %v3171_v34 }
 0x8e0   :  { %1481 = vmatpush.bf16.msra.mxu2 %v3189_v25  ;;  %1494 = vmatpush.bf16.msra.mxu3 %v3187_v11 }
 0x8e4   :  { %1482 = vmatpush.bf16.msra.mxu2 %v3193_v40  ;;  %1495 = vmatpush.bf16.msra.mxu3 %v3195_v47 }
 0x8e8   :  { %1622 = vmatpush.bf16.msrb.mxu2 %v3009_v3  ;;  %1635 = vmatpush.bf16.msrb.mxu3 %v3011_v8  ;;  %v1052_v23 = vpop.f32.mrf.mxu2  ;;  %v1065_v33 = vpop.f32.mrf.mxu3 }
 0x8e9   :  { %v1066_v32 = vadd.f32 %v1065_v33, %v3900_v39  ;;  %v1053_v55 = vadd.f32 %v1052_v23, %v3911_v41 }
 0x8eb   :  { %1089 = vrot.lane.b32.xlu2 %v1066_v32, %s2839_s3  ;;  %v2482_v52 = vmul.f32 -1.442695, %v1053_v55 }
 0x8ec   :  { %1623 = vmatpush.bf16.msrb.mxu2 %v3014_v12  ;;  %1636 = vmatpush.bf16.msrb.mxu3 %v3017_v13 }
 0x8ed   :  { %2641 = vpow2.f32 %v2482_v52 }
 0x8f0   :  { %1624 = vmatpush.bf16.msrb.mxu2 %v3020_v19  ;;  %1637 = vmatpush.bf16.msrb.mxu3 %v3023_v21  ;;  %v1054_v48 = vpop.f32.mrf.mxu2  ;;  %v1067_v14 = vpop.f32.mrf.mxu3 }
 0x8f3   :  { %v2642_v42 = vpop.eup %2641 }
 0x8f4   :  { %1625 = vmatpush.bf16.msrb.mxu2 %v3026_v29  ;;  %1638 = vmatpush.bf16.msrb.mxu3 %v3029_v30  ;;  %v1072_v22 = vadd.f32 1.0, %v2642_v42  ;;  %v3912_v42 = vld [vmem:[#allocation19_spill] sm:$0xff] }
 0x8f6   :  { %2643 = vrcp.f32 %v1072_v22  ;;  %v1084_v2 = vand.u32 2147483648, %v1072_v22  ;;  %vm1078_vm10 = vweird.f32 %v1072_v22  ;;  %v1082_v50 = vand.u32 2147483647, %v1072_v22 }
 0x8f8   :  { %1626 = vmatpush.bf16.msrb.mxu2 %v3032_v37  ;;  %1639 = vmatpush.bf16.msrb.mxu3 %v3035_v38  ;;  %v1085_v0 = vor.u32 1.1754944e-38, %v1084_v2  ;;  %vm1083_vm12 = vcmp.eq.f32.partialorder %v1082_v50, 8.507059e+37  ;;  %v3914_v2 = vld [vmem:[#allocation23_spill] sm:$0xff] }
 0x8fc   :  { %1627 = vmatpush.bf16.msrb.mxu2 %v3038_v44  ;;  %1640 = vmatpush.bf16.msrb.mxu3 %v3041_v45  ;;  %v2644_v63 = vpop.eup %2643 }
 0x8fd   :  { %v1074_v26 = vmul.f32 %v2644_v63, %v1072_v22  ;;  %vm1079_vm9 = vweird.f32 %v2644_v63 }
 0x8fe   :  { %vm1080_vm11 = vmor %vm1078_vm10, %vm1079_vm9 }
 0x8ff   :  { %v1075_v10 = vsub.f32 1.0, %v1074_v26 }
 0x900   :  { %1628 = vmatpush.bf16.msrb.mxu2 %v3907_v35  ;;  %1641 = vmatpush.bf16.msrb.mxu3 %v3908_v16 }
 0x901   :  { %v1076_v58 = vmul.f32 %v2644_v63, %v1075_v10 }
 0x903   :  { %v1077_v7 = vadd.f32 %v2644_v63, %v1076_v58 }
 0x904   :  { %1629 = vmatpush.bf16.msrb.mxu2 %v3909_v60  ;;  %1642 = vmatpush.bf16.msrb.mxu3 %v3910_v1 }
 0x905   :  { %v1081_v36 = vsel %vm1080_vm11, %v2644_v63, %v1077_v7  ;;  %v3913_v7 = vld [vmem:[#allocation13_spill] sm:$0xff] }
 0x906   :  { %v3484_v23 = vsel %vm1083_vm12, %v1085_v0, %v1081_v36  ;;  %v196_v50 = vadd.f32 %v3914_v2, %v3913_v7 }
 0x945   :  { %v1090_v33 = vpop.permute.xlu2 %1089 }
 0x946   :  { %v1092_v48 = vmul.f32 %v1090_v33, %v3484_v23 }
 0x948   :  { %v1093_v14 = vadd.f32 %v1092_v48, %v1066_v32 }
 0x94a   :  { %2645 = vtanh.f32 %v1093_v14  ;;  %v1199_v55 = vpop.f32.mrf.mxu2  ;;  %v1212_v52 = vpop.f32.mrf.mxu3  ;;  %v3915_v14 = vld [vmem:[#allocation24_spill] sm:$0xff] }
 0x94b   :  { %v1213_v26 = vadd.f32 %v1212_v52, %v3912_v42  ;;  %v167_v52 = vadd.f32 %v3915_v14, %v3904_v56 }
 0x94d   :  { %1236 = vrot.lane.b32.xlu0 %v1213_v26, %s2839_s3 }
 0x950   :  { %v3489_v10 = vpop.eup %2645 }
 0x951   :  { %v1095_v22 = vsub.f32 %v3423_v57, %v3489_v10  ;;  %v3916_v57 = vld [vmem:[#allocation20_spill] sm:$0xff] }
 0x952   :  { %v1201_v63 = vpop.f32.mrf.mxu2  ;;  %v1214_v58 = vpop.f32.mrf.mxu3 }
 0x953   :  { %1097 = vrot.lane.b32.xlu1 %v1095_v22, %s2839_s3  ;;  %v1200_v63 = vadd.f32 %v1199_v55, %v3916_v57 }
 0x955   :  { %v2486_v58 = vmul.f32 -1.442695, %v1200_v63 }
 0x95a   :  { %v1344_v32 = vpop.f32.mrf.mxu2  ;;  %v1357_v36 = vpop.f32.mrf.mxu3 }
 0x95b   :  { %v1362_v0 = vadd.f32 %v1357_v36, %v196_v50  ;;  %v1361_v42 = vadd.f32 %v1344_v32, %v167_v52 }
 0x95d   :  { %1383 = vrot.lane.b32.xlu2 %v1362_v0, %s2839_s3  ;;  %v2490_v41 = vmul.f32 -1.442695, %v1361_v42 }
 0x95f   :  { %2647 = vpow2.f32 %v2490_v41 }
 0x960   :  { %2649 = vpow2.f32 %v2486_v58 }
 0x962   :  { %v1346_v33 = vpop.f32.mrf.mxu2  ;;  %v1359_v48 = vpop.f32.mrf.mxu3 }
 0x965   :  { %v2648_v22 = vpop.eup %2647 }
 0x966   :  { %v1366_v1 = vadd.f32 1.0, %v2648_v22  ;;  %v2650_v2 = vpop.eup %2649 }
 0x967   :  { %v1219_v7 = vadd.f32 1.0, %v2650_v2 }
 0x968   :  { %2651 = vrcp.f32 %v1366_v1  ;;  %v1378_v32 = vand.u32 2147483648, %v1366_v1  ;;  %vm1372_vm14 = vweird.f32 %v1366_v1  ;;  %v1376_v41 = vand.u32 2147483647, %v1366_v1 }
 0x969   :  { %2653 = vrcp.f32 %v1219_v7  ;;  %vm1225_vm2 = vweird.f32 %v1219_v7 }
 0x96a   :  { %v1379_v63 = vor.u32 1.1754944e-38, %v1378_v32  ;;  %vm1377_vm0 = vcmp.eq.f32.partialorder %v1376_v41, 8.507059e+37 }
 0x96e   :  { %v2652_v50 = vpop.eup %2651 }
 0x96f   :  { %v1368_v36 = vmul.f32 %v2652_v50, %v1366_v1  ;;  %v2654_v48 = vpop.eup %2653  ;;  %vm1373_vm13 = vweird.f32 %v2652_v50 }
 0x970   :  { %v1221_v16 = vmul.f32 %v2654_v48, %v1219_v7  ;;  %vm1374_vm15 = vmor %vm1372_vm14, %vm1373_vm13  ;;  %vm1226_vm1 = vweird.f32 %v2654_v48 }
 0x971   :  { %v1369_v33 = vsub.f32 1.0, %v1368_v36  ;;  %v1231_v36 = vand.u32 2147483648, %v1219_v7  ;;  %vm1227_vm3 = vmor %vm1225_vm2, %vm1226_vm1 }
 0x972   :  { %v1222_v42 = vsub.f32 1.0, %v1221_v16 }
 0x973   :  { %v1370_v60 = vmul.f32 %v2652_v50, %v1369_v33  ;;  %v1229_v33 = vand.u32 2147483647, %v1219_v7 }
 0x974   :  { %v1223_v52 = vmul.f32 %v2654_v48, %v1222_v42 }
 0x975   :  { %v1371_v14 = vadd.f32 %v2652_v50, %v1370_v60  ;;  %v1232_v60 = vor.u32 1.1754944e-38, %v1231_v36  ;;  %vm1230_vm4 = vcmp.eq.f32.partialorder %v1229_v33, 8.507059e+37 }
 0x976   :  { %v1224_v56 = vadd.f32 %v2654_v48, %v1223_v52 }
 0x977   :  { %v1375_v55 = vsel %vm1374_vm15, %v2652_v50, %v1371_v14 }
 0x978   :  { %v1380_v22 = vsel %vm1377_vm0, %v1379_v63, %v1375_v55  ;;  %v1228_v16 = vsel %vm1227_vm3, %v2654_v48, %v1224_v56 }
 0x979   :  { %v1233_v35 = vsel %vm1230_vm4, %v1232_v60, %v1228_v16 }
 0x9b7   :  { %v1384_v58 = vpop.permute.xlu2 %1383 }
 0x9b8   :  { %v1386_v2 = vmul.f32 %v1384_v58, %v1380_v22 }
 0x9ba   :  { %v1387_v57 = vadd.f32 %v1386_v2, %v1362_v0 }
 0x9bc   :  { %2655 = vtanh.f32 %v1387_v57 }
 0x9bf   :  { %v1237_v1 = vpop.permute.xlu0 %1236 }
 0x9c0   :  { %v1239_v50 = vmul.f32 %v1237_v1, %v1233_v35 }
 0x9c2   :  { %v2656_v14 = vpop.eup %2655  ;;  %v1240_v42 = vadd.f32 %v1239_v50, %v1213_v26 }
 0x9c3   :  { %v1389_v32 = vsub.f32 %v3441_v54, %v2656_v14 }
 0x9c4   :  { %2657 = vtanh.f32 %v1240_v42 }
 0x9c5   :  { %1391 = vrot.lane.b32.xlu2 %v1389_v32, %s2839_s3  ;;  %v1098_v41 = vpop.permute.xlu1 %1097  ;;  %v3918_v32 = vld [vmem:[#allocation15_spill] sm:$0xff] }
 0x9c6   :  { %v1100_v0 = vmul.f32 %v1098_v41, %v3484_v23  ;;  %v3919_v41 = vld [vmem:[#allocation16_spill] sm:$0xff] }
 0x9c8   :  { %1102 = vrot.lane.b32.xlu1 %v1100_v0, %s2839_s3  ;;  %v3920_v0 = vld [vmem:[#allocation17_spill] sm:$0xff] }
 0x9ca   :  { %v2658_v7 = vpop.eup %2657 }
 0x9cb   :  { %v1242_v56 = vsub.f32 %v3427_v51, %v2658_v7 }
 0x9cd   :  { %1244 = vrot.lane.b32.xlu0 %v1242_v56, %s2839_s3  ;;  %v3922_v56 = vld [vmem:[#allocation32_spill] sm:$0xff] }
 0xa1f   :  { %v1392_v57 = vpop.permute.xlu2 %1391 }
 0xa20   :  { %v1394_v48 = vmul.f32 %v1392_v57, %v1380_v22 }
 0xa22   :  { %1396 = vrot.lane.b32.xlu2 %v1394_v48, %s2839_s3 }
 0xa3a   :  { %v1103_v26 = vpop.permute.xlu1 %1102 }
 0xa3b   :  { %v3508_v54 = vadd.f32 %v3489_v10, %v1103_v26 }
 0xa3d   :  { %3917 = vst [vmem:[#allocation22_spill] sm:$0xff] %v3508_v54  ;;  %1254 = vrot.lane.b32.xlu1 %v3508_v54, %s2839_s3 }
 0xa3f   :  { %v1245_v55 = vpop.permute.xlu0 %1244 }
 0xa40   :  { %v1247_v23 = vmul.f32 %v1245_v55, %v1233_v35 }
 0xa42   :  { %1249 = vrot.lane.b32.xlu0 %v1247_v23, %s2839_s3 }
 0xa7c   :  { %v1397_v35 = vpop.permute.xlu2 %1396 }
 0xa7d   :  { %v3527_v10 = vadd.f32 %v2656_v14, %v1397_v35 }
 0xa7f   :  { %v1547_v50 = vpack.c.bf16 %v3527_v10, %v3527_v10 }
 0xaaf   :  { %v1255_v51 = vpop.permute.xlu1 %1254 }
 0xab4   :  { %v1250_v52 = vpop.permute.xlu0 %1249 }
 0xab5   :  { %v3513_v63 = vadd.f32 %v2658_v7, %v1250_v52  ;;  %v3921_v7 = vld [vmem:[#allocation18_spill] sm:$0xff] }
 0xab7   :  { %v1257_v58 = vsel %vm283_vm5, %v3513_v63, %v1255_v51  ;;  %1401 = vrot.lane.b32.xlu0 %v3513_v63, %s2839_s3 }
 0xab8   :  { %v1258_v22 = vpack.c.bf16 %v1257_v58, %v1257_v58 }
 0xaba   :  { %1267 = vmatmul.bf16.vlgmr.msrb.gmra.mxu0 %v1258_v22  ;;  %1280 = vmatmul.bf16.vlgmr.msrb.gmra.mxu1 %v1258_v22 }
 0xabb   :  { %1555 = vmatpush.bf16.msrb.mxu0 %v2945_v15  ;;  %1568 = vmatpush.bf16.msrb.mxu1 %v2922_v4 }
 0xabf   :  { %1556 = vmatpush.bf16.msrb.mxu0 %v2964_v24  ;;  %1569 = vmatpush.bf16.msrb.mxu1 %v2928_v9 }
 0xac3   :  { %1557 = vmatpush.bf16.msrb.mxu0 %v2976_v28  ;;  %1570 = vmatpush.bf16.msrb.mxu1 %v2954_v20 }
 0xac7   :  { %1571 = vmatpush.bf16.msrb.mxu1 %v2973_v27  ;;  %1558 = vmatpush.bf16.msrb.mxu0 %v2987_v31 }
 0xb29   :  { %v1402_v2 = vpop.permute.xlu0 %1401 }
 0xb2a   :  { %v1404_v36 = vsel %vm283_vm5, %v3527_v10, %v1402_v2 }
 0xb2b   :  { %v1405_v33 = vpack.c.bf16 %v1404_v36, %v1404_v36 }
 0xb2d   :  { %1414 = vmatmul.bf16.vlgmr.msra.gmra.mxu0 %v1405_v33  ;;  %1427 = vmatmul.bf16.vlgmr.msra.gmra.mxu1 %v1405_v33 }
 0xb2e   :  { %1691 = vmatpush.bf16.msra.mxu0 %v3143_v59  ;;  %1704 = vmatpush.bf16.msra.mxu1 %v3136_v49 }
 0xb32   :  { %1692 = vmatpush.bf16.msra.mxu0 %v3146_v61  ;;  %1705 = vmatpush.bf16.msra.mxu1 %v3141_v62 }
 0xb36   :  { %1693 = vmatpush.bf16.msra.mxu0 %v3152_v17  ;;  %1706 = vmatpush.bf16.msra.mxu1 %v3149_v5 }
 0xb37   :  { %v1268_v16 = vpop.f32.mrf.mxu0  ;;  %v1281_v60 = vpop.f32.mrf.mxu1 }
 0xb38   :  { %v1282_v1 = vadd.f32 %v1281_v60, %v3900_v39  ;;  %v1269_v57 = vadd.f32 %v1268_v16, %v3922_v56  ;;  %v3923_v16 = vld [vmem:[#allocation19_spill] sm:$0xff] }
 0xb3a   :  { %1305 = vrot.lane.b32.xlu1 %v1282_v1, %s2839_s3  ;;  %1694 = vmatpush.bf16.msra.mxu0 %v3164_v46  ;;  %v2487_v48 = vmul.f32 -1.442695, %v1269_v57 }
 0xb3b   :  { %1707 = vmatpush.bf16.msra.mxu1 %v3155_v18 }
 0xb3c   :  { %2659 = vpow2.f32 %v2487_v48 }
 0xb3d   :  { %2493 = vmatmul.msk.bf16.vlgmr.msrb.gmra.mxu0 %vm283_vm5, %v1547_v50  ;;  %2494 = vmatmul.msk.bf16.vlgmr.msrb.gmra.mxu1 %vm283_vm5, %v1547_v50 }
 0xb3e   :  { %1695 = vmatpush.bf16.msra.mxu0 %v3173_v53 }
 0xb3f   :  { %v1270_v14 = vpop.f32.mrf.mxu0  ;;  %v1283_v42 = vpop.f32.mrf.mxu1  ;;  %1708 = vmatpush.bf16.msra.mxu1 %v3162_v43 }
 0xb42   :  { %1696 = vmatpush.bf16.msra.mxu0 %v3184_v6  ;;  %v2660_v26 = vpop.eup %2659 }
 0xb43   :  { %1709 = vmatpush.bf16.msra.mxu1 %v3171_v34  ;;  %v1288_v55 = vadd.f32 1.0, %v2660_v26 }
 0xb45   :  { %2661 = vrcp.f32 %v1288_v55  ;;  %v1300_v35 = vand.u32 2147483648, %v1288_v55  ;;  %vm1294_vm7 = vweird.f32 %v1288_v55  ;;  %v1298_v2 = vand.u32 2147483647, %v1288_v55 }
 0xb46   :  { %1697 = vmatpush.bf16.msra.mxu0 %v3189_v25 }
 0xb47   :  { %1710 = vmatpush.bf16.msra.mxu1 %v3187_v11  ;;  %v1301_v50 = vor.u32 1.1754944e-38, %v1300_v35  ;;  %vm1299_vm9 = vcmp.eq.f32.partialorder %v1298_v2, 8.507059e+37 }
 0xb4a   :  { %1698 = vmatpush.bf16.msra.mxu0 %v3193_v40 }
 0xb4b   :  { %1711 = vmatpush.bf16.msra.mxu1 %v3195_v47  ;;  %v2662_v23 = vpop.eup %2661 }
 0xb4c   :  { %v1290_v52 = vmul.f32 %v2662_v23, %v1288_v55  ;;  %vm1295_vm6 = vweird.f32 %v2662_v23 }
 0xb4d   :  { %vm1296_vm8 = vmor %vm1294_vm7, %vm1295_vm6 }
 0xb4e   :  { %1838 = vmatpush.bf16.msrb.mxu0 %v3009_v3  ;;  %v1291_v51 = vsub.f32 1.0, %v1290_v52 }
 0xb4f   :  { %1851 = vmatpush.bf16.msrb.mxu1 %v3011_v8 }
 0xb50   :  { %v1292_v58 = vmul.f32 %v2662_v23, %v1291_v51 }
 0xb52   :  { %1839 = vmatpush.bf16.msrb.mxu0 %v3014_v12  ;;  %v1293_v22 = vadd.f32 %v2662_v23, %v1292_v58  ;;  %v3924_v58 = vld [vmem:[#allocation13_spill] sm:$0xff] }
 0xb53   :  { %1852 = vmatpush.bf16.msrb.mxu1 %v3017_v13 }
 0xb54   :  { %v1297_v36 = vsel %vm1296_vm8, %v2662_v23, %v1293_v22  ;;  %v3925_v22 = vld [vmem:[#allocation25_spill] sm:$0xff] }
 0xb55   :  { %v3571_v57 = vsel %vm1299_vm9, %v1301_v50, %v1297_v36  ;;  %v198_v35 = vadd.f32 %v3925_v22, %v3924_v58  ;;  %v3927_v22 = vld [vmem:[#allocation14_spill] sm:$0xff] }
 0xb56   :  { %1840 = vmatpush.bf16.msrb.mxu0 %v3020_v19  ;;  %v3928_v58 = vld [vmem:[#allocation26_spill] sm:$0xff] }
 0xb57   :  { %1853 = vmatpush.bf16.msrb.mxu1 %v3023_v21  ;;  %v169_v39 = vadd.f32 %v3928_v58, %v3927_v22 }
 0xb5a   :  { %1841 = vmatpush.bf16.msrb.mxu0 %v3026_v29 }
 0xb5b   :  { %1854 = vmatpush.bf16.msrb.mxu1 %v3029_v30 }
 0xb5e   :  { %1842 = vmatpush.bf16.msrb.mxu0 %v3032_v37 }
 0xb5f   :  { %1855 = vmatpush.bf16.msrb.mxu1 %v3035_v38 }
 0xb62   :  { %1843 = vmatpush.bf16.msrb.mxu0 %v3038_v44 }
 0xb63   :  { %1856 = vmatpush.bf16.msrb.mxu1 %v3041_v45 }
 0xb66   :  { %1844 = vmatpush.bf16.msrb.mxu0 %v3918_v32 }
 0xb67   :  { %1857 = vmatpush.bf16.msrb.mxu1 %v3919_v41 }
 0xb6a   :  { %1845 = vmatpush.bf16.msrb.mxu0 %v3920_v0 }
 0xb6b   :  { %1858 = vmatpush.bf16.msrb.mxu1 %v3921_v7 }
 0xbaa   :  { %v1415_v33 = vpop.f32.mrf.mxu0  ;;  %v1428_v60 = vpop.f32.mrf.mxu1 }
 0xbab   :  { %v1429_v14 = vadd.f32 %v1428_v60, %v3923_v16 }
 0xbac   :  { %v1306_v42 = vpop.permute.xlu1 %1305 }
 0xbad   :  { %v1308_v48 = vmul.f32 %v1306_v42, %v3571_v57  ;;  %1452 = vrot.lane.b32.xlu2 %v1429_v14, %s2839_s3  ;;  %v3926_v42 = vld [vmem:[#allocation20_spill] sm:$0xff] }
 0xbaf   :  { %v1309_v26 = vadd.f32 %v1308_v48, %v1282_v1  ;;  %v1416_v48 = vadd.f32 %v1415_v33, %v3926_v42 }
 0xbb1   :  { %2663 = vtanh.f32 %v1309_v26  ;;  %v2491_v26 = vmul.f32 -1.442695, %v1416_v48 }
 0xbb2   :  { %v1417_v52 = vpop.f32.mrf.mxu0  ;;  %v1430_v51 = vpop.f32.mrf.mxu1 }
 0xbb3   :  { %2665 = vpow2.f32 %v2491_v26 }
 0xbb7   :  { %v3575_v55 = vpop.eup %2663 }
 0xbb8   :  { %v1311_v23 = vsub.f32 %v3508_v54, %v3575_v55 }
 0xbb9   :  { %v2666_v52 = vpop.eup %2665 }
 0xbba   :  { %v1560_v2 = vpop.f32.mrf.mxu0  ;;  %v1573_v60 = vpop.f32.mrf.mxu1  ;;  %1313 = vrot.lane.b32.xlu0 %v1311_v23, %s2839_s3  ;;  %v1435_v51 = vadd.f32 1.0, %v2666_v52 }
 0xbbb   :  { %v1578_v36 = vadd.f32 %v1573_v60, %v198_v35  ;;  %v1577_v23 = vadd.f32 %v1560_v2, %v169_v39 }
 0xbbc   :  { %2667 = vrcp.f32 %v1435_v51  ;;  %v1447_v60 = vand.u32 2147483648, %v1435_v51  ;;  %vm1441_vm11 = vweird.f32 %v1435_v51 }
 0xbbd   :  { %1599 = vrot.lane.b32.xlu1 %v1578_v36, %s2839_s3 }
 0xbbe   :  { %v1448_v48 = vor.u32 1.1754944e-38, %v1447_v60 }
 0xbc2   :  { %v1562_v50 = vpop.f32.mrf.mxu0  ;;  %v1575_v1 = vpop.f32.mrf.mxu1 }
 0xbc3   :  { %v2668_v54 = vpop.eup %2667  ;;  %v2495_v50 = vmul.f32 -1.442695, %v1577_v23  ;;  %v1445_v1 = vand.u32 2147483647, %v1435_v51 }
 0xbc4   :  { %v1437_v56 = vmul.f32 %v2668_v54, %v1435_v51  ;;  %vm1442_vm10 = vweird.f32 %v2668_v54 }
 0xbc5   :  { %vm1443_vm12 = vmor %vm1441_vm11, %vm1442_vm10  ;;  %2669 = vpow2.f32 %v2495_v50  ;;  %vm1446_vm13 = vcmp.eq.f32.partialorder %v1445_v1, 8.507059e+37 }
 0xbc6   :  { %v1438_v16 = vsub.f32 1.0, %v1437_v56 }
 0xbc8   :  { %v1439_v7 = vmul.f32 %v2668_v54, %v1438_v16 }
 0xbca   :  { %v1440_v35 = vadd.f32 %v2668_v54, %v1439_v7 }
 0xbcb   :  { %v2670_v0 = vpop.eup %2669 }
 0xbcc   :  { %v1444_v33 = vsel %vm1443_vm12, %v2668_v54, %v1440_v35  ;;  %v1582_v58 = vadd.f32 1.0, %v2670_v0 }
 0xbcd   :  { %v1449_v52 = vsel %vm1446_vm13, %v1448_v48, %v1444_v33 }
 0xbce   :  { %v1594_v35 = vand.u32 2147483648, %v1582_v58  ;;  %vm1588_vm15 = vweird.f32 %v1582_v58  ;;  %v1592_v60 = vand.u32 2147483647, %v1582_v58 }
 0xbd0   :  { %v1595_v50 = vor.u32 1.1754944e-38, %v1594_v35  ;;  %vm1593_vm1 = vcmp.eq.f32.partialorder %v1592_v60, 8.507059e+37 }
 0xc07   :  { %v1453_v26 = vpop.permute.xlu2 %1452 }
 0xc08   :  { %v1455_v42 = vmul.f32 %v1453_v26, %v1449_v52 }
 0xc0a   :  { %v1456_v56 = vadd.f32 %v1455_v42, %v1429_v14 }
 0xc0c   :  { %2671 = vtanh.f32 %v1456_v56 }
 0xc0d   :  { %2673 = vrcp.f32 %v1582_v58 }
 0xc12   :  { %v2672_v16 = vpop.eup %2671 }
 0xc13   :  { %v1458_v39 = vsub.f32 %v3513_v63, %v2672_v16  ;;  %v2674_v7 = vpop.eup %2673 }
 0xc14   :  { %v1584_v2 = vmul.f32 %v2674_v7, %v1582_v58  ;;  %vm1589_vm14 = vweird.f32 %v2674_v7 }
 0xc15   :  { %1460 = vrot.lane.b32.xlu2 %v1458_v39, %s2839_s3  ;;  %vm1590_vm0 = vmor %vm1588_vm15, %vm1589_vm14 }
 0xc16   :  { %v1585_v51 = vsub.f32 1.0, %v1584_v2 }
 0xc18   :  { %v1586_v54 = vmul.f32 %v2674_v7, %v1585_v51 }
 0xc1a   :  { %v1587_v23 = vadd.f32 %v2674_v7, %v1586_v54 }
 0xc1c   :  { %v1591_v42 = vsel %vm1590_vm0, %v2674_v7, %v1587_v23 }
 0xc1d   :  { %v1596_v63 = vsel %vm1593_vm1, %v1595_v50, %v1591_v42  ;;  %v3934_v50 = vld [vmem:[#allocation27_spill] sm:$0xff] }
 0xc2c   :  { %v1314_v14 = vpop.permute.xlu0 %1313 }
 0xc2d   :  { %v1316_v0 = vmul.f32 %v1314_v14, %v3571_v57 }
 0xc2f   :  { %v1600_v1 = vpop.permute.xlu1 %1599  ;;  %1318 = vrot.lane.b32.xlu0 %v1316_v0, %s2839_s3  ;;  %v3933_v0 = vld [vmem:[#allocation13_spill] sm:$0xff] }
 0xc30   :  { %v1602_v33 = vmul.f32 %v1600_v1, %v1596_v63  ;;  %v201_v1 = vadd.f32 %v3934_v50, %v3933_v0 }
 0xc32   :  { %v1603_v48 = vadd.f32 %v1602_v33, %v1578_v36 }
 0xc34   :  { %2675 = vtanh.f32 %v1603_v48 }
 0xc3a   :  { %v2676_v26 = vpop.eup %2675 }
 0xc3b   :  { %v1605_v56 = vsub.f32 %v3527_v10, %v2676_v26 }
 0xc3d   :  { %1607 = vrot.lane.b32.xlu1 %v1605_v56, %s2839_s3 }
 0xc6f   :  { %v1461_v58 = vpop.permute.xlu2 %1460 }
 0xc70   :  { %v1463_v39 = vmul.f32 %v1461_v58, %v1449_v52 }
 0xc72   :  { %1465 = vrot.lane.b32.xlu2 %v1463_v39, %s2839_s3 }
 0xca1   :  { %v1319_v7 = vpop.permute.xlu0 %1318 }
 0xca2   :  { %v3594_v57 = vadd.f32 %v3575_v55, %v1319_v7 }
 0xca4   :  { %1470 = vrot.lane.b32.xlu0 %v3594_v57, %s2839_s3 }
 0xcaf   :  { %v1608_v2 = vpop.permute.xlu1 %1607 }
 0xcb0   :  { %v1610_v51 = vmul.f32 %v1608_v2, %v1596_v63  ;;  %v3935_v63 = vld [vmem:[#allocation28_spill] sm:$0xff] }
 0xcb1   :  { %v172_v33 = vadd.f32 %v3935_v63, %v3927_v22  ;;  %v3936_v2 = vld [vmem:[#allocation32_spill] sm:$0xff] }
 0xcb2   :  { %1612 = vrot.lane.b32.xlu1 %v1610_v51, %s2839_s3 }
 0xccc   :  { %v1466_v36 = vpop.permute.xlu2 %1465 }
 0xccd   :  { %v3599_v54 = vadd.f32 %v2672_v16, %v1466_v36 }
 0xccf   :  { %1617 = vrot.lane.b32.xlu2 %v3599_v54, %s2839_s3 }
 0xd16   :  { %v1471_v10 = vpop.permute.xlu0 %1470 }
 0xd17   :  { %v1473_v52 = vsel %vm283_vm5, %v3599_v54, %v1471_v10 }
 0xd18   :  { %v1474_v23 = vpack.c.bf16 %v1473_v52, %v1473_v52 }
 0xd1a   :  { %1483 = vmatmul.bf16.vlgmr.msra.gmra.mxu2 %v1474_v23  ;;  %1496 = vmatmul.bf16.vlgmr.msra.gmra.mxu3 %v1474_v23  ;;  %v3937_v23 = vld [vmem:[#allocation20_spill] sm:$0xff] }
 0xd1b   :  { %1771 = vmatpush.bf16.msra.mxu2 %v2945_v15  ;;  %1784 = vmatpush.bf16.msra.mxu3 %v2922_v4 }
 0xd1f   :  { %1772 = vmatpush.bf16.msra.mxu2 %v2964_v24  ;;  %1785 = vmatpush.bf16.msra.mxu3 %v2928_v9 }
 0xd23   :  { %1773 = vmatpush.bf16.msra.mxu2 %v2976_v28  ;;  %1786 = vmatpush.bf16.msra.mxu3 %v2954_v20 }
 0xd24   :  { %v1613_v55 = vpop.permute.xlu1 %1612 }
 0xd25   :  { %v3613_v16 = vadd.f32 %v2676_v26, %v1613_v55 }
 0xd27   :  { %1774 = vmatpush.bf16.msra.mxu2 %v2987_v31  ;;  %1787 = vmatpush.bf16.msra.mxu3 %v2973_v27  ;;  %v1763_v42 = vpack.c.bf16 %v3613_v16, %v3613_v16 }
 0xd29   :  { %v1618_v35 = vpop.permute.xlu2 %1617 }
 0xd2a   :  { %v1620_v60 = vsel %vm283_vm5, %v3613_v16, %v1618_v35 }
 0xd2b   :  { %v1621_v14 = vpack.c.bf16 %v1620_v60, %v1620_v60 }
 0xd2d   :  { %1630 = vmatmul.bf16.vlgmr.msrb.gmra.mxu2 %v1621_v14  ;;  %1643 = vmatmul.bf16.vlgmr.msrb.gmra.mxu3 %v1621_v14 }
 0xd2e   :  { %1907 = vmatpush.bf16.msrb.mxu2 %v3143_v59  ;;  %1920 = vmatpush.bf16.msrb.mxu3 %v3136_v49 }
 0xd32   :  { %1908 = vmatpush.bf16.msrb.mxu2 %v3146_v61  ;;  %1921 = vmatpush.bf16.msrb.mxu3 %v3141_v62 }
 0xd36   :  { %1909 = vmatpush.bf16.msrb.mxu2 %v3152_v17  ;;  %1922 = vmatpush.bf16.msrb.mxu3 %v3149_v5 }
 0xd3a   :  { %1910 = vmatpush.bf16.msrb.mxu2 %v3164_v46  ;;  %1923 = vmatpush.bf16.msrb.mxu3 %v3155_v18 }
 0xd3d   :  { %2498 = vmatmul.msk.bf16.vlgmr.msra.gmra.mxu2 %vm283_vm5, %v1763_v42  ;;  %2499 = vmatmul.msk.bf16.vlgmr.msra.gmra.mxu3 %vm283_vm5, %v1763_v42 }
 0xd3e   :  { %1911 = vmatpush.bf16.msrb.mxu2 %v3173_v53  ;;  %1924 = vmatpush.bf16.msrb.mxu3 %v3162_v43 }
 0xd42   :  { %1912 = vmatpush.bf16.msrb.mxu2 %v3184_v6  ;;  %1925 = vmatpush.bf16.msrb.mxu3 %v3171_v34 }
 0xd46   :  { %1913 = vmatpush.bf16.msrb.mxu2 %v3189_v25  ;;  %1926 = vmatpush.bf16.msrb.mxu3 %v3187_v11 }
 0xd4a   :  { %1914 = vmatpush.bf16.msrb.mxu2 %v3193_v40  ;;  %1927 = vmatpush.bf16.msrb.mxu3 %v3195_v47 }
 0xd4e   :  { %2054 = vmatpush.bf16.msra.mxu2 %v3009_v3  ;;  %2067 = vmatpush.bf16.msra.mxu3 %v3011_v8  ;;  %v3929_v3 = vld [vmem:[#allocation17_spill] sm:$0xff]  ;;  %v3930_v8 = vld [vmem:[#allocation18_spill] sm:$0xff] }
 0xd52   :  { %2055 = vmatpush.bf16.msra.mxu2 %v3014_v12  ;;  %2068 = vmatpush.bf16.msra.mxu3 %v3017_v13 }
 0xd56   :  { %2056 = vmatpush.bf16.msra.mxu2 %v3020_v19  ;;  %2069 = vmatpush.bf16.msra.mxu3 %v3023_v21  ;;  %v3931_v19 = vld [vmem:[#allocation31_spill] sm:$0xff] }
 0xd5a   :  { %2057 = vmatpush.bf16.msra.mxu2 %v3026_v29  ;;  %2070 = vmatpush.bf16.msra.mxu3 %v3029_v30 }
 0xd5e   :  { %2058 = vmatpush.bf16.msra.mxu2 %v3032_v37  ;;  %2071 = vmatpush.bf16.msra.mxu3 %v3035_v38 }
 0xd62   :  { %2059 = vmatpush.bf16.msra.mxu2 %v3038_v44  ;;  %2072 = vmatpush.bf16.msra.mxu3 %v3041_v45  ;;  %v3932_v44 = vld [vmem:[#allocation19_spill] sm:$0xff] }
 0xd66   :  { %2060 = vmatpush.bf16.msra.mxu2 %v3918_v32  ;;  %2073 = vmatpush.bf16.msra.mxu3 %v3919_v41 }
 0xd6a   :  { %2061 = vmatpush.bf16.msra.mxu2 %v3929_v3  ;;  %2074 = vmatpush.bf16.msra.mxu3 %v3930_v8 }
 0xd9d   :  { %v1484_v12 = vpop.f32.mrf.mxu2  ;;  %v1497_v13 = vpop.f32.mrf.mxu3 }
 0xd9e   :  { %v1498_v21 = vadd.f32 %v1497_v13, %v3931_v19  ;;  %v1485_v51 = vadd.f32 %v1484_v12, %v3936_v2 }
 0xda0   :  { %1521 = vrot.lane.b32.xlu0 %v1498_v21, %s2839_s3  ;;  %v2492_v36 = vmul.f32 -1.442695, %v1485_v51 }
 0xda2   :  { %2677 = vpow2.f32 %v2492_v36 }
 0xda5   :  { %v1486_v29 = vpop.f32.mrf.mxu2  ;;  %v1499_v30 = vpop.f32.mrf.mxu3 }
 0xda8   :  { %v2678_v10 = vpop.eup %2677 }
 0xda9   :  { %v1504_v52 = vadd.f32 1.0, %v2678_v10 }
 0xdab   :  { %2679 = vrcp.f32 %v1504_v52  ;;  %v1516_v12 = vand.u32 2147483648, %v1504_v52  ;;  %vm1510_vm3 = vweird.f32 %v1504_v52 }
 0xdb0   :  { %v1631_v37 = vpop.f32.mrf.mxu2  ;;  %v1644_v38 = vpop.f32.mrf.mxu3 }
 0xdb1   :  { %v3656_v45 = vadd.f32 %v1644_v38, %v3932_v44  ;;  %v1632_v55 = vadd.f32 %v1631_v37, %v3937_v23  ;;  %v2680_v60 = vpop.eup %2679  ;;  %v1514_v38 = vand.u32 2147483647, %v1504_v52 }
 0xdb2   :  { %v1506_v14 = vmul.f32 %v2680_v60, %v1504_v52  ;;  %vm1511_vm2 = vweird.f32 %v2680_v60 }
 0xdb3   :  { %1668 = vrot.lane.b32.xlu1 %v3656_v45, %s2839_s3  ;;  %v2496_v35 = vmul.f32 -1.442695, %v1632_v55  ;;  %vm1512_vm4 = vmor %vm1510_vm3, %vm1511_vm2  ;;  %vm1515_vm6 = vcmp.eq.f32.partialorder %v1514_v38, 8.507059e+37 }
 0xdb4   :  { %v1507_v3 = vsub.f32 1.0, %v1506_v14 }
 0xdb5   :  { %2681 = vpow2.f32 %v2496_v35 }
 0xdb6   :  { %v1508_v13 = vmul.f32 %v2680_v60, %v1507_v3 }
 0xdb8   :  { %v1633_v32 = vpop.f32.mrf.mxu2  ;;  %v1646_v41 = vpop.f32.mrf.mxu3  ;;  %v1509_v30 = vadd.f32 %v2680_v60, %v1508_v13 }
 0xdb9   :  { %v1517_v41 = vor.u32 1.1754944e-38, %v1516_v12 }
 0xdba   :  { %v1513_v37 = vsel %vm1512_vm4, %v2680_v60, %v1509_v30 }
 0xdbb   :  { %v2682_v42 = vpop.eup %2681  ;;  %v1518_v63 = vsel %vm1515_vm6, %v1517_v41, %v1513_v37 }
 0xdbc   :  { %v1651_v8 = vadd.f32 1.0, %v2682_v42 }
 0xdbe   :  { %2683 = vrcp.f32 %v1651_v8  ;;  %v1663_v55 = vand.u32 2147483648, %v1651_v8  ;;  %vm1657_vm8 = vweird.f32 %v1651_v8  ;;  %v1661_v35 = vand.u32 2147483647, %v1651_v8 }
 0xdc0   :  { %v1776_v48 = vpop.f32.mrf.mxu2  ;;  %v1789_v26 = vpop.f32.mrf.mxu3  ;;  %v1664_v42 = vor.u32 1.1754944e-38, %v1663_v55  ;;  %vm1662_vm10 = vcmp.eq.f32.partialorder %v1661_v35, 8.507059e+37 }
 0xdc1   :  { %v1793_v56 = vadd.f32 %v1776_v48, %v172_v33  ;;  %v3664_v58 = vadd.f32 %v1789_v26, %v201_v1 }
 0xdc3   :  { %1815 = vrot.lane.b32.xlu0 %v3664_v58, %s2839_s3  ;;  %v2500_v29 = vmul.f32 -1.442695, %v1793_v56 }
 0xdc4   :  { %v2684_v32 = vpop.eup %2683 }
 0xdc5   :  { %2685 = vpow2.f32 %v2500_v29  ;;  %v1653_v33 = vmul.f32 %v2684_v32, %v1651_v8  ;;  %vm1658_vm7 = vweird.f32 %v2684_v32 }
 0xdc6   :  { %vm1659_vm9 = vmor %vm1657_vm8, %vm1658_vm7 }
 0xdc7   :  { %v1654_v56 = vsub.f32 1.0, %v1653_v33 }
 0xdc8   :  { %v1778_v39 = vpop.f32.mrf.mxu2  ;;  %v1791_v7 = vpop.f32.mrf.mxu3 }
 0xdc9   :  { %v1655_v7 = vmul.f32 %v2684_v32, %v1654_v56 }
 0xdcb   :  { %v2686_v50 = vpop.eup %2685  ;;  %v1656_v10 = vadd.f32 %v2684_v32, %v1655_v7 }
 0xdcc   :  { %v1798_v26 = vadd.f32 1.0, %v2686_v50 }
 0xdcd   :  { %v1660_v60 = vsel %vm1659_vm9, %v2684_v32, %v1656_v10 }
 0xdce   :  { %v1665_v3 = vsel %vm1662_vm10, %v1664_v42, %v1660_v60  ;;  %v1810_v37 = vand.u32 2147483648, %v1798_v26  ;;  %vm1804_vm12 = vweird.f32 %v1798_v26  ;;  %v1808_v50 = vand.u32 2147483647, %v1798_v26 }
 0xdd0   :  { %vm1809_vm14 = vcmp.eq.f32.partialorder %v1808_v50, 8.507059e+37 }
 0xe12   :  { %v1522_v1 = vpop.permute.xlu0 %1521 }
 0xe13   :  { %v1524_v48 = vmul.f32 %v1522_v1, %v1518_v63  ;;  %v1811_v1 = vor.u32 1.1754944e-38, %v1810_v37 }
 0xe15   :  { %v1525_v39 = vadd.f32 %v1524_v48, %v1498_v21 }
 0xe17   :  { %2687 = vtanh.f32 %v1525_v39 }
 0xe18   :  { %2689 = vrcp.f32 %v1798_v26 }
 0xe1d   :  { %v2688_v51 = vpop.eup %2687 }
 0xe1e   :  { %v1527_v36 = vsub.f32 %v3594_v57, %v2688_v51  ;;  %v2690_v52 = vpop.eup %2689 }
 0xe1f   :  { %v1800_v14 = vmul.f32 %v2690_v52, %v1798_v26  ;;  %vm1805_vm11 = vweird.f32 %v2690_v52 }
 0xe20   :  { %1529 = vrot.lane.b32.xlu2 %v1527_v36, %s2839_s3  ;;  %vm1806_vm13 = vmor %vm1804_vm12, %vm1805_vm11 }
 0xe21   :  { %v1801_v29 = vsub.f32 1.0, %v1800_v14 }
 0xe23   :  { %v1802_v12 = vmul.f32 %v2690_v52, %v1801_v29 }
 0xe25   :  { %v1669_v21 = vpop.permute.xlu1 %1668  ;;  %v1803_v38 = vadd.f32 %v2690_v52, %v1802_v12 }
 0xe26   :  { %v1671_v13 = vmul.f32 %v1669_v21, %v1665_v3 }
 0xe27   :  { %v1807_v32 = vsel %vm1806_vm13, %v2690_v52, %v1803_v38 }
 0xe28   :  { %v1672_v30 = vadd.f32 %v1671_v13, %v3656_v45  ;;  %v1812_v48 = vsel %vm1809_vm14, %v1811_v1, %v1807_v32 }
 0xe2a   :  { %2691 = vtanh.f32 %v1672_v30 }
 0xe30   :  { %v2692_v41 = vpop.eup %2691 }
 0xe31   :  { %v1674_v8 = vsub.f32 %v3599_v54, %v2692_v41 }
 0xe33   :  { %1676 = vrot.lane.b32.xlu1 %v1674_v8, %s2839_s3  ;;  %v3938_v8 = vld [vmem:[#allocation29_spill] sm:$0xff] }
 0xe34   :  { %v203_v32 = vadd.f32 %v3938_v8, %v3933_v0 }
 0xe35   :  { %v1816_v33 = vpop.permute.xlu0 %1815 }
 0xe36   :  { %v1818_v39 = vmul.f32 %v1816_v33, %v1812_v48 }
 0xe38   :  { %v1819_v45 = vadd.f32 %v1818_v39, %v3664_v58 }
 0xe3a   :  { %2693 = vtanh.f32 %v1819_v45 }
 0xe40   :  { %v2694_v56 = vpop.eup %2693 }
 0xe41   :  { %v1821_v7 = vsub.f32 %v3613_v16, %v2694_v56 }
 0xe43   :  { %1823 = vrot.lane.b32.xlu0 %v1821_v7, %s2839_s3 }
 0xe7a   :  { %v1530_v26 = vpop.permute.xlu2 %1529 }
 0xe7b   :  { %v1532_v36 = vmul.f32 %v1530_v26, %v1518_v63 }
 0xe7d   :  { %1534 = vrot.lane.b32.xlu2 %v1532_v36, %s2839_s3 }
 0xea5   :  { %v1677_v54 = vpop.permute.xlu1 %1676 }
 0xea6   :  { %v1679_v10 = vmul.f32 %v1677_v54, %v1665_v3 }
 0xea8   :  { %1681 = vrot.lane.b32.xlu1 %v1679_v10, %s2839_s3 }
 0xeb5   :  { %v1824_v52 = vpop.permute.xlu0 %1823 }
 0xeb6   :  { %v1826_v55 = vmul.f32 %v1824_v52, %v1812_v48 }
 0xeb8   :  { %1828 = vrot.lane.b32.xlu0 %v1826_v55, %s2839_s3 }
 0xed7   :  { %v1535_v35 = vpop.permute.xlu2 %1534 }
 0xed8   :  { %v3681_v58 = vadd.f32 %v2688_v51, %v1535_v35 }
 0xeda   :  { %1686 = vrot.lane.b32.xlu2 %v3681_v58, %s2839_s3 }
 0xf1a   :  { %v1682_v16 = vpop.permute.xlu1 %1681 }
 0xf1b   :  { %v3685_v60 = vadd.f32 %v2692_v41, %v1682_v16 }
 0xf1d   :  { %1833 = vrot.lane.b32.xlu1 %v3685_v60, %s2839_s3 }
 0xf2a   :  { %v1829_v51 = vpop.permute.xlu0 %1828 }
 0xf2b   :  { %v3699_v21 = vadd.f32 %v2694_v56, %v1829_v51  ;;  %v3939_v56 = vld [vmem:[#allocation30_spill] sm:$0xff] }
 0xf2c   :  { %v174_v7 = vadd.f32 %v3939_v56, %v3927_v22 }
 0xf34   :  { %v1687_v63 = vpop.permute.xlu2 %1686 }
 0xf35   :  { %v1689_v14 = vsel %vm283_vm5, %v3685_v60, %v1687_v63 }
 0xf36   :  { %v1690_v42 = vpack.c.bf16 %v1689_v14, %v1689_v14 }
 0xf38   :  { %1699 = vmatmul.bf16.vlgmr.msra.gmra.mxu0 %v1690_v42  ;;  %1712 = vmatmul.bf16.vlgmr.msra.gmra.mxu1 %v1690_v42 }
 0xf39   :  { %1987 = vmatpush.bf16.msra.mxu0 %v2945_v15  ;;  %2000 = vmatpush.bf16.msra.mxu1 %v2922_v4 }
 0xf3d   :  { %1988 = vmatpush.bf16.msra.mxu0 %v2964_v24  ;;  %2001 = vmatpush.bf16.msra.mxu1 %v2928_v9  ;;  %v1979_v9 = vpack.c.bf16 %v3699_v21, %v3699_v21 }
 0xf41   :  { %1989 = vmatpush.bf16.msra.mxu0 %v2976_v28  ;;  %2002 = vmatpush.bf16.msra.mxu1 %v2954_v20 }
 0xf45   :  { %1990 = vmatpush.bf16.msra.mxu0 %v2987_v31  ;;  %2003 = vmatpush.bf16.msra.mxu1 %v2973_v27 }
 0xf8f   :  { %v1834_v3 = vpop.permute.xlu1 %1833 }
 0xf90   :  { %v1836_v15 = vsel %vm283_vm5, %v3699_v21, %v1834_v3 }
 0xf91   :  { %v1837_v4 = vpack.c.bf16 %v1836_v15, %v1836_v15 }
 0xf93   :  { %1846 = vmatmul.bf16.vlgmr.msrb.gmra.mxu0 %v1837_v4  ;;  %1859 = vmatmul.bf16.vlgmr.msrb.gmra.mxu1 %v1837_v4 }
 0xf94   :  { %2123 = vmatpush.bf16.msrb.mxu0 %v3143_v59  ;;  %2136 = vmatpush.bf16.msrb.mxu1 %v3136_v49 }
 0xf98   :  { %2124 = vmatpush.bf16.msrb.mxu0 %v3146_v61  ;;  %2137 = vmatpush.bf16.msrb.mxu1 %v3141_v62 }
 0xf9c   :  { %2125 = vmatpush.bf16.msrb.mxu0 %v3152_v17  ;;  %2138 = vmatpush.bf16.msrb.mxu1 %v3149_v5 }
 0xfa0   :  { %2126 = vmatpush.bf16.msrb.mxu0 %v3164_v46  ;;  %2139 = vmatpush.bf16.msrb.mxu1 %v3155_v18 }
 0xfa3   :  { %2503 = vmatmul.msk.bf16.vlgmr.msra.gmra.mxu0 %vm283_vm5, %v1979_v9  ;;  %2504 = vmatmul.msk.bf16.vlgmr.msra.gmra.mxu1 %vm283_vm5, %v1979_v9 }
 0xfa4   :  { %2127 = vmatpush.bf16.msrb.mxu0 %v3173_v53  ;;  %2140 = vmatpush.bf16.msrb.mxu1 %v3162_v43 }
 0xfa8   :  { %2128 = vmatpush.bf16.msrb.mxu0 %v3184_v6  ;;  %2141 = vmatpush.bf16.msrb.mxu1 %v3171_v34 }
 0xfac   :  { %2129 = vmatpush.bf16.msrb.mxu0 %v3189_v25  ;;  %2142 = vmatpush.bf16.msrb.mxu1 %v3187_v11 }
 0xfb0   :  { %2130 = vmatpush.bf16.msrb.mxu0 %v3193_v40  ;;  %2143 = vmatpush.bf16.msrb.mxu1 %v3195_v47 }
 0xfb5   :  { %v1700_v20 = vpop.f32.mrf.mxu0  ;;  %v1713_v24 = vpop.f32.mrf.mxu1 }
 0xfb6   :  { %v1714_v27 = vadd.f32 %v1713_v24, %v3931_v19  ;;  %v1701_v49 = vadd.f32 %v1700_v20, %v3936_v2 }
 0xfb8   :  { %1737 = vrot.lane.b32.xlu2 %v1714_v27, %s2839_s3  ;;  %v2497_v62 = vmul.f32 -1.442695, %v1701_v49 }
 0xfba   :  { %2695 = vpow2.f32 %v2497_v62 }
 0xfbd   :  { %v1702_v28 = vpop.f32.mrf.mxu0  ;;  %v1715_v31 = vpop.f32.mrf.mxu1 }
 0xfc0   :  { %v2696_v59 = vpop.eup %2695 }
 0xfc1   :  { %v1720_v61 = vadd.f32 1.0, %v2696_v59 }
 0xfc3   :  { %2697 = vrcp.f32 %v1720_v61  ;;  %v1732_v34 = vand.u32 2147483648, %v1720_v61  ;;  %vm1726_vm0 = vweird.f32 %v1720_v61  ;;  %v1730_v53 = vand.u32 2147483647, %v1720_v61 }
 0xfc5   :  { %v1733_v40 = vor.u32 1.1754944e-38, %v1732_v34  ;;  %vm1731_vm2 = vcmp.eq.f32.partialorder %v1730_v53, 8.507059e+37 }
 0xfc9   :  { %v2698_v5 = vpop.eup %2697 }
 0xfca   :  { %v1722_v17 = vmul.f32 %v2698_v5, %v1720_v61  ;;  %vm1727_vm15 = vweird.f32 %v2698_v5 }
 0xfcb   :  { %vm1728_vm1 = vmor %vm1726_vm0, %vm1727_vm15 }
 0xfcc   :  { %v1723_v18 = vsub.f32 1.0, %v1722_v17 }
 0xfce   :  { %v1724_v43 = vmul.f32 %v2698_v5, %v1723_v18 }
 0xfd0   :  { %v1725_v46 = vadd.f32 %v2698_v5, %v1724_v43 }
 0xfd2   :  { %v1729_v6 = vsel %vm1728_vm1, %v2698_v5, %v1725_v46 }
 0xfd3   :  { %v3729_v29 = vsel %vm1731_vm2, %v1733_v40, %v1729_v6 }
0x1010   :  { %v1847_v11 = vpop.f32.mrf.mxu0  ;;  %v1860_v25 = vpop.f32.mrf.mxu1 }
0x1011   :  { %v3727_v47 = vadd.f32 %v1860_v25, %v3932_v44  ;;  %v1848_v54 = vadd.f32 %v1847_v11, %v3937_v23 }
0x1012   :  { %v1738_v13 = vpop.permute.xlu2 %1737 }
0x1013   :  { %v1740_v30 = vmul.f32 %v1738_v13, %v3729_v29  ;;  %1884 = vrot.lane.b32.xlu0 %v3727_v47, %s2839_s3  ;;  %v2501_v10 = vmul.f32 -1.442695, %v1848_v54 }
0x1015   :  { %v1741_v12 = vadd.f32 %v1740_v30, %v1714_v27 }
0x1017   :  { %2699 = vtanh.f32 %v1741_v12 }
0x1018   :  { %v1849_v38 = vpop.f32.mrf.mxu0  ;;  %v1862_v37 = vpop.f32.mrf.mxu1 }
0x101d   :  { %v3734_v41 = vpop.eup %2699 }
0x101e   :  { %v1743_v50 = vsub.f32 %v3681_v58, %v3734_v41 }
0x1020   :  { %v1992_v1 = vpop.f32.mrf.mxu0  ;;  %v2005_v33 = vpop.f32.mrf.mxu1  ;;  %1745 = vrot.lane.b32.xlu1 %v1743_v50, %s2839_s3 }
0x1021   :  { %v2010_v48 = vadd.f32 %v2005_v33, %v203_v32  ;;  %v2009_v26 = vadd.f32 %v1992_v1, %v174_v7 }
0x1023   :  { %2031 = vrot.lane.b32.xlu2 %v2010_v48, %s2839_s3  ;;  %v2505_v36 = vmul.f32 -1.442695, %v2009_v26 }
0x1025   :  { %2701 = vpow2.f32 %v2505_v36 }
0x1026   :  { %2703 = vpow2.f32 %v2501_v10 }
0x1028   :  { %v1994_v39 = vpop.f32.mrf.mxu0  ;;  %v2007_v45 = vpop.f32.mrf.mxu1 }
0x102b   :  { %v2702_v52 = vpop.eup %2701 }
0x102c   :  { %v2014_v0 = vadd.f32 1.0, %v2702_v52  ;;  %v2704_v55 = vpop.eup %2703 }
0x102d   :  { %v1867_v35 = vadd.f32 1.0, %v2704_v55 }
0x102e   :  { %2705 = vrcp.f32 %v2014_v0  ;;  %v2026_v4 = vand.u32 2147483648, %v2014_v0  ;;  %vm2020_vm4 = vweird.f32 %v2014_v0  ;;  %v2024_v9 = vand.u32 2147483647, %v2014_v0 }
0x102f   :  { %2707 = vrcp.f32 %v1867_v35  ;;  %v1879_v59 = vand.u32 2147483648, %v1867_v35  ;;  %vm1873_vm9 = vweird.f32 %v1867_v35  ;;  %v1877_v5 = vand.u32 2147483647, %v1867_v35 }
0x1030   :  { %v2027_v27 = vor.u32 1.1754944e-38, %v2026_v4  ;;  %vm2025_vm7 = vcmp.eq.f32.partialorder %v2024_v9, 8.507059e+37 }
0x1031   :  { %v1880_v18 = vor.u32 1.1754944e-38, %v1879_v59  ;;  %vm1878_vm11 = vcmp.eq.f32.partialorder %v1877_v5, 8.507059e+37 }
0x1034   :  { %v2706_v16 = vpop.eup %2705 }
0x1035   :  { %v2016_v63 = vmul.f32 %v2706_v16, %v2014_v0  ;;  %v2708_v42 = vpop.eup %2707  ;;  %vm2021_vm3 = vweird.f32 %v2706_v16 }
0x1036   :  { %v1869_v3 = vmul.f32 %v2708_v42, %v1867_v35  ;;  %vm2022_vm6 = vmor %vm2020_vm4, %vm2021_vm3  ;;  %vm1874_vm8 = vweird.f32 %v2708_v42 }
0x1037   :  { %v2017_v14 = vsub.f32 1.0, %v2016_v63  ;;  %vm1875_vm10 = vmor %vm1873_vm9, %vm1874_vm8 }
0x1038   :  { %v1870_v15 = vsub.f32 1.0, %v1869_v3 }
0x1039   :  { %v2018_v51 = vmul.f32 %v2706_v16, %v2017_v14 }
0x103a   :  { %v1871_v24 = vmul.f32 %v2708_v42, %v1870_v15 }
0x103b   :  { %v2019_v22 = vadd.f32 %v2706_v16, %v2018_v51 }
0x103c   :  { %v1872_v62 = vadd.f32 %v2708_v42, %v1871_v24 }
0x103d   :  { %v2023_v20 = vsel %vm2022_vm6, %v2706_v16, %v2019_v22 }
0x103e   :  { %v2028_v31 = vsel %vm2025_vm7, %v2027_v27, %v2023_v20  ;;  %v1876_v17 = vsel %vm1875_vm10, %v2708_v42, %v1872_v62 }
0x103f   :  { %v1881_v46 = vsel %vm1878_vm11, %v1880_v18, %v1876_v17 }
0x107d   :  { %v2032_v28 = vpop.permute.xlu2 %2031 }
0x107e   :  { %v2034_v49 = vmul.f32 %v2032_v28, %v2028_v31 }
0x1080   :  { %v2035_v61 = vadd.f32 %v2034_v49, %v2010_v48 }
0x1082   :  { %2709 = vtanh.f32 %v2035_v61 }
0x1085   :  { %v1885_v43 = vpop.permute.xlu0 %1884 }
0x1086   :  { %v1887_v34 = vmul.f32 %v1885_v43, %v1881_v46 }
0x1088   :  { %v2710_v53 = vpop.eup %2709  ;;  %v1888_v6 = vadd.f32 %v1887_v34, %v3727_v47 }
0x1089   :  { %v2037_v11 = vsub.f32 %v3699_v21, %v2710_v53 }
0x108a   :  { %2711 = vtanh.f32 %v1888_v6 }
0x108b   :  { %2039 = vrot.lane.b32.xlu2 %v2037_v11, %s2839_s3 }
0x1090   :  { %v2712_v25 = vpop.eup %2711 }
0x1091   :  { %v1890_v40 = vsub.f32 %v3685_v60, %v2712_v25 }
0x1092   :  { %v1746_v13 = vpop.permute.xlu1 %1745 }
0x1093   :  { %v1748_v30 = vmul.f32 %v1746_v13, %v3729_v29  ;;  %1892 = vrot.lane.b32.xlu0 %v1890_v40, %s2839_s3 }
0x1095   :  { %1750 = vrot.lane.b32.xlu1 %v1748_v30, %s2839_s3 }
0x10e5   :  { %v2040_v12 = vpop.permute.xlu2 %2039 }
0x10e6   :  { %v2042_v38 = vmul.f32 %v2040_v12, %v2028_v31 }
0x10e8   :  { %2044 = vrot.lane.b32.xlu2 %v2042_v38, %s2839_s3 }
0x1105   :  { %v1893_v47 = vpop.permute.xlu0 %1892 }
0x1106   :  { %v1895_v37 = vmul.f32 %v1893_v47, %v1881_v46 }
0x1107   :  { %v1751_v21 = vpop.permute.xlu1 %1750 }
0x1108   :  { %v3754_v50 = vadd.f32 %v3734_v41, %v1751_v21  ;;  %1897 = vrot.lane.b32.xlu0 %v1895_v37, %s2839_s3 }
0x110a   :  { %1902 = vrot.lane.b32.xlu1 %v3754_v50, %s2839_s3 }
0x1142   :  { %v2045_v41 = vpop.permute.xlu2 %2044 }
0x1143   :  { %v2047_v33 = vadd.f32 %v2710_v53, %v2045_v41 }
0x117a   :  { %v1898_v60 = vpop.permute.xlu0 %1897 }
0x117b   :  { %v3759_v29 = vadd.f32 %v2712_v25, %v1898_v60 }
0x117c   :  { %v1903_v8 = vpop.permute.xlu1 %1902 }
0x117d   :  { %v1905_v32 = vsel %vm283_vm5, %v3759_v29, %v1903_v8  ;;  %2049 = vrot.lane.b32.xlu0 %v3759_v29, %s2839_s3 }
0x117e   :  { %v1906_v1 = vpack.c.bf16 %v1905_v32, %v1905_v32 }
0x1180   :  { %1915 = vmatmul.bf16.vlgmr.msrb.gmra.mxu2 %v1906_v1  ;;  %1928 = vmatmul.bf16.vlgmr.msrb.gmra.mxu3 %v1906_v1 }
0x11ef   :  { %v2050_v48 = vpop.permute.xlu0 %2049 }
0x11f0   :  { %v2052_v39 = vsel %vm283_vm5, %v2047_v33, %v2050_v48  ;;  %v3783_v33 = vld [vmem:[%s3836_s0] sm:$0xff] }
0x11f1   :  { %v2053_v45 = vpack.c.bf16 %v2052_v39, %v2052_v39  ;;  %vm674_vm4 = vcmp.eq.s32.totalorder %v3783_v33, 1  ;;  %vm890_vm6 = vcmp.eq.s32.totalorder %v3783_v33, 2  ;;  %vm1322_vm7 = vcmp.eq.s32.totalorder %v3783_v33, 4 }
0x11f2   :  { %vm1754_vm8 = vcmp.eq.s32.totalorder %v3783_v33, 6  ;;  %vm1538_vm9 = vcmp.eq.s32.totalorder %v3783_v33, 5  ;;  %vm1970_vm11 = vcmp.eq.s32.totalorder %v3783_v33, 7 }
0x11f3   :  { %2062 = vmatmul.bf16.vlgmr.msra.gmra.mxu2 %v2053_v45  ;;  %2075 = vmatmul.bf16.vlgmr.msra.gmra.mxu3 %v2053_v45 }
0x1203   :  { %v1916_v56 = vpop.f32.mrf.mxu2  ;;  %v1929_v7 = vpop.f32.mrf.mxu3 }
0x1204   :  { %v1930_v26 = vadd.f32 %v1929_v7, %v3931_v19  ;;  %v1917_v10 = vadd.f32 %v1916_v56, %v3936_v2 }
0x1206   :  { %1953 = vrot.lane.b32.xlu1 %v1930_v26, %s2839_s3  ;;  %v2502_v52 = vmul.f32 -1.442695, %v1917_v10 }
0x1208   :  { %2713 = vpow2.f32 %v2502_v52 }
0x120b   :  { %v1918_v36 = vpop.f32.mrf.mxu2  ;;  %v1931_v54 = vpop.f32.mrf.mxu3 }
0x120e   :  { %v2714_v0 = vpop.eup %2713 }
0x120f   :  { %v1936_v55 = vadd.f32 1.0, %v2714_v0 }
0x1211   :  { %2715 = vrcp.f32 %v1936_v55  ;;  %v1948_v51 = vand.u32 2147483648, %v1936_v55  ;;  %vm1942_vm13 = vweird.f32 %v1936_v55  ;;  %v1946_v3 = vand.u32 2147483647, %v1936_v55 }
0x1213   :  { %v1949_v9 = vor.u32 1.1754944e-38, %v1948_v51  ;;  %vm1947_vm15 = vcmp.eq.f32.partialorder %v1946_v3, 8.507059e+37 }
0x1217   :  { %v2716_v35 = vpop.eup %2715 }
0x1218   :  { %v1938_v16 = vmul.f32 %v2716_v35, %v1936_v55  ;;  %vm1943_vm12 = vweird.f32 %v2716_v35 }
0x1219   :  { %vm1944_vm14 = vmor %vm1942_vm13, %vm1943_vm12  ;;  %vm2186_vm12 = vcmp.eq.s32.totalorder %v3783_v33, 8 }
0x121a   :  { %v1939_v63 = vsub.f32 1.0, %v1938_v16 }
0x121c   :  { %v1940_v14 = vmul.f32 %v2716_v35, %v1939_v63 }
0x121e   :  { %v1941_v42 = vadd.f32 %v2716_v35, %v1940_v14 }
0x1220   :  { %v1945_v22 = vsel %vm1944_vm14, %v2716_v35, %v1941_v42 }
0x1221   :  { %v1950_v27 = vsel %vm1947_vm15, %v1949_v9, %v1945_v22 }
0x1276   :  { %v2063_v15 = vpop.f32.mrf.mxu2  ;;  %v2076_v4 = vpop.f32.mrf.mxu3 }
0x1277   :  { %v2077_v20 = vadd.f32 %v2076_v4, %v3932_v44  ;;  %v2064_v5 = vadd.f32 %v2063_v15, %v3937_v23 }
0x1278   :  { %v1954_v24 = vpop.permute.xlu1 %1953 }
0x1279   :  { %v1956_v28 = vmul.f32 %v1954_v24, %v1950_v27  ;;  %2100 = vrot.lane.b32.xlu2 %v2077_v20, %s2839_s3  ;;  %v2506_v17 = vmul.f32 -1.442695, %v2064_v5 }
0x127b   :  { %v1957_v31 = vadd.f32 %v1956_v28, %v1930_v26 }
0x127d   :  { %2717 = vtanh.f32 %v1957_v31 }
0x127e   :  { %v2065_v49 = vpop.f32.mrf.mxu2  ;;  %v2078_v62 = vpop.f32.mrf.mxu3  ;;  %2719 = vpow2.f32 %v2506_v17 }
0x1283   :  { %v2718_v59 = vpop.eup %2717 }
0x1284   :  { %v1959_v61 = vsub.f32 %v3754_v50, %v2718_v59  ;;  %v2720_v44 = vpop.eup %2719 }
0x1285   :  { %v2083_v18 = vadd.f32 1.0, %v2720_v44 }
0x1286   :  { %1961 = vrot.lane.b32.xlu0 %v1959_v61, %s2839_s3 }
0x1287   :  { %2721 = vrcp.f32 %v2083_v18  ;;  %v2095_v11 = vand.u32 2147483648, %v2083_v18  ;;  %vm2089_vm1 = vweird.f32 %v2083_v18  ;;  %v2093_v25 = vand.u32 2147483647, %v2083_v18 }
0x1289   :  { %v2096_v13 = vor.u32 1.1754944e-38, %v2095_v11  ;;  %vm2094_vm3 = vcmp.eq.f32.partialorder %v2093_v25, 8.507059e+37 }
0x128d   :  { %v2722_v43 = vpop.eup %2721 }
0x128e   :  { %v2085_v46 = vmul.f32 %v2722_v43, %v2083_v18  ;;  %vm2090_vm0 = vweird.f32 %v2722_v43  ;;  %v2574_v18 = vld [vmem:[%s3845_s9 + $0x18] sm:$0xff] }
0x128f   :  { %vm2091_vm2 = vmor %vm2089_vm1, %vm2090_vm0  ;;  %vm1106_vm0 = vcmp.eq.s32.totalorder %v3783_v33, 3  ;;  %2237 = vmatpush.bf16.msrb.mxu2 %v2574_v18 }
0x1290   :  { %v2086_v34 = vsub.f32 1.0, %v2085_v46  ;;  %v2572_v46 = vld [vmem:[%s3845_s9 + $0x8] sm:$0xff] }
0x1292   :  { %v2087_v53 = vmul.f32 %v2722_v43, %v2086_v34 }
0x1294   :  { %v2088_v6 = vadd.f32 %v2722_v43, %v2087_v53 }
0x1296   :  { %v2092_v40 = vsel %vm2091_vm2, %v2722_v43, %v2088_v6  ;;  %v2573_v43 = vld [vmem:[%s3845_s9 + $0x10] sm:$0xff]  ;;  %v2571_v6 = vld [vmem:[%s3845_s9] sm:$0xff] }
0x1297   :  { %v2097_v23 = vsel %vm2094_vm3, %v2096_v13, %v2092_v40  ;;  %2238 = vmatpush.bf16.msrb.mxu2 %v2573_v43 }
0x129b   :  { %2239 = vmatpush.bf16.msrb.mxu2 %v2572_v46 }
0x129f   :  { %2240 = vmatpush.bf16.msrb.mxu2 %v2571_v6 }
0x12d3   :  { %v2101_v30 = vpop.permute.xlu2 %2100 }
0x12d4   :  { %v2103_v12 = vmul.f32 %v2101_v30, %v2097_v23 }
0x12d6   :  { %v2104_v38 = vadd.f32 %v2103_v12, %v2077_v20 }
0x12d8   :  { %2723 = vtanh.f32 %v2104_v38  ;;  %v3942_v38 = vld [vmem:[#allocation21_spill] sm:$0xff] }
0x12de   :  { %v2724_v47 = vpop.eup %2723 }
0x12df   :  { %v2106_v37 = vsub.f32 %v3759_v29, %v2724_v47  ;;  %v3940_v29 = vmov 0  }
0x12e0   :  { %v675_v48 = vsel %vm674_vm4, 1, %v3940_v29  ;;  %v891_v55 = vsel %vm890_vm6, 1, %v3940_v29  ;;  %v1539_v15 = vsel %vm1538_vm9, 1, %v3940_v29  ;;  %v2187_v28 = vsel %vm2186_vm12, 1, %v3940_v29 }
0x12e1   :  { %2108 = vrot.lane.b32.xlu1 %v2106_v37, %s2839_s3  ;;  %v1107_v44 = vsel %vm1106_vm0, 1, %v3940_v29  ;;  %v3943_v37 = vld [vmem:[#allocation22_spill] sm:$0xff] }
0x12f8   :  { %v1962_v21 = vpop.permute.xlu0 %1961 }
0x12f9   :  { %v1964_v60 = vmul.f32 %v1962_v21, %v1950_v27  ;;  %v1971_v27 = vsel %vm1970_vm11, 1, %v3940_v29 }
0x12fb   :  { %1966 = vrot.lane.b32.xlu2 %v1964_v60, %s2839_s3 }
0x1353   :  { %v2109_v8 = vpop.permute.xlu1 %2108 }
0x1354   :  { %v2111_v32 = vmul.f32 %v2109_v8, %v2097_v23  ;;  %v3941_v23 = vld [vmem:[#allocation33_spill] sm:$0xff] }
0x1355   :  { %v1967_v1 = vpop.permute.xlu2 %1966 }
0x1356   :  { %v3777_v41 = vadd.f32 %v2718_v59, %v1967_v1  ;;  %2113 = vrot.lane.b32.xlu0 %v2111_v32, %s2839_s3 }
0x1358   :  { %2118 = vrot.lane.b32.xlu1 %v3777_v41, %s2839_s3 }
0x1360   :  { %677 = vperm.xlu1 %2583, %v675_v48  }
0x13c8   :  { %v2114_v39 = vpop.permute.xlu0 %2113 }
0x13c9   :  { %v2116_v45 = vadd.f32 %v2724_v47, %v2114_v39 }
0x13ca   :  { %v2119_v56 = vpop.permute.xlu1 %2118 }
0x13cb   :  { %v2121_v7 = vsel %vm283_vm5, %v2116_v45, %v2119_v56 }
0x13cc   :  { %v2122_v26 = vpack.c.bf16 %v2121_v7, %v2121_v7 }
0x13ce   :  { %2131 = vmatmul.bf16.vlgmr.msrb.gmra.mxu0 %v2122_v26  ;;  %2144 = vmatmul.bf16.vlgmr.msrb.gmra.mxu1 %v2122_v26 }
0x13d2   :  { %v678_v11 = vpop.permute.xlu1 %677 }
0x13d3   :  { %vm679_vm1 = vcmp.eq.s32.totalorder %v678_v11, 1 }
0x13d4   :  { %v680_v12 = vsel %vm679_vm1, %v3941_v23, 0.0 }
0x144b   :  { %v2132_v36 = vpop.f32.mrf.mxu0  ;;  %v2145_v54 = vpop.f32.mrf.mxu1 }
0x144c   :  { %v2146_v10 = vadd.f32 %v2145_v54, %v3931_v19  ;;  %v2133_v35 = vadd.f32 %v2132_v36, %v3936_v2  ;;  %v1323_v19 = vsel %vm1322_vm7, 1, %v3940_v29  ;;  %v1755_v2 = vsel %vm1754_vm8, 1, %v3940_v29 }
0x144d   :  { %1325 = vperm.xlu1 %2583, %v1323_v19  }
0x144e   :  { %2169 = vrot.lane.b32.xlu2 %v2146_v10, %s2839_s3  ;;  %v2507_v16 = vmul.f32 -1.442695, %v2133_v35 }
0x1450   :  { %2725 = vpow2.f32 %v2507_v16 }
0x1453   :  { %v2134_v52 = vpop.f32.mrf.mxu0  ;;  %v2147_v0 = vpop.f32.mrf.mxu1 }
0x1455   :  { %1757 = vperm.xlu1 %2583, %v1755_v2  }
0x1456   :  { %893 = vperm.xlu2 %2584, %v891_v55   ;;  %v2726_v63 = vpop.eup %2725 }
0x1457   :  { %v2152_v14 = vadd.f32 1.0, %v2726_v63 }
0x1459   :  { %2727 = vrcp.f32 %v2152_v14  ;;  %v2164_v9 = vand.u32 2147483648, %v2152_v14  ;;  %vm2158_vm13 = vweird.f32 %v2152_v14  ;;  %v2162_v20 = vand.u32 2147483647, %v2152_v14 }
0x145b   :  { %v2165_v31 = vor.u32 1.1754944e-38, %v2164_v9  ;;  %vm2163_vm15 = vcmp.eq.f32.partialorder %v2162_v20, 8.507059e+37 }
0x145d   :  { %2189 = vperm.xlu1 %2583, %v2187_v28  }
0x145e   :  { %1541 = vperm.xlu2 %2584, %v1539_v15  }
0x145f   :  { %v2728_v42 = vpop.eup %2727 }
0x1460   :  { %v2154_v51 = vmul.f32 %v2728_v42, %v2152_v14  ;;  %vm2159_vm10 = vweird.f32 %v2728_v42 }
0x1461   :  { %vm2160_vm14 = vmor %vm2158_vm13, %vm2159_vm10  ;;  %vm2246_vm10 = vcmask 64512  }
0x1462   :  { %v2155_v3 = vsub.f32 1.0, %v2154_v51 }
0x1464   :  { %v2156_v22 = vmul.f32 %v2728_v42, %v2155_v3 }
0x1466   :  { %v2157_v4 = vadd.f32 %v2728_v42, %v2156_v22  ;;  %1973 = vperm.xlu2 %2584, %v1971_v27  }
0x1468   :  { %v2161_v24 = vsel %vm2160_vm14, %v2728_v42, %v2157_v4 }
0x1469   :  { %v2166_v62 = vsel %vm2163_vm15, %v2165_v31, %v2161_v24 }
0x14a8   :  { %v2170_v49 = vpop.permute.xlu2 %2169 }
0x14a9   :  { %v2172_v59 = vmul.f32 %v2170_v49, %v2166_v62 }
0x14ab   :  { %v2173_v61 = vadd.f32 %v2172_v59, %v2146_v10 }
0x14ad   :  { %2729 = vtanh.f32 %v2173_v61 }
0x14b0   :  { %v894_v25 = vpop.permute.xlu2 %893 }
0x14b1   :  { %vm895_vm2 = vcmp.eq.s32.totalorder %v894_v25, 1 }
0x14b2   :  { %v896_v47 = vsel %vm895_vm2, %v3942_v38, %v680_v12 }
0x14b3   :  { %v2730_v5 = vpop.eup %2729 }
0x14b4   :  { %v2175_v17 = vsub.f32 %v3777_v41, %v2730_v5 }
0x14b6   :  { %2177 = vrot.lane.b32.xlu0 %v2175_v17, %s2839_s3 }
0x14b8   :  { %v1542_v30 = vpop.permute.xlu2 %1541 }
0x14b9   :  { %vm1543_vm6 = vcmp.eq.s32.totalorder %v1542_v30, 1 }
0x14be   :  { %1109 = vperm.xlu0 %2585, %v1107_v44  }
0x14bf   :  { %v1326_v40 = vpop.permute.xlu1 %1325 }
0x14c0   :  { %vm1327_vm4 = vcmp.eq.s32.totalorder %v1326_v40, 1  ;;  %v1974_v1 = vpop.permute.xlu2 %1973 }
0x14c1   :  { %vm1975_vm8 = vcmp.eq.s32.totalorder %v1974_v1, 1 }
0x14c7   :  { %v1758_v60 = vpop.permute.xlu1 %1757 }
0x14c8   :  { %vm1759_vm7 = vcmp.eq.s32.totalorder %v1758_v60, 1 }
0x14cf   :  { %v2190_v29 = vpop.permute.xlu1 %2189 }
0x14d0   :  { %vm2191_vm9 = vcmp.eq.s32.totalorder %v2190_v29, 1 }
0x1528   :  { %v2178_v34 = vpop.permute.xlu0 %2177 }
0x1529   :  { %v2180_v53 = vmul.f32 %v2178_v34, %v2166_v62 }
0x152b   :  { %2182 = vrot.lane.b32.xlu0 %v2180_v53, %s2839_s3 }
0x1530   :  { %v1110_v13 = vpop.permute.xlu0 %1109 }
0x1531   :  { %vm1111_vm3 = vcmp.eq.s32.totalorder %v1110_v13, 1 }
0x1532   :  { %v1112_v21 = vsel %vm1111_vm3, %v3943_v37, %v896_v47 }
0x1533   :  { %v1328_v8 = vsel %vm1327_vm4, %v3594_v57, %v1112_v21  ;;  %v2586_v57 = vld [vmem:[%s3846_s10] ss:$0 sm:$0xff] }
0x1534   :  { %v1544_v32 = vsel %vm1543_vm6, %v3681_v58, %v1328_v8 }
0x1535   :  { %v1760_v33 = vsel %vm1759_vm7, %v3754_v50, %v1544_v32 }
0x1536   :  { %v1976_v45 = vsel %vm1975_vm8, %v3777_v41, %v1760_v33 }
0x159d   :  { %v2183_v48 = vpop.permute.xlu0 %2182 }
0x159e   :  { %v2185_v39 = vadd.f32 %v2730_v5, %v2183_v48 }
0x15a0   :  { %v2192_v56 = vsel %vm2191_vm9, %v2185_v39, %v1976_v45 }
0x15a1   :  { %v2193_v7 = vpack.c.bf16 %v2192_v56, %v2192_v56 }
0x15a3   :  { %2524 = vmatmul.msk.bf16.vlgmr.msrb.gmra.mxu2 %vm283_vm5, %v2193_v7 }
0x1626   :  { %v2242_v58 = vpop.f32.mrf.mxu2 }
0x1627   :  { %v2243_v50 = vadd.f32 %v2586_v57, %v2242_v58 }
0x1629   :  { %2247 = vst.msk [vmem:[#allocation9] sm:$0xff] %vm2246_vm10, %v2243_v50 }
0x162a   :  { %2258 = dma.vmem_to_hbm [thread:$0]  %s2254_s21, 128, %s2256_s24, [#allocation5]  }
0x162e   :  { %v2244_v41 = vpop.f32.mrf.mxu2 }
0x162f   :  { %2831 = dma.done.wait [#allocation5], 128  }
0x1630   :  { %2832 = vsyncadd [#allocation5], 4294967168 }
0x1631   :  { %2263 = vsyncpa [#allocation4], 1 }
0x1632   :  { %2264 = vsyncpa [#allocation7], 1 }
0x1633   :  { %2265 = vsyncpa [#allocation5], 1 }

</bundles_post_ra>
